<compile_context>
chip_gen: v5e
topology: v5e:2x2
jax: 0.10.0
libtpu: 0.0.40
codegen_flags: <defaults>
</compile_context>

<pallas_src>
from functools import partial

import jax
import jax.numpy as jnp
from jax import lax
from jax.experimental import pallas as pl
from jax.experimental.pallas import tpu as pltpu

HIDDEN = 64                       # TSEncoder hidden_dims
OUTPUT = 320                      # TSEncoder output_dims
DEPTH = 10                        # hidden 64->64 ConvBlocks; block #11 is 64->320
KSIZE = 3                         # dilated conv kernel size
FINAL_DILATION = 2 ** DEPTH       # dilation of the final ConvBlock (1024)
ROW_CAP = 2048                    # max Btile*T activation rows per grid step


def _gelu(x):
    # tanh-approx GELU: routes the transcendental to the otherwise-idle EUP slot.
    # torch's default is the exact erf form; |diff| < ~1e-3, inside the bf16-weight
    # tolerance of this kernel.  Use approximate=False to match torch bit-closer.
    return jax.nn.gelu(x, approximate=True)


def _round_up(n, m):
    return ((n + m - 1) // m) * m


def _slab_a_layout(din):
    """Row offsets inside the packed 64-wide bf16 weight slab."""
    dp = _round_up(max(din, 1), 8)            # keep later regions sublane-aligned
    off_fc = 0
    off_w1 = dp
    off_w2 = dp + DEPTH * KSIZE * HIDDEN
    rows = dp + 2 * DEPTH * KSIZE * HIDDEN
    return dp, off_fc, off_w1, off_w2, rows


def _slab_b_layout(center_only):
    """Row offsets inside the packed 320-wide bf16 weight slab (final block)."""
    r1 = HIDDEN if center_only else KSIZE * HIDDEN     # final conv1 rows (cin=64)
    r2 = OUTPUT if center_only else KSIZE * OUTPUT     # final conv2 rows (cin=320)
    off_w1f = 0
    off_wpf = r1
    off_w2f = r1 + HIDDEN
    rows = r1 + HIDDEN + r2
    return off_w1f, off_wpf, off_w2f, rows


def _choose_btile(B, T):
    """Largest batch tile with >=2 grid steps (v7x: 2 TCs) and bounded row count."""
    best = 1
    for bt in range(1, B + 1):
        if B % bt or bt * T > ROW_CAP or (B // bt) < min(2, B):
            continue
        best = bt
    return best


def _make_kernel(T, btile, din):
    M = btile * T
    _, off_fc, off_w1, off_w2, _ = _slab_a_layout(din)
    center_only = FINAL_DILATION >= T
    off_w1f, off_wpf, off_w2f, _ = _slab_b_layout(center_only)

    ROW_FC_B = 0
    ROW_B1 = 1               # rows 1..10  : conv1 biases of hidden blocks
    ROW_B2 = 1 + DEPTH       # rows 11..20 : conv2 biases of hidden blocks
    ROW_B1F, ROW_BPF, ROW_B2F = 0, 1, 2

    def kernel(x_ref, keep_ref, wa_ref, ba_ref, wb_ref, bb_ref,
               regw_ref, regb_ref, o_ref):
        # per-row time index within each sample (row n = b*T + t), hoisted once
        t_idx = lax.broadcasted_iota(jnp.int32, (M, 1), 0) % T

        def dconv(g32, w_ref, w_off, cin, bias, d):
            """Same-padded dilated conv1d (k=3) over flat (M, cin) rows as up to
            three accumulating bf16 MXU dots (no lane-axis concat)."""
            gb = g32.astype(jnp.bfloat16)
            out = jnp.dot(gb, w_ref[w_off + cin:w_off + 2 * cin, :],
                          preferred_element_type=jnp.float32)
            if d < T:
                zero = jnp.zeros_like(gb)
                # x[t-d] tap: head rows (t < d) read zero padding.
                g_l = jnp.where(t_idx >= d, jnp.roll(gb, d, axis=0), zero)
                # x[t+d] tap: tail rows (t >= T-d) read zero padding.
                g_r = jnp.where(t_idx < T - d, jnp.roll(gb, -d, axis=0), zero)
                out = out + jnp.dot(g_l, w_ref[w_off:w_off + cin, :],
                                    preferred_element_type=jnp.float32)
                out = out + jnp.dot(g_r, w_ref[w_off + 2 * cin:w_off + 3 * cin, :],
                                    preferred_element_type=jnp.float32)
            return out + bias

        def last_rows(v):
            """Gather row b*T + (T-1) of every sample via an exact 0/1 f32
            selection matmul (layout-safe for any T / Btile)."""
            col = lax.broadcasted_iota(jnp.int32, (btile, M), 1)
            row = lax.broadcasted_iota(jnp.int32, (btile, M), 0)
            sel = (col == row * T + (T - 1)).astype(jnp.float32)
            return jnp.dot(sel, v, preferred_element_type=jnp.float32)

        # input_fc, then zero rows whose input contained NaN (mask='all_true')
        h = jnp.dot(x_ref[...].astype(jnp.bfloat16),
                    wa_ref[off_fc:off_fc + din, :],
                    preferred_element_type=jnp.float32)
        h = (h + ba_ref[ROW_FC_B]) * keep_ref[...]                      # (M, 64)

        # 10 hidden ConvBlocks (64 -> 64), dilation 2**i, statically unrolled
        for i in range(DEPTH):
            d = 2 ** i
            residual = h
            g = dconv(_gelu(h), wa_ref, off_w1 + i * KSIZE * HIDDEN, HIDDEN,
                      ba_ref[ROW_B1 + i], d)
            g = dconv(_gelu(g), wa_ref, off_w2 + i * KSIZE * HIDDEN, HIDDEN,
                      ba_ref[ROW_B2 + i], d)
            h = g + residual

        # Final ConvBlock (64 -> 320) with 1x1 projector.  Only t = T-1 feeds
        # rep = encoder(x)[:, -1]; when its dilation (1024) >= T the off-center
        # taps read pure zero padding, so one row per sample + center tap suffice.
        if center_only:
            hl = last_rows(h)                                           # (btile, 64)
            res = jnp.dot(hl.astype(jnp.bfloat16),
                          wb_ref[off_wpf:off_wpf + HIDDEN, :],
                          preferred_element_type=jnp.float32) + bb_ref[ROW_BPF]
            g = jnp.dot(_gelu(hl).astype(jnp.bfloat16),
                        wb_ref[off_w1f:off_w1f + HIDDEN, :],
                        preferred_element_type=jnp.float32) + bb_ref[ROW_B1F]
            g = jnp.dot(_gelu(g).astype(jnp.bfloat16),
                        wb_ref[off_w2f:off_w2f + OUTPUT, :],
                        preferred_element_type=jnp.float32) + bb_ref[ROW_B2F]
            rep = g + res                                               # (btile, 320)
        else:
            # General fallback (T > 1024): run the final block on every row.
            res = jnp.dot(h.astype(jnp.bfloat16),
                          wb_ref[off_wpf:off_wpf + HIDDEN, :],
                          preferred_element_type=jnp.float32) + bb_ref[ROW_BPF]
            g = dconv(_gelu(h), wb_ref, off_w1f, HIDDEN, bb_ref[ROW_B1F],
                      FINAL_DILATION)
            g = dconv(_gelu(g), wb_ref, off_w2f, OUTPUT, bb_ref[ROW_B2F],
                      FINAL_DILATION)
            rep = last_rows(g + res)
        # repr_dropout(p=0.1) is identity in eval mode.

        # regressor: (btile, 320) @ (320, enc_in*pred_len)
        y = jnp.dot(rep.astype(jnp.bfloat16), regw_ref[...],
                    preferred_element_type=jnp.float32) + regb_ref[...]
        o_ref[...] = y.astype(o_ref.dtype)

    return kernel


def fused_forward(x, keep, p):
    """x: (B, T, Din) f32 (NaN rows already zeroed); keep: (B, T, 1) f32."""
    B, T, din = x.shape
    n_out = p["reg_w"].shape[1]
    btile = _choose_btile(B, T)
    grid = B // btile
    M = btile * T

    center_only = FINAL_DILATION >= T
    assert p["wb"].shape[0] == _slab_b_layout(center_only)[3], \
        "pack_params() was packed for a different seq_len"

    # Host-side flatten to per-grid-step slabs (free reshapes) so all in-kernel
    # operands are plain 2-D (rows, channels) arrays with full-extent blocks.
    x3 = x.reshape(grid, M, din)
    keep3 = keep.reshape(grid, M, 1)

    rows_a = p["wa"].shape[0]
    rows_ba = p["ba"].shape[0]
    rows_b = p["wb"].shape[0]

    out = pl.pallas_call(
        _make_kernel(T, btile, din),
        out_shape=jax.ShapeDtypeStruct((grid, btile, n_out), jnp.float32),
        grid=(grid,),
        in_specs=[
            pl.BlockSpec((None, M, din), lambda b: (b, 0, 0)),        # activations
            pl.BlockSpec((None, M, 1), lambda b: (b, 0, 0)),          # keep mask
            pl.BlockSpec((rows_a, HIDDEN), lambda b: (0, 0)),         # 64-wide weights (bf16)
            pl.BlockSpec((rows_ba, 1, HIDDEN), lambda b: (0, 0, 0)),  # 64-wide biases (f32)
            pl.BlockSpec((rows_b, OUTPUT), lambda b: (0, 0)),         # 320-wide weights (bf16)
            pl.BlockSpec((3, 1, OUTPUT), lambda b: (0, 0, 0)),        # 320-wide biases (f32)
            pl.BlockSpec((OUTPUT, n_out), lambda b: (0, 0)),          # regressor weight (bf16)
            pl.BlockSpec((1, n_out), lambda b: (0, 0)),               # regressor bias
        ],
        out_specs=pl.BlockSpec((None, btile, n_out), lambda b: (b, 0, 0)),
        compiler_params=pltpu.CompilerParams(
            dimension_semantics=("parallel",)),
    )(x3, keep3, p["wa"], p["ba"], p["wb"], p["bb"], p["reg_w"], p["reg_b"])
    return out.reshape(B, n_out)


# --------------------------------------------------------------------------
# Parameters (synthetic, deterministic) and host-side packing for the kernel.
# --------------------------------------------------------------------------

def init_params(key, enc_in, pred_len):
    """Deterministic synthetic parameters (shapes mirror the PyTorch module)."""
    in_dims = enc_in + 4
    channels = [HIDDEN] * DEPTH + [OUTPUT]
    keys = iter(jax.random.split(key, 4 + 6 * len(channels)))

    def nrm(k, shape, scale=0.05):
        return scale * jax.random.normal(k, shape, dtype=jnp.float32)

    params = {
        "fc_w": nrm(next(keys), (in_dims, HIDDEN)),      # nn.Linear(in_dims, 64)
        "fc_b": nrm(next(keys), (HIDDEN,)),
        "blocks": [],
    }
    cin = HIDDEN
    for i, cout in enumerate(channels):
        final = (i == len(channels) - 1)
        blk = {
            "dilation": 2 ** i,
            "w1": nrm(next(keys), (KSIZE, cin, cout)),   # SamePadConv conv1 taps [-d,0,+d]
            "b1": nrm(next(keys), (cout,)),
            "w2": nrm(next(keys), (KSIZE, cout, cout)),  # SamePadConv conv2
            "b2": nrm(next(keys), (cout,)),
        }
        if cin != cout or final:
            blk["wp"] = nrm(next(keys), (cin, cout))     # 1x1 projector conv
            blk["bp"] = nrm(next(keys), (cout,))
        else:
            next(keys); next(keys)                       # keep key stream deterministic
        params["blocks"].append(blk)
        cin = cout
    params["reg_w"] = nrm(next(keys), (OUTPUT, enc_in * pred_len))   # regressor
    params["reg_b"] = nrm(next(keys), (enc_in * pred_len,))
    return params


def pack_params(params, seq_len):
    """Pack per-layer params into a few coalesced slabs (weights bf16, biases f32)."""
    din = params["fc_w"].shape[0]
    _, off_fc, off_w1, off_w2, rows_a = _slab_a_layout(din)
    center_only = FINAL_DILATION >= seq_len
    off_w1f, off_wpf, off_w2f, rows_b = _slab_b_layout(center_only)

    def taps(w):                                   # (3, cin, cout) -> (3*cin, cout)
        k, cin, cout = w.shape
        return w.reshape(k * cin, cout)

    wa = jnp.zeros((rows_a, HIDDEN), jnp.float32)
    wa = wa.at[off_fc:off_fc + din].set(params["fc_w"])
    ba = jnp.zeros((1 + 2 * DEPTH, 1, HIDDEN), jnp.float32)
    ba = ba.at[0, 0].set(params["fc_b"])
    for i, blk in enumerate(params["blocks"][:DEPTH]):
        r1 = off_w1 + i * KSIZE * HIDDEN
        r2 = off_w2 + i * KSIZE * HIDDEN
        wa = wa.at[r1:r1 + KSIZE * HIDDEN].set(taps(blk["w1"]))
        wa = wa.at[r2:r2 + KSIZE * HIDDEN].set(taps(blk["w2"]))
        ba = ba.at[1 + i, 0].set(blk["b1"])
        ba = ba.at[1 + DEPTH + i, 0].set(blk["b2"])

    final = params["blocks"][DEPTH]
    w1f, w2f = taps(final["w1"]), taps(final["w2"])
    if center_only:                # off-center taps only ever read zero padding
        w1f = w1f[HIDDEN:2 * HIDDEN]            # (64, 320)
        w2f = w2f[OUTPUT:2 * OUTPUT]            # (320, 320)
    wb = jnp.zeros((rows_b, OUTPUT), jnp.float32)
    wb = wb.at[off_w1f:off_w1f + w1f.shape[0]].set(w1f)
    wb = wb.at[off_wpf:off_wpf + HIDDEN].set(final["wp"])
    wb = wb.at[off_w2f:off_w2f + w2f.shape[0]].set(w2f)
    bb = jnp.stack([final["b1"], final["bp"], final["b2"]]).reshape(3, 1, OUTPUT)

    n_out = params["reg_w"].shape[1]
    return {
        "wa": wa.astype(jnp.bfloat16), "ba": ba,
        "wb": wb.astype(jnp.bfloat16), "bb": bb,
        "reg_w": params["reg_w"].astype(jnp.bfloat16),
        "reg_b": params["reg_b"].reshape(1, n_out),
    }


@partial(jax.jit, static_argnames=("enc_in", "pred_len"))
def model_forward(packed, batch_x, batch_x_mark, batch_y, batch_y_mark, *,
                  enc_in, pred_len):
    # batch_y / batch_y_mark are unused by the PyTorch forward as well.
    x = jnp.concatenate([batch_x.astype(jnp.float32),
                         batch_x_mark.astype(jnp.float32)], axis=-1)   # (B, T, enc_in+4)
    # TSEncoder: zero rows containing NaN; mask='all_true' -> keep == nan-free rows.
    nan_row = jnp.isnan(x).any(axis=-1, keepdims=True)                 # (B, T, 1)
    x = jnp.where(nan_row, 0.0, x)
    keep = 1.0 - nan_row.astype(jnp.float32)                           # 0 on NaN rows

    y = fused_forward(x, keep, packed)                                 # (B, enc_in*pred_len)
    return y.reshape(-1, pred_len, enc_in)


if __name__ == "__main__":
    B, seq_len, enc_in, pred_len = 2, 16, 4, 8
    key = jax.random.PRNGKey(0)
    kp, kx, kxm, ky, kym = jax.random.split(key, 5)

    params = init_params(kp, enc_in, pred_len)
    packed = pack_params(params, seq_len)

    batch_x = jax.random.normal(kx, (B, seq_len, enc_in), dtype=jnp.float32)
    batch_x_mark = jax.random.normal(kxm, (B, seq_len, 4), dtype=jnp.float32)
    batch_y = jax.random.normal(ky, (B, pred_len, enc_in), dtype=jnp.float32)
    batch_y_mark = jax.random.normal(kym, (B, pred_len, 4), dtype=jnp.float32)

    out = model_forward(packed, batch_x, batch_x_mark, batch_y, batch_y_mark,
                        enc_in=enc_in, pred_len=pred_len)
    out = jax.block_until_ready(out)
    assert out.shape == (B, pred_len, enc_in), out.shape
    assert jnp.all(jnp.isfinite(out))
    print("KERNEL_OK")
</pallas_src>

<mosaic_0001>
module attributes {stable_mosaic.version = 11 : i64} {
  func.func @kernel(%arg0: i32, %arg1: memref<1x16x8xf32, #tpu.memory_space<vmem>>, %arg2: memref<1x16x1xf32, #tpu.memory_space<vmem>>, %arg3: memref<3848x64xbf16, #tpu.memory_space<vmem>>, %arg4: memref<21x1x64xf32, #tpu.memory_space<vmem>>, %arg5: memref<448x320xbf16, #tpu.memory_space<vmem>>, %arg6: memref<3x1x320xf32, #tpu.memory_space<vmem>>, %arg7: memref<320x32xbf16, #tpu.memory_space<vmem>>, %arg8: memref<1x32xf32, #tpu.memory_space<vmem>>, %arg9: memref<1x1x32xf32, #tpu.memory_space<vmem>>) attributes {dimension_semantics = [#tpu.dimension_semantics<parallel>], iteration_bounds = array<i64: 2>, scalar_prefetch = 0 : i64, scratch_operands = 0 : i64, tpu.core_type = #tpu.core_type<tc>, window_params = [{transform_indices = @transform_0, window_bounds = array<i64: 1, 16, 8>}, {transform_indices = @transform_1, window_bounds = array<i64: 1, 16, 1>}, {pipeline_mode = #tpu.pipeline_mode<synchronous>, transform_indices = @transform_2, window_bounds = array<i64: 3848, 64>}, {pipeline_mode = #tpu.pipeline_mode<synchronous>, transform_indices = @transform_3, window_bounds = array<i64: 21, 1, 64>}, {pipeline_mode = #tpu.pipeline_mode<synchronous>, transform_indices = @transform_4, window_bounds = array<i64: 448, 320>}, {pipeline_mode = #tpu.pipeline_mode<synchronous>, transform_indices = @transform_5, window_bounds = array<i64: 3, 1, 320>}, {pipeline_mode = #tpu.pipeline_mode<synchronous>, transform_indices = @transform_6, window_bounds = array<i64: 320, 32>}, {pipeline_mode = #tpu.pipeline_mode<synchronous>, transform_indices = @transform_7, window_bounds = array<i64: 1, 32>}, {transform_indices = @transform_8, window_bounds = array<i64: 1, 1, 32>}]} {
    %0 = tpu.iota {dimensions = array<i32: 0>} : vector<16x1xi32>
    %c16_i32 = arith.constant 16 : i32
    %c0_i32 = arith.constant 0 : i32
    %1 = arith.cmpi eq, %c16_i32, %c0_i32 : i32
    %c1_i32 = arith.constant 1 : i32
    %2 = arith.select %1, %c1_i32, %c16_i32 : i32
    %3 = vector.broadcast %2 : i32 to vector<16x1xi32>
    %4 = arith.remsi %0, %3 : vector<16x1xi32>
    %c0_i32_0 = arith.constant 0 : i32
    %5 = vector.broadcast %c0_i32_0 : i32 to vector<16x1xi32>
    %6 = arith.cmpi ne, %4, %5 : vector<16x1xi32>
    %c0_i32_1 = arith.constant 0 : i32
    %7 = vector.broadcast %c0_i32_1 : i32 to vector<16x1xi32>
    %8 = arith.cmpi slt, %4, %7 : vector<16x1xi32>
    %c0_i32_2 = arith.constant 0 : i32
    %9 = arith.cmpi slt, %2, %c0_i32_2 : i32
    %10 = vector.broadcast %9 : i1 to vector<16x1xi1>
    %11 = vector.broadcast %10 : vector<16x1xi1> to vector<16x1xi1>
    %12 = arith.xori %8, %11 : vector<16x1xi1>
    %13 = arith.andi %12, %6 : vector<16x1xi1>
    %14 = vector.broadcast %2 : i32 to vector<16x1xi32>
    %15 = arith.addi %4, %14 : vector<16x1xi32>
    %16 = arith.select %13, %15, %4 : vector<16x1xi1>, vector<16x1xi32>
    %c0 = arith.constant 0 : index
    %c0_3 = arith.constant 0 : index
    %c0_4 = arith.constant 0 : index
    %17 = vector.load %arg1[%c0, %c0_3, %c0_4] : memref<1x16x8xf32, #tpu.memory_space<vmem>>, vector<1x16x8xf32>
    %18 = vector.shape_cast %17 : vector<1x16x8xf32> to vector<16x8xf32>
    %19 = arith.truncf %18 : vector<16x8xf32> to vector<16x8xbf16>
    %c0_5 = arith.constant 0 : index
    %c0_6 = arith.constant 0 : index
    %20 = vector.load %arg3[%c0_5, %c0_6] : memref<3848x64xbf16, #tpu.memory_space<vmem>>, vector<8x64xbf16>
    %cst = arith.constant dense<0.000000e+00> : vector<16x64xf32>
    %21 = tpu.matmul %19, %20, %cst {dimension_numbers = #tpu.dot_dimension_numbers<[1], [0], [0], [1], [0, 0, 1, 1], [], []>} : vector<16x8xbf16>, vector<8x64xbf16>, vector<16x64xf32> -> vector<16x64xf32>
    %c0_7 = arith.constant 0 : index
    %c0_8 = arith.constant 0 : index
    %c0_9 = arith.constant 0 : index
    %22 = vector.load %arg4[%c0_7, %c0_8, %c0_9] : memref<21x1x64xf32, #tpu.memory_space<vmem>>, vector<1x1x64xf32>
    %23 = vector.shape_cast %22 : vector<1x1x64xf32> to vector<1x64xf32>
    %24 = vector.broadcast %23 : vector<1x64xf32> to vector<16x64xf32>
    %25 = arith.addf %21, %24 : vector<16x64xf32>
    %c0_10 = arith.constant 0 : index
    %c0_11 = arith.constant 0 : index
    %c0_12 = arith.constant 0 : index
    %26 = vector.load %arg2[%c0_10, %c0_11, %c0_12] : memref<1x16x1xf32, #tpu.memory_space<vmem>>, vector<1x16x1xf32>
    %27 = vector.shape_cast %26 : vector<1x16x1xf32> to vector<16x1xf32>
    %28 = vector.broadcast %27 : vector<16x1xf32> to vector<16x64xf32>
    %29 = arith.mulf %25, %28 : vector<16x64xf32>
    %30 = arith.mulf %29, %29 : vector<16x64xf32>
    %31 = arith.mulf %29, %30 : vector<16x64xf32>
    %cst_13 = arith.constant 4.471500e-02 : f32
    %32 = vector.broadcast %cst_13 : f32 to vector<16x64xf32>
    %33 = arith.mulf %32, %31 : vector<16x64xf32>
    %34 = arith.addf %29, %33 : vector<16x64xf32>
    %cst_14 = arith.constant 0.797884583 : f32
    %35 = vector.broadcast %cst_14 : f32 to vector<16x64xf32>
    %36 = arith.mulf %35, %34 : vector<16x64xf32>
    %37 = math.tanh %36 : vector<16x64xf32>
    %cst_15 = arith.constant 1.000000e+00 : f32
    %38 = vector.broadcast %cst_15 : f32 to vector<16x64xf32>
    %39 = arith.addf %38, %37 : vector<16x64xf32>
    %cst_16 = arith.constant 5.000000e-01 : f32
    %40 = vector.broadcast %cst_16 : f32 to vector<16x64xf32>
    %41 = arith.mulf %40, %39 : vector<16x64xf32>
    %42 = arith.mulf %29, %41 : vector<16x64xf32>
    %c1 = arith.constant 1 : index
    %c0_17 = arith.constant 0 : index
    %c0_18 = arith.constant 0 : index
    %43 = vector.load %arg4[%c1, %c0_17, %c0_18] : memref<21x1x64xf32, #tpu.memory_space<vmem>>, vector<1x1x64xf32>
    %44 = vector.shape_cast %43 : vector<1x1x64xf32> to vector<1x64xf32>
    %45 = arith.truncf %42 : vector<16x64xf32> to vector<16x64xbf16>
    %c72 = arith.constant 72 : index
    %c0_19 = arith.constant 0 : index
    %46 = vector.load %arg3[%c72, %c0_19] : memref<3848x64xbf16, #tpu.memory_space<vmem>>, vector<64x64xbf16>
    %cst_20 = arith.constant dense<0.000000e+00> : vector<16x64xf32>
    %47 = tpu.matmul %45, %46, %cst_20 {dimension_numbers = #tpu.dot_dimension_numbers<[1], [0], [0], [1], [0, 0, 1, 1], [], []>} : vector<16x64xbf16>, vector<64x64xbf16>, vector<16x64xf32> -> vector<16x64xf32>
    %cst_21 = arith.constant 0.000000e+00 : bf16
    %48 = vector.broadcast %cst_21 : bf16 to vector<16x64xbf16>
    %c1_i32_22 = arith.constant 1 : i32
    %49 = vector.broadcast %c1_i32_22 : i32 to vector<16x1xi32>
    %50 = arith.cmpi sge, %16, %49 : vector<16x1xi32>
    %51 = vector.extract_strided_slice %45 {offsets = [15, 0], sizes = [1, 64], strides = [1, 1]} : vector<16x64xbf16> to vector<1x64xbf16>
    %52 = vector.extract_strided_slice %45 {offsets = [0, 0], sizes = [15, 64], strides = [1, 1]} : vector<16x64xbf16> to vector<15x64xbf16>
    %53 = tpu.concatenate %51, %52 in 0 : vector<1x64xbf16>, vector<15x64xbf16> -> vector<16x64xbf16>
    %54 = vector.shape_cast %50 : vector<16x1xi1> to vector<16x1xi1>
    %55 = vector.broadcast %54 : vector<16x1xi1> to vector<16x64xi1>
    %56 = arith.select %55, %53, %48 : vector<16x64xi1>, vector<16x64xbf16>
    %c15_i32 = arith.constant 15 : i32
    %57 = vector.broadcast %c15_i32 : i32 to vector<16x1xi32>
    %58 = arith.cmpi slt, %16, %57 : vector<16x1xi32>
    %59 = vector.extract_strided_slice %45 {offsets = [1, 0], sizes = [15, 64], strides = [1, 1]} : vector<16x64xbf16> to vector<15x64xbf16>
    %60 = vector.extract_strided_slice %45 {offsets = [0, 0], sizes = [1, 64], strides = [1, 1]} : vector<16x64xbf16> to vector<1x64xbf16>
    %61 = tpu.concatenate %59, %60 in 0 : vector<15x64xbf16>, vector<1x64xbf16> -> vector<16x64xbf16>
    %62 = vector.shape_cast %58 : vector<16x1xi1> to vector<16x1xi1>
    %63 = vector.broadcast %62 : vector<16x1xi1> to vector<16x64xi1>
    %64 = arith.select %63, %61, %48 : vector<16x64xi1>, vector<16x64xbf16>
    %c8 = arith.constant 8 : index
    %c0_23 = arith.constant 0 : index
    %65 = vector.load %arg3[%c8, %c0_23] : memref<3848x64xbf16, #tpu.memory_space<vmem>>, vector<64x64xbf16>
    %cst_24 = arith.constant dense<0.000000e+00> : vector<16x64xf32>
    %66 = tpu.matmul %56, %65, %cst_24 {dimension_numbers = #tpu.dot_dimension_numbers<[1], [0], [0], [1], [0, 0, 1, 1], [], []>} : vector<16x64xbf16>, vector<64x64xbf16>, vector<16x64xf32> -> vector<16x64xf32>
    %67 = arith.addf %47, %66 : vector<16x64xf32>
    %c136 = arith.constant 136 : index
    %c0_25 = arith.constant 0 : index
    %68 = vector.load %arg3[%c136, %c0_25] : memref<3848x64xbf16, #tpu.memory_space<vmem>>, vector<64x64xbf16>
    %cst_26 = arith.constant dense<0.000000e+00> : vector<16x64xf32>
    %69 = tpu.matmul %64, %68, %cst_26 {dimension_numbers = #tpu.dot_dimension_numbers<[1], [0], [0], [1], [0, 0, 1, 1], [], []>} : vector<16x64xbf16>, vector<64x64xbf16>, vector<16x64xf32> -> vector<16x64xf32>
    %70 = arith.addf %67, %69 : vector<16x64xf32>
    %71 = vector.broadcast %44 : vector<1x64xf32> to vector<16x64xf32>
    %72 = arith.addf %70, %71 : vector<16x64xf32>
    %73 = arith.mulf %72, %72 : vector<16x64xf32>
    %74 = arith.mulf %72, %73 : vector<16x64xf32>
    %cst_27 = arith.constant 4.471500e-02 : f32
    %75 = vector.broadcast %cst_27 : f32 to vector<16x64xf32>
    %76 = arith.mulf %75, %74 : vector<16x64xf32>
    %77 = arith.addf %72, %76 : vector<16x64xf32>
    %cst_28 = arith.constant 0.797884583 : f32
    %78 = vector.broadcast %cst_28 : f32 to vector<16x64xf32>
    %79 = arith.mulf %78, %77 : vector<16x64xf32>
    %80 = math.tanh %79 : vector<16x64xf32>
    %cst_29 = arith.constant 1.000000e+00 : f32
    %81 = vector.broadcast %cst_29 : f32 to vector<16x64xf32>
    %82 = arith.addf %81, %80 : vector<16x64xf32>
    %cst_30 = arith.constant 5.000000e-01 : f32
    %83 = vector.broadcast %cst_30 : f32 to vector<16x64xf32>
    %84 = arith.mulf %83, %82 : vector<16x64xf32>
    %85 = arith.mulf %72, %84 : vector<16x64xf32>
    %c11 = arith.constant 11 : index
    %c0_31 = arith.constant 0 : index
    %c0_32 = arith.constant 0 : index
    %86 = vector.load %arg4[%c11, %c0_31, %c0_32] : memref<21x1x64xf32, #tpu.memory_space<vmem>>, vector<1x1x64xf32>
    %87 = vector.shape_cast %86 : vector<1x1x64xf32> to vector<1x64xf32>
    %88 = arith.truncf %85 : vector<16x64xf32> to vector<16x64xbf16>
    %c1992 = arith.constant 1992 : index
    %c0_33 = arith.constant 0 : index
    %89 = vector.load %arg3[%c1992, %c0_33] : memref<3848x64xbf16, #tpu.memory_space<vmem>>, vector<64x64xbf16>
    %cst_34 = arith.constant dense<0.000000e+00> : vector<16x64xf32>
    %90 = tpu.matmul %88, %89, %cst_34 {dimension_numbers = #tpu.dot_dimension_numbers<[1], [0], [0], [1], [0, 0, 1, 1], [], []>} : vector<16x64xbf16>, vector<64x64xbf16>, vector<16x64xf32> -> vector<16x64xf32>
    %cst_35 = arith.constant 0.000000e+00 : bf16
    %91 = vector.broadcast %cst_35 : bf16 to vector<16x64xbf16>
    %c1_i32_36 = arith.constant 1 : i32
    %92 = vector.broadcast %c1_i32_36 : i32 to vector<16x1xi32>
    %93 = arith.cmpi sge, %16, %92 : vector<16x1xi32>
    %94 = vector.extract_strided_slice %88 {offsets = [15, 0], sizes = [1, 64], strides = [1, 1]} : vector<16x64xbf16> to vector<1x64xbf16>
    %95 = vector.extract_strided_slice %88 {offsets = [0, 0], sizes = [15, 64], strides = [1, 1]} : vector<16x64xbf16> to vector<15x64xbf16>
    %96 = tpu.concatenate %94, %95 in 0 : vector<1x64xbf16>, vector<15x64xbf16> -> vector<16x64xbf16>
    %97 = vector.shape_cast %93 : vector<16x1xi1> to vector<16x1xi1>
    %98 = vector.broadcast %97 : vector<16x1xi1> to vector<16x64xi1>
    %99 = arith.select %98, %96, %91 : vector<16x64xi1>, vector<16x64xbf16>
    %c15_i32_37 = arith.constant 15 : i32
    %100 = vector.broadcast %c15_i32_37 : i32 to vector<16x1xi32>
    %101 = arith.cmpi slt, %16, %100 : vector<16x1xi32>
    %102 = vector.extract_strided_slice %88 {offsets = [1, 0], sizes = [15, 64], strides = [1, 1]} : vector<16x64xbf16> to vector<15x64xbf16>
    %103 = vector.extract_strided_slice %88 {offsets = [0, 0], sizes = [1, 64], strides = [1, 1]} : vector<16x64xbf16> to vector<1x64xbf16>
    %104 = tpu.concatenate %102, %103 in 0 : vector<15x64xbf16>, vector<1x64xbf16> -> vector<16x64xbf16>
    %105 = vector.shape_cast %101 : vector<16x1xi1> to vector<16x1xi1>
    %106 = vector.broadcast %105 : vector<16x1xi1> to vector<16x64xi1>
    %107 = arith.select %106, %104, %91 : vector<16x64xi1>, vector<16x64xbf16>
    %c1928 = arith.constant 1928 : index
    %c0_38 = arith.constant 0 : index
    %108 = vector.load %arg3[%c1928, %c0_38] : memref<3848x64xbf16, #tpu.memory_space<vmem>>, vector<64x64xbf16>
    %cst_39 = arith.constant dense<0.000000e+00> : vector<16x64xf32>
    %109 = tpu.matmul %99, %108, %cst_39 {dimension_numbers = #tpu.dot_dimension_numbers<[1], [0], [0], [1], [0, 0, 1, 1], [], []>} : vector<16x64xbf16>, vector<64x64xbf16>, vector<16x64xf32> -> vector<16x64xf32>
    %110 = arith.addf %90, %109 : vector<16x64xf32>
    %c2056 = arith.constant 2056 : index
    %c0_40 = arith.constant 0 : index
    %111 = vector.load %arg3[%c2056, %c0_40] : memref<3848x64xbf16, #tpu.memory_space<vmem>>, vector<64x64xbf16>
    %cst_41 = arith.constant dense<0.000000e+00> : vector<16x64xf32>
    %112 = tpu.matmul %107, %111, %cst_41 {dimension_numbers = #tpu.dot_dimension_numbers<[1], [0], [0], [1], [0, 0, 1, 1], [], []>} : vector<16x64xbf16>, vector<64x64xbf16>, vector<16x64xf32> -> vector<16x64xf32>
    %113 = arith.addf %110, %112 : vector<16x64xf32>
    %114 = vector.broadcast %87 : vector<1x64xf32> to vector<16x64xf32>
    %115 = arith.addf %113, %114 : vector<16x64xf32>
    %116 = arith.addf %115, %29 : vector<16x64xf32>
    %117 = arith.mulf %116, %116 : vector<16x64xf32>
    %118 = arith.mulf %116, %117 : vector<16x64xf32>
    %cst_42 = arith.constant 4.471500e-02 : f32
    %119 = vector.broadcast %cst_42 : f32 to vector<16x64xf32>
    %120 = arith.mulf %119, %118 : vector<16x64xf32>
    %121 = arith.addf %116, %120 : vector<16x64xf32>
    %cst_43 = arith.constant 0.797884583 : f32
    %122 = vector.broadcast %cst_43 : f32 to vector<16x64xf32>
    %123 = arith.mulf %122, %121 : vector<16x64xf32>
    %124 = math.tanh %123 : vector<16x64xf32>
    %cst_44 = arith.constant 1.000000e+00 : f32
    %125 = vector.broadcast %cst_44 : f32 to vector<16x64xf32>
    %126 = arith.addf %125, %124 : vector<16x64xf32>
    %cst_45 = arith.constant 5.000000e-01 : f32
    %127 = vector.broadcast %cst_45 : f32 to vector<16x64xf32>
    %128 = arith.mulf %127, %126 : vector<16x64xf32>
    %129 = arith.mulf %116, %128 : vector<16x64xf32>
    %c2 = arith.constant 2 : index
    %c0_46 = arith.constant 0 : index
    %c0_47 = arith.constant 0 : index
    %130 = vector.load %arg4[%c2, %c0_46, %c0_47] : memref<21x1x64xf32, #tpu.memory_space<vmem>>, vector<1x1x64xf32>
    %131 = vector.shape_cast %130 : vector<1x1x64xf32> to vector<1x64xf32>
    %132 = arith.truncf %129 : vector<16x64xf32> to vector<16x64xbf16>
    %c264 = arith.constant 264 : index
    %c0_48 = arith.constant 0 : index
    %133 = vector.load %arg3[%c264, %c0_48] : memref<3848x64xbf16, #tpu.memory_space<vmem>>, vector<64x64xbf16>
    %cst_49 = arith.constant dense<0.000000e+00> : vector<16x64xf32>
    %134 = tpu.matmul %132, %133, %cst_49 {dimension_numbers = #tpu.dot_dimension_numbers<[1], [0], [0], [1], [0, 0, 1, 1], [], []>} : vector<16x64xbf16>, vector<64x64xbf16>, vector<16x64xf32> -> vector<16x64xf32>
    %cst_50 = arith.constant 0.000000e+00 : bf16
    %135 = vector.broadcast %cst_50 : bf16 to vector<16x64xbf16>
    %c2_i32 = arith.constant 2 : i32
    %136 = vector.broadcast %c2_i32 : i32 to vector<16x1xi32>
    %137 = arith.cmpi sge, %16, %136 : vector<16x1xi32>
    %138 = vector.extract_strided_slice %132 {offsets = [14, 0], sizes = [2, 64], strides = [1, 1]} : vector<16x64xbf16> to vector<2x64xbf16>
    %139 = vector.extract_strided_slice %132 {offsets = [0, 0], sizes = [14, 64], strides = [1, 1]} : vector<16x64xbf16> to vector<14x64xbf16>
    %140 = tpu.concatenate %138, %139 in 0 : vector<2x64xbf16>, vector<14x64xbf16> -> vector<16x64xbf16>
    %141 = vector.shape_cast %137 : vector<16x1xi1> to vector<16x1xi1>
    %142 = vector.broadcast %141 : vector<16x1xi1> to vector<16x64xi1>
    %143 = arith.select %142, %140, %135 : vector<16x64xi1>, vector<16x64xbf16>
    %c14_i32 = arith.constant 14 : i32
    %144 = vector.broadcast %c14_i32 : i32 to vector<16x1xi32>
    %145 = arith.cmpi slt, %16, %144 : vector<16x1xi32>
    %146 = vector.extract_strided_slice %132 {offsets = [2, 0], sizes = [14, 64], strides = [1, 1]} : vector<16x64xbf16> to vector<14x64xbf16>
    %147 = vector.extract_strided_slice %132 {offsets = [0, 0], sizes = [2, 64], strides = [1, 1]} : vector<16x64xbf16> to vector<2x64xbf16>
    %148 = tpu.concatenate %146, %147 in 0 : vector<14x64xbf16>, vector<2x64xbf16> -> vector<16x64xbf16>
    %149 = vector.shape_cast %145 : vector<16x1xi1> to vector<16x1xi1>
    %150 = vector.broadcast %149 : vector<16x1xi1> to vector<16x64xi1>
    %151 = arith.select %150, %148, %135 : vector<16x64xi1>, vector<16x64xbf16>
    %c200 = arith.constant 200 : index
    %c0_51 = arith.constant 0 : index
    %152 = vector.load %arg3[%c200, %c0_51] : memref<3848x64xbf16, #tpu.memory_space<vmem>>, vector<64x64xbf16>
    %cst_52 = arith.constant dense<0.000000e+00> : vector<16x64xf32>
    %153 = tpu.matmul %143, %152, %cst_52 {dimension_numbers = #tpu.dot_dimension_numbers<[1], [0], [0], [1], [0, 0, 1, 1], [], []>} : vector<16x64xbf16>, vector<64x64xbf16>, vector<16x64xf32> -> vector<16x64xf32>
    %154 = arith.addf %134, %153 : vector<16x64xf32>
    %c328 = arith.constant 328 : index
    %c0_53 = arith.constant 0 : index
    %155 = vector.load %arg3[%c328, %c0_53] : memref<3848x64xbf16, #tpu.memory_space<vmem>>, vector<64x64xbf16>
    %cst_54 = arith.constant dense<0.000000e+00> : vector<16x64xf32>
    %156 = tpu.matmul %151, %155, %cst_54 {dimension_numbers = #tpu.dot_dimension_numbers<[1], [0], [0], [1], [0, 0, 1, 1], [], []>} : vector<16x64xbf16>, vector<64x64xbf16>, vector<16x64xf32> -> vector<16x64xf32>
    %157 = arith.addf %154, %156 : vector<16x64xf32>
    %158 = vector.broadcast %131 : vector<1x64xf32> to vector<16x64xf32>
    %159 = arith.addf %157, %158 : vector<16x64xf32>
    %160 = arith.mulf %159, %159 : vector<16x64xf32>
    %161 = arith.mulf %159, %160 : vector<16x64xf32>
    %cst_55 = arith.constant 4.471500e-02 : f32
    %162 = vector.broadcast %cst_55 : f32 to vector<16x64xf32>
    %163 = arith.mulf %162, %161 : vector<16x64xf32>
    %164 = arith.addf %159, %163 : vector<16x64xf32>
    %cst_56 = arith.constant 0.797884583 : f32
    %165 = vector.broadcast %cst_56 : f32 to vector<16x64xf32>
    %166 = arith.mulf %165, %164 : vector<16x64xf32>
    %167 = math.tanh %166 : vector<16x64xf32>
    %cst_57 = arith.constant 1.000000e+00 : f32
    %168 = vector.broadcast %cst_57 : f32 to vector<16x64xf32>
    %169 = arith.addf %168, %167 : vector<16x64xf32>
    %cst_58 = arith.constant 5.000000e-01 : f32
    %170 = vector.broadcast %cst_58 : f32 to vector<16x64xf32>
    %171 = arith.mulf %170, %169 : vector<16x64xf32>
    %172 = arith.mulf %159, %171 : vector<16x64xf32>
    %c12 = arith.constant 12 : index
    %c0_59 = arith.constant 0 : index
    %c0_60 = arith.constant 0 : index
    %173 = vector.load %arg4[%c12, %c0_59, %c0_60] : memref<21x1x64xf32, #tpu.memory_space<vmem>>, vector<1x1x64xf32>
    %174 = vector.shape_cast %173 : vector<1x1x64xf32> to vector<1x64xf32>
    %175 = arith.truncf %172 : vector<16x64xf32> to vector<16x64xbf16>
    %c2184 = arith.constant 2184 : index
    %c0_61 = arith.constant 0 : index
    %176 = vector.load %arg3[%c2184, %c0_61] : memref<3848x64xbf16, #tpu.memory_space<vmem>>, vector<64x64xbf16>
    %cst_62 = arith.constant dense<0.000000e+00> : vector<16x64xf32>
    %177 = tpu.matmul %175, %176, %cst_62 {dimension_numbers = #tpu.dot_dimension_numbers<[1], [0], [0], [1], [0, 0, 1, 1], [], []>} : vector<16x64xbf16>, vector<64x64xbf16>, vector<16x64xf32> -> vector<16x64xf32>
    %cst_63 = arith.constant 0.000000e+00 : bf16
    %178 = vector.broadcast %cst_63 : bf16 to vector<16x64xbf16>
    %c2_i32_64 = arith.constant 2 : i32
    %179 = vector.broadcast %c2_i32_64 : i32 to vector<16x1xi32>
    %180 = arith.cmpi sge, %16, %179 : vector<16x1xi32>
    %181 = vector.extract_strided_slice %175 {offsets = [14, 0], sizes = [2, 64], strides = [1, 1]} : vector<16x64xbf16> to vector<2x64xbf16>
    %182 = vector.extract_strided_slice %175 {offsets = [0, 0], sizes = [14, 64], strides = [1, 1]} : vector<16x64xbf16> to vector<14x64xbf16>
    %183 = tpu.concatenate %181, %182 in 0 : vector<2x64xbf16>, vector<14x64xbf16> -> vector<16x64xbf16>
    %184 = vector.shape_cast %180 : vector<16x1xi1> to vector<16x1xi1>
    %185 = vector.broadcast %184 : vector<16x1xi1> to vector<16x64xi1>
    %186 = arith.select %185, %183, %178 : vector<16x64xi1>, vector<16x64xbf16>
    %c14_i32_65 = arith.constant 14 : i32
    %187 = vector.broadcast %c14_i32_65 : i32 to vector<16x1xi32>
    %188 = arith.cmpi slt, %16, %187 : vector<16x1xi32>
    %189 = vector.extract_strided_slice %175 {offsets = [2, 0], sizes = [14, 64], strides = [1, 1]} : vector<16x64xbf16> to vector<14x64xbf16>
    %190 = vector.extract_strided_slice %175 {offsets = [0, 0], sizes = [2, 64], strides = [1, 1]} : vector<16x64xbf16> to vector<2x64xbf16>
    %191 = tpu.concatenate %189, %190 in 0 : vector<14x64xbf16>, vector<2x64xbf16> -> vector<16x64xbf16>
    %192 = vector.shape_cast %188 : vector<16x1xi1> to vector<16x1xi1>
    %193 = vector.broadcast %192 : vector<16x1xi1> to vector<16x64xi1>
    %194 = arith.select %193, %191, %178 : vector<16x64xi1>, vector<16x64xbf16>
    %c2120 = arith.constant 2120 : index
    %c0_66 = arith.constant 0 : index
    %195 = vector.load %arg3[%c2120, %c0_66] : memref<3848x64xbf16, #tpu.memory_space<vmem>>, vector<64x64xbf16>
    %cst_67 = arith.constant dense<0.000000e+00> : vector<16x64xf32>
    %196 = tpu.matmul %186, %195, %cst_67 {dimension_numbers = #tpu.dot_dimension_numbers<[1], [0], [0], [1], [0, 0, 1, 1], [], []>} : vector<16x64xbf16>, vector<64x64xbf16>, vector<16x64xf32> -> vector<16x64xf32>
    %197 = arith.addf %177, %196 : vector<16x64xf32>
    %c2248 = arith.constant 2248 : index
    %c0_68 = arith.constant 0 : index
    %198 = vector.load %arg3[%c2248, %c0_68] : memref<3848x64xbf16, #tpu.memory_space<vmem>>, vector<64x64xbf16>
    %cst_69 = arith.constant dense<0.000000e+00> : vector<16x64xf32>
    %199 = tpu.matmul %194, %198, %cst_69 {dimension_numbers = #tpu.dot_dimension_numbers<[1], [0], [0], [1], [0, 0, 1, 1], [], []>} : vector<16x64xbf16>, vector<64x64xbf16>, vector<16x64xf32> -> vector<16x64xf32>
    %200 = arith.addf %197, %199 : vector<16x64xf32>
    %201 = vector.broadcast %174 : vector<1x64xf32> to vector<16x64xf32>
    %202 = arith.addf %200, %201 : vector<16x64xf32>
    %203 = arith.addf %202, %116 : vector<16x64xf32>
    %204 = arith.mulf %203, %203 : vector<16x64xf32>
    %205 = arith.mulf %203, %204 : vector<16x64xf32>
    %cst_70 = arith.constant 4.471500e-02 : f32
    %206 = vector.broadcast %cst_70 : f32 to vector<16x64xf32>
    %207 = arith.mulf %206, %205 : vector<16x64xf32>
    %208 = arith.addf %203, %207 : vector<16x64xf32>
    %cst_71 = arith.constant 0.797884583 : f32
    %209 = vector.broadcast %cst_71 : f32 to vector<16x64xf32>
    %210 = arith.mulf %209, %208 : vector<16x64xf32>
    %211 = math.tanh %210 : vector<16x64xf32>
    %cst_72 = arith.constant 1.000000e+00 : f32
    %212 = vector.broadcast %cst_72 : f32 to vector<16x64xf32>
    %213 = arith.addf %212, %211 : vector<16x64xf32>
    %cst_73 = arith.constant 5.000000e-01 : f32
    %214 = vector.broadcast %cst_73 : f32 to vector<16x64xf32>
    %215 = arith.mulf %214, %213 : vector<16x64xf32>
    %216 = arith.mulf %203, %215 : vector<16x64xf32>
    %c3 = arith.constant 3 : index
    %c0_74 = arith.constant 0 : index
    %c0_75 = arith.constant 0 : index
    %217 = vector.load %arg4[%c3, %c0_74, %c0_75] : memref<21x1x64xf32, #tpu.memory_space<vmem>>, vector<1x1x64xf32>
    %218 = vector.shape_cast %217 : vector<1x1x64xf32> to vector<1x64xf32>
    %219 = arith.truncf %216 : vector<16x64xf32> to vector<16x64xbf16>
    %c456 = arith.constant 456 : index
    %c0_76 = arith.constant 0 : index
    %220 = vector.load %arg3[%c456, %c0_76] : memref<3848x64xbf16, #tpu.memory_space<vmem>>, vector<64x64xbf16>
    %cst_77 = arith.constant dense<0.000000e+00> : vector<16x64xf32>
    %221 = tpu.matmul %219, %220, %cst_77 {dimension_numbers = #tpu.dot_dimension_numbers<[1], [0], [0], [1], [0, 0, 1, 1], [], []>} : vector<16x64xbf16>, vector<64x64xbf16>, vector<16x64xf32> -> vector<16x64xf32>
    %cst_78 = arith.constant 0.000000e+00 : bf16
    %222 = vector.broadcast %cst_78 : bf16 to vector<16x64xbf16>
    %c4_i32 = arith.constant 4 : i32
    %223 = vector.broadcast %c4_i32 : i32 to vector<16x1xi32>
    %224 = arith.cmpi sge, %16, %223 : vector<16x1xi32>
    %225 = vector.extract_strided_slice %219 {offsets = [12, 0], sizes = [4, 64], strides = [1, 1]} : vector<16x64xbf16> to vector<4x64xbf16>
    %226 = vector.extract_strided_slice %219 {offsets = [0, 0], sizes = [12, 64], strides = [1, 1]} : vector<16x64xbf16> to vector<12x64xbf16>
    %227 = tpu.concatenate %225, %226 in 0 : vector<4x64xbf16>, vector<12x64xbf16> -> vector<16x64xbf16>
    %228 = vector.shape_cast %224 : vector<16x1xi1> to vector<16x1xi1>
    %229 = vector.broadcast %228 : vector<16x1xi1> to vector<16x64xi1>
    %230 = arith.select %229, %227, %222 : vector<16x64xi1>, vector<16x64xbf16>
    %c12_i32 = arith.constant 12 : i32
    %231 = vector.broadcast %c12_i32 : i32 to vector<16x1xi32>
    %232 = arith.cmpi slt, %16, %231 : vector<16x1xi32>
    %233 = vector.extract_strided_slice %219 {offsets = [4, 0], sizes = [12, 64], strides = [1, 1]} : vector<16x64xbf16> to vector<12x64xbf16>
    %234 = vector.extract_strided_slice %219 {offsets = [0, 0], sizes = [4, 64], strides = [1, 1]} : vector<16x64xbf16> to vector<4x64xbf16>
    %235 = tpu.concatenate %233, %234 in 0 : vector<12x64xbf16>, vector<4x64xbf16> -> vector<16x64xbf16>
    %236 = vector.shape_cast %232 : vector<16x1xi1> to vector<16x1xi1>
    %237 = vector.broadcast %236 : vector<16x1xi1> to vector<16x64xi1>
    %238 = arith.select %237, %235, %222 : vector<16x64xi1>, vector<16x64xbf16>
    %c392 = arith.constant 392 : index
    %c0_79 = arith.constant 0 : index
    %239 = vector.load %arg3[%c392, %c0_79] : memref<3848x64xbf16, #tpu.memory_space<vmem>>, vector<64x64xbf16>
    %cst_80 = arith.constant dense<0.000000e+00> : vector<16x64xf32>
    %240 = tpu.matmul %230, %239, %cst_80 {dimension_numbers = #tpu.dot_dimension_numbers<[1], [0], [0], [1], [0, 0, 1, 1], [], []>} : vector<16x64xbf16>, vector<64x64xbf16>, vector<16x64xf32> -> vector<16x64xf32>
    %241 = arith.addf %221, %240 : vector<16x64xf32>
    %c520 = arith.constant 520 : index
    %c0_81 = arith.constant 0 : index
    %242 = vector.load %arg3[%c520, %c0_81] : memref<3848x64xbf16, #tpu.memory_space<vmem>>, vector<64x64xbf16>
    %cst_82 = arith.constant dense<0.000000e+00> : vector<16x64xf32>
    %243 = tpu.matmul %238, %242, %cst_82 {dimension_numbers = #tpu.dot_dimension_numbers<[1], [0], [0], [1], [0, 0, 1, 1], [], []>} : vector<16x64xbf16>, vector<64x64xbf16>, vector<16x64xf32> -> vector<16x64xf32>
    %244 = arith.addf %241, %243 : vector<16x64xf32>
    %245 = vector.broadcast %218 : vector<1x64xf32> to vector<16x64xf32>
    %246 = arith.addf %244, %245 : vector<16x64xf32>
    %247 = arith.mulf %246, %246 : vector<16x64xf32>
    %248 = arith.mulf %246, %247 : vector<16x64xf32>
    %cst_83 = arith.constant 4.471500e-02 : f32
    %249 = vector.broadcast %cst_83 : f32 to vector<16x64xf32>
    %250 = arith.mulf %249, %248 : vector<16x64xf32>
    %251 = arith.addf %246, %250 : vector<16x64xf32>
    %cst_84 = arith.constant 0.797884583 : f32
    %252 = vector.broadcast %cst_84 : f32 to vector<16x64xf32>
    %253 = arith.mulf %252, %251 : vector<16x64xf32>
    %254 = math.tanh %253 : vector<16x64xf32>
    %cst_85 = arith.constant 1.000000e+00 : f32
    %255 = vector.broadcast %cst_85 : f32 to vector<16x64xf32>
    %256 = arith.addf %255, %254 : vector<16x64xf32>
    %cst_86 = arith.constant 5.000000e-01 : f32
    %257 = vector.broadcast %cst_86 : f32 to vector<16x64xf32>
    %258 = arith.mulf %257, %256 : vector<16x64xf32>
    %259 = arith.mulf %246, %258 : vector<16x64xf32>
    %c13 = arith.constant 13 : index
    %c0_87 = arith.constant 0 : index
    %c0_88 = arith.constant 0 : index
    %260 = vector.load %arg4[%c13, %c0_87, %c0_88] : memref<21x1x64xf32, #tpu.memory_space<vmem>>, vector<1x1x64xf32>
    %261 = vector.shape_cast %260 : vector<1x1x64xf32> to vector<1x64xf32>
    %262 = arith.truncf %259 : vector<16x64xf32> to vector<16x64xbf16>
    %c2376 = arith.constant 2376 : index
    %c0_89 = arith.constant 0 : index
    %263 = vector.load %arg3[%c2376, %c0_89] : memref<3848x64xbf16, #tpu.memory_space<vmem>>, vector<64x64xbf16>
    %cst_90 = arith.constant dense<0.000000e+00> : vector<16x64xf32>
    %264 = tpu.matmul %262, %263, %cst_90 {dimension_numbers = #tpu.dot_dimension_numbers<[1], [0], [0], [1], [0, 0, 1, 1], [], []>} : vector<16x64xbf16>, vector<64x64xbf16>, vector<16x64xf32> -> vector<16x64xf32>
    %cst_91 = arith.constant 0.000000e+00 : bf16
    %265 = vector.broadcast %cst_91 : bf16 to vector<16x64xbf16>
    %c4_i32_92 = arith.constant 4 : i32
    %266 = vector.broadcast %c4_i32_92 : i32 to vector<16x1xi32>
    %267 = arith.cmpi sge, %16, %266 : vector<16x1xi32>
    %268 = vector.extract_strided_slice %262 {offsets = [12, 0], sizes = [4, 64], strides = [1, 1]} : vector<16x64xbf16> to vector<4x64xbf16>
    %269 = vector.extract_strided_slice %262 {offsets = [0, 0], sizes = [12, 64], strides = [1, 1]} : vector<16x64xbf16> to vector<12x64xbf16>
    %270 = tpu.concatenate %268, %269 in 0 : vector<4x64xbf16>, vector<12x64xbf16> -> vector<16x64xbf16>
    %271 = vector.shape_cast %267 : vector<16x1xi1> to vector<16x1xi1>
    %272 = vector.broadcast %271 : vector<16x1xi1> to vector<16x64xi1>
    %273 = arith.select %272, %270, %265 : vector<16x64xi1>, vector<16x64xbf16>
    %c12_i32_93 = arith.constant 12 : i32
    %274 = vector.broadcast %c12_i32_93 : i32 to vector<16x1xi32>
    %275 = arith.cmpi slt, %16, %274 : vector<16x1xi32>
    %276 = vector.extract_strided_slice %262 {offsets = [4, 0], sizes = [12, 64], strides = [1, 1]} : vector<16x64xbf16> to vector<12x64xbf16>
    %277 = vector.extract_strided_slice %262 {offsets = [0, 0], sizes = [4, 64], strides = [1, 1]} : vector<16x64xbf16> to vector<4x64xbf16>
    %278 = tpu.concatenate %276, %277 in 0 : vector<12x64xbf16>, vector<4x64xbf16> -> vector<16x64xbf16>
    %279 = vector.shape_cast %275 : vector<16x1xi1> to vector<16x1xi1>
    %280 = vector.broadcast %279 : vector<16x1xi1> to vector<16x64xi1>
    %281 = arith.select %280, %278, %265 : vector<16x64xi1>, vector<16x64xbf16>
    %c2312 = arith.constant 2312 : index
    %c0_94 = arith.constant 0 : index
    %282 = vector.load %arg3[%c2312, %c0_94] : memref<3848x64xbf16, #tpu.memory_space<vmem>>, vector<64x64xbf16>
    %cst_95 = arith.constant dense<0.000000e+00> : vector<16x64xf32>
    %283 = tpu.matmul %273, %282, %cst_95 {dimension_numbers = #tpu.dot_dimension_numbers<[1], [0], [0], [1], [0, 0, 1, 1], [], []>} : vector<16x64xbf16>, vector<64x64xbf16>, vector<16x64xf32> -> vector<16x64xf32>
    %284 = arith.addf %264, %283 : vector<16x64xf32>
    %c2440 = arith.constant 2440 : index
    %c0_96 = arith.constant 0 : index
    %285 = vector.load %arg3[%c2440, %c0_96] : memref<3848x64xbf16, #tpu.memory_space<vmem>>, vector<64x64xbf16>
    %cst_97 = arith.constant dense<0.000000e+00> : vector<16x64xf32>
    %286 = tpu.matmul %281, %285, %cst_97 {dimension_numbers = #tpu.dot_dimension_numbers<[1], [0], [0], [1], [0, 0, 1, 1], [], []>} : vector<16x64xbf16>, vector<64x64xbf16>, vector<16x64xf32> -> vector<16x64xf32>
    %287 = arith.addf %284, %286 : vector<16x64xf32>
    %288 = vector.broadcast %261 : vector<1x64xf32> to vector<16x64xf32>
    %289 = arith.addf %287, %288 : vector<16x64xf32>
    %290 = arith.addf %289, %203 : vector<16x64xf32>
    %291 = arith.mulf %290, %290 : vector<16x64xf32>
    %292 = arith.mulf %290, %291 : vector<16x64xf32>
    %cst_98 = arith.constant 4.471500e-02 : f32
    %293 = vector.broadcast %cst_98 : f32 to vector<16x64xf32>
    %294 = arith.mulf %293, %292 : vector<16x64xf32>
    %295 = arith.addf %290, %294 : vector<16x64xf32>
    %cst_99 = arith.constant 0.797884583 : f32
    %296 = vector.broadcast %cst_99 : f32 to vector<16x64xf32>
    %297 = arith.mulf %296, %295 : vector<16x64xf32>
    %298 = math.tanh %297 : vector<16x64xf32>
    %cst_100 = arith.constant 1.000000e+00 : f32
    %299 = vector.broadcast %cst_100 : f32 to vector<16x64xf32>
    %300 = arith.addf %299, %298 : vector<16x64xf32>
    %cst_101 = arith.constant 5.000000e-01 : f32
    %301 = vector.broadcast %cst_101 : f32 to vector<16x64xf32>
    %302 = arith.mulf %301, %300 : vector<16x64xf32>
    %303 = arith.mulf %290, %302 : vector<16x64xf32>
    %c4 = arith.constant 4 : index
    %c0_102 = arith.constant 0 : index
    %c0_103 = arith.constant 0 : index
    %304 = vector.load %arg4[%c4, %c0_102, %c0_103] : memref<21x1x64xf32, #tpu.memory_space<vmem>>, vector<1x1x64xf32>
    %305 = vector.shape_cast %304 : vector<1x1x64xf32> to vector<1x64xf32>
    %306 = arith.truncf %303 : vector<16x64xf32> to vector<16x64xbf16>
    %c648 = arith.constant 648 : index
    %c0_104 = arith.constant 0 : index
    %307 = vector.load %arg3[%c648, %c0_104] : memref<3848x64xbf16, #tpu.memory_space<vmem>>, vector<64x64xbf16>
    %cst_105 = arith.constant dense<0.000000e+00> : vector<16x64xf32>
    %308 = tpu.matmul %306, %307, %cst_105 {dimension_numbers = #tpu.dot_dimension_numbers<[1], [0], [0], [1], [0, 0, 1, 1], [], []>} : vector<16x64xbf16>, vector<64x64xbf16>, vector<16x64xf32> -> vector<16x64xf32>
    %cst_106 = arith.constant 0.000000e+00 : bf16
    %309 = vector.broadcast %cst_106 : bf16 to vector<16x64xbf16>
    %c8_i32 = arith.constant 8 : i32
    %310 = vector.broadcast %c8_i32 : i32 to vector<16x1xi32>
    %311 = arith.cmpi sge, %16, %310 : vector<16x1xi32>
    %312 = vector.extract_strided_slice %306 {offsets = [8, 0], sizes = [8, 64], strides = [1, 1]} : vector<16x64xbf16> to vector<8x64xbf16>
    %313 = vector.extract_strided_slice %306 {offsets = [0, 0], sizes = [8, 64], strides = [1, 1]} : vector<16x64xbf16> to vector<8x64xbf16>
    %314 = tpu.concatenate %312, %313 in 0 : vector<8x64xbf16>, vector<8x64xbf16> -> vector<16x64xbf16>
    %315 = vector.shape_cast %311 : vector<16x1xi1> to vector<16x1xi1>
    %316 = vector.broadcast %315 : vector<16x1xi1> to vector<16x64xi1>
    %317 = arith.select %316, %314, %309 : vector<16x64xi1>, vector<16x64xbf16>
    %c8_i32_107 = arith.constant 8 : i32
    %318 = vector.broadcast %c8_i32_107 : i32 to vector<16x1xi32>
    %319 = arith.cmpi slt, %16, %318 : vector<16x1xi32>
    %320 = vector.extract_strided_slice %306 {offsets = [8, 0], sizes = [8, 64], strides = [1, 1]} : vector<16x64xbf16> to vector<8x64xbf16>
    %321 = vector.extract_strided_slice %306 {offsets = [0, 0], sizes = [8, 64], strides = [1, 1]} : vector<16x64xbf16> to vector<8x64xbf16>
    %322 = tpu.concatenate %320, %321 in 0 : vector<8x64xbf16>, vector<8x64xbf16> -> vector<16x64xbf16>
    %323 = vector.shape_cast %319 : vector<16x1xi1> to vector<16x1xi1>
    %324 = vector.broadcast %323 : vector<16x1xi1> to vector<16x64xi1>
    %325 = arith.select %324, %322, %309 : vector<16x64xi1>, vector<16x64xbf16>
    %c584 = arith.constant 584 : index
    %c0_108 = arith.constant 0 : index
    %326 = vector.load %arg3[%c584, %c0_108] : memref<3848x64xbf16, #tpu.memory_space<vmem>>, vector<64x64xbf16>
    %cst_109 = arith.constant dense<0.000000e+00> : vector<16x64xf32>
    %327 = tpu.matmul %317, %326, %cst_109 {dimension_numbers = #tpu.dot_dimension_numbers<[1], [0], [0], [1], [0, 0, 1, 1], [], []>} : vector<16x64xbf16>, vector<64x64xbf16>, vector<16x64xf32> -> vector<16x64xf32>
    %328 = arith.addf %308, %327 : vector<16x64xf32>
    %c712 = arith.constant 712 : index
    %c0_110 = arith.constant 0 : index
    %329 = vector.load %arg3[%c712, %c0_110] : memref<3848x64xbf16, #tpu.memory_space<vmem>>, vector<64x64xbf16>
    %cst_111 = arith.constant dense<0.000000e+00> : vector<16x64xf32>
    %330 = tpu.matmul %325, %329, %cst_111 {dimension_numbers = #tpu.dot_dimension_numbers<[1], [0], [0], [1], [0, 0, 1, 1], [], []>} : vector<16x64xbf16>, vector<64x64xbf16>, vector<16x64xf32> -> vector<16x64xf32>
    %331 = arith.addf %328, %330 : vector<16x64xf32>
    %332 = vector.broadcast %305 : vector<1x64xf32> to vector<16x64xf32>
    %333 = arith.addf %331, %332 : vector<16x64xf32>
    %334 = arith.mulf %333, %333 : vector<16x64xf32>
    %335 = arith.mulf %333, %334 : vector<16x64xf32>
    %cst_112 = arith.constant 4.471500e-02 : f32
    %336 = vector.broadcast %cst_112 : f32 to vector<16x64xf32>
    %337 = arith.mulf %336, %335 : vector<16x64xf32>
    %338 = arith.addf %333, %337 : vector<16x64xf32>
    %cst_113 = arith.constant 0.797884583 : f32
    %339 = vector.broadcast %cst_113 : f32 to vector<16x64xf32>
    %340 = arith.mulf %339, %338 : vector<16x64xf32>
    %341 = math.tanh %340 : vector<16x64xf32>
    %cst_114 = arith.constant 1.000000e+00 : f32
    %342 = vector.broadcast %cst_114 : f32 to vector<16x64xf32>
    %343 = arith.addf %342, %341 : vector<16x64xf32>
    %cst_115 = arith.constant 5.000000e-01 : f32
    %344 = vector.broadcast %cst_115 : f32 to vector<16x64xf32>
    %345 = arith.mulf %344, %343 : vector<16x64xf32>
    %346 = arith.mulf %333, %345 : vector<16x64xf32>
    %c14 = arith.constant 14 : index
    %c0_116 = arith.constant 0 : index
    %c0_117 = arith.constant 0 : index
    %347 = vector.load %arg4[%c14, %c0_116, %c0_117] : memref<21x1x64xf32, #tpu.memory_space<vmem>>, vector<1x1x64xf32>
    %348 = vector.shape_cast %347 : vector<1x1x64xf32> to vector<1x64xf32>
    %349 = arith.truncf %346 : vector<16x64xf32> to vector<16x64xbf16>
    %c2568 = arith.constant 2568 : index
    %c0_118 = arith.constant 0 : index
    %350 = vector.load %arg3[%c2568, %c0_118] : memref<3848x64xbf16, #tpu.memory_space<vmem>>, vector<64x64xbf16>
    %cst_119 = arith.constant dense<0.000000e+00> : vector<16x64xf32>
    %351 = tpu.matmul %349, %350, %cst_119 {dimension_numbers = #tpu.dot_dimension_numbers<[1], [0], [0], [1], [0, 0, 1, 1], [], []>} : vector<16x64xbf16>, vector<64x64xbf16>, vector<16x64xf32> -> vector<16x64xf32>
    %cst_120 = arith.constant 0.000000e+00 : bf16
    %352 = vector.broadcast %cst_120 : bf16 to vector<16x64xbf16>
    %c8_i32_121 = arith.constant 8 : i32
    %353 = vector.broadcast %c8_i32_121 : i32 to vector<16x1xi32>
    %354 = arith.cmpi sge, %16, %353 : vector<16x1xi32>
    %355 = vector.extract_strided_slice %349 {offsets = [8, 0], sizes = [8, 64], strides = [1, 1]} : vector<16x64xbf16> to vector<8x64xbf16>
    %356 = vector.extract_strided_slice %349 {offsets = [0, 0], sizes = [8, 64], strides = [1, 1]} : vector<16x64xbf16> to vector<8x64xbf16>
    %357 = tpu.concatenate %355, %356 in 0 : vector<8x64xbf16>, vector<8x64xbf16> -> vector<16x64xbf16>
    %358 = vector.shape_cast %354 : vector<16x1xi1> to vector<16x1xi1>
    %359 = vector.broadcast %358 : vector<16x1xi1> to vector<16x64xi1>
    %360 = arith.select %359, %357, %352 : vector<16x64xi1>, vector<16x64xbf16>
    %c8_i32_122 = arith.constant 8 : i32
    %361 = vector.broadcast %c8_i32_122 : i32 to vector<16x1xi32>
    %362 = arith.cmpi slt, %16, %361 : vector<16x1xi32>
    %363 = vector.extract_strided_slice %349 {offsets = [8, 0], sizes = [8, 64], strides = [1, 1]} : vector<16x64xbf16> to vector<8x64xbf16>
    %364 = vector.extract_strided_slice %349 {offsets = [0, 0], sizes = [8, 64], strides = [1, 1]} : vector<16x64xbf16> to vector<8x64xbf16>
    %365 = tpu.concatenate %363, %364 in 0 : vector<8x64xbf16>, vector<8x64xbf16> -> vector<16x64xbf16>
    %366 = vector.shape_cast %362 : vector<16x1xi1> to vector<16x1xi1>
    %367 = vector.broadcast %366 : vector<16x1xi1> to vector<16x64xi1>
    %368 = arith.select %367, %365, %352 : vector<16x64xi1>, vector<16x64xbf16>
    %c2504 = arith.constant 2504 : index
    %c0_123 = arith.constant 0 : index
    %369 = vector.load %arg3[%c2504, %c0_123] : memref<3848x64xbf16, #tpu.memory_space<vmem>>, vector<64x64xbf16>
    %cst_124 = arith.constant dense<0.000000e+00> : vector<16x64xf32>
    %370 = tpu.matmul %360, %369, %cst_124 {dimension_numbers = #tpu.dot_dimension_numbers<[1], [0], [0], [1], [0, 0, 1, 1], [], []>} : vector<16x64xbf16>, vector<64x64xbf16>, vector<16x64xf32> -> vector<16x64xf32>
    %371 = arith.addf %351, %370 : vector<16x64xf32>
    %c2632 = arith.constant 2632 : index
    %c0_125 = arith.constant 0 : index
    %372 = vector.load %arg3[%c2632, %c0_125] : memref<3848x64xbf16, #tpu.memory_space<vmem>>, vector<64x64xbf16>
    %cst_126 = arith.constant dense<0.000000e+00> : vector<16x64xf32>
    %373 = tpu.matmul %368, %372, %cst_126 {dimension_numbers = #tpu.dot_dimension_numbers<[1], [0], [0], [1], [0, 0, 1, 1], [], []>} : vector<16x64xbf16>, vector<64x64xbf16>, vector<16x64xf32> -> vector<16x64xf32>
    %374 = arith.addf %371, %373 : vector<16x64xf32>
    %375 = vector.broadcast %348 : vector<1x64xf32> to vector<16x64xf32>
    %376 = arith.addf %374, %375 : vector<16x64xf32>
    %377 = arith.addf %376, %290 : vector<16x64xf32>
    %378 = arith.mulf %377, %377 : vector<16x64xf32>
    %379 = arith.mulf %377, %378 : vector<16x64xf32>
    %cst_127 = arith.constant 4.471500e-02 : f32
    %380 = vector.broadcast %cst_127 : f32 to vector<16x64xf32>
    %381 = arith.mulf %380, %379 : vector<16x64xf32>
    %382 = arith.addf %377, %381 : vector<16x64xf32>
    %cst_128 = arith.constant 0.797884583 : f32
    %383 = vector.broadcast %cst_128 : f32 to vector<16x64xf32>
    %384 = arith.mulf %383, %382 : vector<16x64xf32>
    %385 = math.tanh %384 : vector<16x64xf32>
    %cst_129 = arith.constant 1.000000e+00 : f32
    %386 = vector.broadcast %cst_129 : f32 to vector<16x64xf32>
    %387 = arith.addf %386, %385 : vector<16x64xf32>
    %cst_130 = arith.constant 5.000000e-01 : f32
    %388 = vector.broadcast %cst_130 : f32 to vector<16x64xf32>
    %389 = arith.mulf %388, %387 : vector<16x64xf32>
    %390 = arith.mulf %377, %389 : vector<16x64xf32>
    %c5 = arith.constant 5 : index
    %c0_131 = arith.constant 0 : index
    %c0_132 = arith.constant 0 : index
    %391 = vector.load %arg4[%c5, %c0_131, %c0_132] : memref<21x1x64xf32, #tpu.memory_space<vmem>>, vector<1x1x64xf32>
    %392 = vector.shape_cast %391 : vector<1x1x64xf32> to vector<1x64xf32>
    %393 = arith.truncf %390 : vector<16x64xf32> to vector<16x64xbf16>
    %c840 = arith.constant 840 : index
    %c0_133 = arith.constant 0 : index
    %394 = vector.load %arg3[%c840, %c0_133] : memref<3848x64xbf16, #tpu.memory_space<vmem>>, vector<64x64xbf16>
    %cst_134 = arith.constant dense<0.000000e+00> : vector<16x64xf32>
    %395 = tpu.matmul %393, %394, %cst_134 {dimension_numbers = #tpu.dot_dimension_numbers<[1], [0], [0], [1], [0, 0, 1, 1], [], []>} : vector<16x64xbf16>, vector<64x64xbf16>, vector<16x64xf32> -> vector<16x64xf32>
    %396 = vector.broadcast %392 : vector<1x64xf32> to vector<16x64xf32>
    %397 = arith.addf %395, %396 : vector<16x64xf32>
    %398 = arith.mulf %397, %397 : vector<16x64xf32>
    %399 = arith.mulf %397, %398 : vector<16x64xf32>
    %cst_135 = arith.constant 4.471500e-02 : f32
    %400 = vector.broadcast %cst_135 : f32 to vector<16x64xf32>
    %401 = arith.mulf %400, %399 : vector<16x64xf32>
    %402 = arith.addf %397, %401 : vector<16x64xf32>
    %cst_136 = arith.constant 0.797884583 : f32
    %403 = vector.broadcast %cst_136 : f32 to vector<16x64xf32>
    %404 = arith.mulf %403, %402 : vector<16x64xf32>
    %405 = math.tanh %404 : vector<16x64xf32>
    %cst_137 = arith.constant 1.000000e+00 : f32
    %406 = vector.broadcast %cst_137 : f32 to vector<16x64xf32>
    %407 = arith.addf %406, %405 : vector<16x64xf32>
    %cst_138 = arith.constant 5.000000e-01 : f32
    %408 = vector.broadcast %cst_138 : f32 to vector<16x64xf32>
    %409 = arith.mulf %408, %407 : vector<16x64xf32>
    %410 = arith.mulf %397, %409 : vector<16x64xf32>
    %c15 = arith.constant 15 : index
    %c0_139 = arith.constant 0 : index
    %c0_140 = arith.constant 0 : index
    %411 = vector.load %arg4[%c15, %c0_139, %c0_140] : memref<21x1x64xf32, #tpu.memory_space<vmem>>, vector<1x1x64xf32>
    %412 = vector.shape_cast %411 : vector<1x1x64xf32> to vector<1x64xf32>
    %413 = arith.truncf %410 : vector<16x64xf32> to vector<16x64xbf16>
    %c2760 = arith.constant 2760 : index
    %c0_141 = arith.constant 0 : index
    %414 = vector.load %arg3[%c2760, %c0_141] : memref<3848x64xbf16, #tpu.memory_space<vmem>>, vector<64x64xbf16>
    %cst_142 = arith.constant dense<0.000000e+00> : vector<16x64xf32>
    %415 = tpu.matmul %413, %414, %cst_142 {dimension_numbers = #tpu.dot_dimension_numbers<[1], [0], [0], [1], [0, 0, 1, 1], [], []>} : vector<16x64xbf16>, vector<64x64xbf16>, vector<16x64xf32> -> vector<16x64xf32>
    %416 = vector.broadcast %412 : vector<1x64xf32> to vector<16x64xf32>
    %417 = arith.addf %415, %416 : vector<16x64xf32>
    %418 = arith.addf %417, %377 : vector<16x64xf32>
    %419 = arith.mulf %418, %418 : vector<16x64xf32>
    %420 = arith.mulf %418, %419 : vector<16x64xf32>
    %cst_143 = arith.constant 4.471500e-02 : f32
    %421 = vector.broadcast %cst_143 : f32 to vector<16x64xf32>
    %422 = arith.mulf %421, %420 : vector<16x64xf32>
    %423 = arith.addf %418, %422 : vector<16x64xf32>
    %cst_144 = arith.constant 0.797884583 : f32
    %424 = vector.broadcast %cst_144 : f32 to vector<16x64xf32>
    %425 = arith.mulf %424, %423 : vector<16x64xf32>
    %426 = math.tanh %425 : vector<16x64xf32>
    %cst_145 = arith.constant 1.000000e+00 : f32
    %427 = vector.broadcast %cst_145 : f32 to vector<16x64xf32>
    %428 = arith.addf %427, %426 : vector<16x64xf32>
    %cst_146 = arith.constant 5.000000e-01 : f32
    %429 = vector.broadcast %cst_146 : f32 to vector<16x64xf32>
    %430 = arith.mulf %429, %428 : vector<16x64xf32>
    %431 = arith.mulf %418, %430 : vector<16x64xf32>
    %c6 = arith.constant 6 : index
    %c0_147 = arith.constant 0 : index
    %c0_148 = arith.constant 0 : index
    %432 = vector.load %arg4[%c6, %c0_147, %c0_148] : memref<21x1x64xf32, #tpu.memory_space<vmem>>, vector<1x1x64xf32>
    %433 = vector.shape_cast %432 : vector<1x1x64xf32> to vector<1x64xf32>
    %434 = arith.truncf %431 : vector<16x64xf32> to vector<16x64xbf16>
    %c1032 = arith.constant 1032 : index
    %c0_149 = arith.constant 0 : index
    %435 = vector.load %arg3[%c1032, %c0_149] : memref<3848x64xbf16, #tpu.memory_space<vmem>>, vector<64x64xbf16>
    %cst_150 = arith.constant dense<0.000000e+00> : vector<16x64xf32>
    %436 = tpu.matmul %434, %435, %cst_150 {dimension_numbers = #tpu.dot_dimension_numbers<[1], [0], [0], [1], [0, 0, 1, 1], [], []>} : vector<16x64xbf16>, vector<64x64xbf16>, vector<16x64xf32> -> vector<16x64xf32>
    %437 = vector.broadcast %433 : vector<1x64xf32> to vector<16x64xf32>
    %438 = arith.addf %436, %437 : vector<16x64xf32>
    %439 = arith.mulf %438, %438 : vector<16x64xf32>
    %440 = arith.mulf %438, %439 : vector<16x64xf32>
    %cst_151 = arith.constant 4.471500e-02 : f32
    %441 = vector.broadcast %cst_151 : f32 to vector<16x64xf32>
    %442 = arith.mulf %441, %440 : vector<16x64xf32>
    %443 = arith.addf %438, %442 : vector<16x64xf32>
    %cst_152 = arith.constant 0.797884583 : f32
    %444 = vector.broadcast %cst_152 : f32 to vector<16x64xf32>
    %445 = arith.mulf %444, %443 : vector<16x64xf32>
    %446 = math.tanh %445 : vector<16x64xf32>
    %cst_153 = arith.constant 1.000000e+00 : f32
    %447 = vector.broadcast %cst_153 : f32 to vector<16x64xf32>
    %448 = arith.addf %447, %446 : vector<16x64xf32>
    %cst_154 = arith.constant 5.000000e-01 : f32
    %449 = vector.broadcast %cst_154 : f32 to vector<16x64xf32>
    %450 = arith.mulf %449, %448 : vector<16x64xf32>
    %451 = arith.mulf %438, %450 : vector<16x64xf32>
    %c16 = arith.constant 16 : index
    %c0_155 = arith.constant 0 : index
    %c0_156 = arith.constant 0 : index
    %452 = vector.load %arg4[%c16, %c0_155, %c0_156] : memref<21x1x64xf32, #tpu.memory_space<vmem>>, vector<1x1x64xf32>
    %453 = vector.shape_cast %452 : vector<1x1x64xf32> to vector<1x64xf32>
    %454 = arith.truncf %451 : vector<16x64xf32> to vector<16x64xbf16>
    %c2952 = arith.constant 2952 : index
    %c0_157 = arith.constant 0 : index
    %455 = vector.load %arg3[%c2952, %c0_157] : memref<3848x64xbf16, #tpu.memory_space<vmem>>, vector<64x64xbf16>
    %cst_158 = arith.constant dense<0.000000e+00> : vector<16x64xf32>
    %456 = tpu.matmul %454, %455, %cst_158 {dimension_numbers = #tpu.dot_dimension_numbers<[1], [0], [0], [1], [0, 0, 1, 1], [], []>} : vector<16x64xbf16>, vector<64x64xbf16>, vector<16x64xf32> -> vector<16x64xf32>
    %457 = vector.broadcast %453 : vector<1x64xf32> to vector<16x64xf32>
    %458 = arith.addf %456, %457 : vector<16x64xf32>
    %459 = arith.addf %458, %418 : vector<16x64xf32>
    %460 = arith.mulf %459, %459 : vector<16x64xf32>
    %461 = arith.mulf %459, %460 : vector<16x64xf32>
    %cst_159 = arith.constant 4.471500e-02 : f32
    %462 = vector.broadcast %cst_159 : f32 to vector<16x64xf32>
    %463 = arith.mulf %462, %461 : vector<16x64xf32>
    %464 = arith.addf %459, %463 : vector<16x64xf32>
    %cst_160 = arith.constant 0.797884583 : f32
    %465 = vector.broadcast %cst_160 : f32 to vector<16x64xf32>
    %466 = arith.mulf %465, %464 : vector<16x64xf32>
    %467 = math.tanh %466 : vector<16x64xf32>
    %cst_161 = arith.constant 1.000000e+00 : f32
    %468 = vector.broadcast %cst_161 : f32 to vector<16x64xf32>
    %469 = arith.addf %468, %467 : vector<16x64xf32>
    %cst_162 = arith.constant 5.000000e-01 : f32
    %470 = vector.broadcast %cst_162 : f32 to vector<16x64xf32>
    %471 = arith.mulf %470, %469 : vector<16x64xf32>
    %472 = arith.mulf %459, %471 : vector<16x64xf32>
    %c7 = arith.constant 7 : index
    %c0_163 = arith.constant 0 : index
    %c0_164 = arith.constant 0 : index
    %473 = vector.load %arg4[%c7, %c0_163, %c0_164] : memref<21x1x64xf32, #tpu.memory_space<vmem>>, vector<1x1x64xf32>
    %474 = vector.shape_cast %473 : vector<1x1x64xf32> to vector<1x64xf32>
    %475 = arith.truncf %472 : vector<16x64xf32> to vector<16x64xbf16>
    %c1224 = arith.constant 1224 : index
    %c0_165 = arith.constant 0 : index
    %476 = vector.load %arg3[%c1224, %c0_165] : memref<3848x64xbf16, #tpu.memory_space<vmem>>, vector<64x64xbf16>
    %cst_166 = arith.constant dense<0.000000e+00> : vector<16x64xf32>
    %477 = tpu.matmul %475, %476, %cst_166 {dimension_numbers = #tpu.dot_dimension_numbers<[1], [0], [0], [1], [0, 0, 1, 1], [], []>} : vector<16x64xbf16>, vector<64x64xbf16>, vector<16x64xf32> -> vector<16x64xf32>
    %478 = vector.broadcast %474 : vector<1x64xf32> to vector<16x64xf32>
    %479 = arith.addf %477, %478 : vector<16x64xf32>
    %480 = arith.mulf %479, %479 : vector<16x64xf32>
    %481 = arith.mulf %479, %480 : vector<16x64xf32>
    %cst_167 = arith.constant 4.471500e-02 : f32
    %482 = vector.broadcast %cst_167 : f32 to vector<16x64xf32>
    %483 = arith.mulf %482, %481 : vector<16x64xf32>
    %484 = arith.addf %479, %483 : vector<16x64xf32>
    %cst_168 = arith.constant 0.797884583 : f32
    %485 = vector.broadcast %cst_168 : f32 to vector<16x64xf32>
    %486 = arith.mulf %485, %484 : vector<16x64xf32>
    %487 = math.tanh %486 : vector<16x64xf32>
    %cst_169 = arith.constant 1.000000e+00 : f32
    %488 = vector.broadcast %cst_169 : f32 to vector<16x64xf32>
    %489 = arith.addf %488, %487 : vector<16x64xf32>
    %cst_170 = arith.constant 5.000000e-01 : f32
    %490 = vector.broadcast %cst_170 : f32 to vector<16x64xf32>
    %491 = arith.mulf %490, %489 : vector<16x64xf32>
    %492 = arith.mulf %479, %491 : vector<16x64xf32>
    %c17 = arith.constant 17 : index
    %c0_171 = arith.constant 0 : index
    %c0_172 = arith.constant 0 : index
    %493 = vector.load %arg4[%c17, %c0_171, %c0_172] : memref<21x1x64xf32, #tpu.memory_space<vmem>>, vector<1x1x64xf32>
    %494 = vector.shape_cast %493 : vector<1x1x64xf32> to vector<1x64xf32>
    %495 = arith.truncf %492 : vector<16x64xf32> to vector<16x64xbf16>
    %c3144 = arith.constant 3144 : index
    %c0_173 = arith.constant 0 : index
    %496 = vector.load %arg3[%c3144, %c0_173] : memref<3848x64xbf16, #tpu.memory_space<vmem>>, vector<64x64xbf16>
    %cst_174 = arith.constant dense<0.000000e+00> : vector<16x64xf32>
    %497 = tpu.matmul %495, %496, %cst_174 {dimension_numbers = #tpu.dot_dimension_numbers<[1], [0], [0], [1], [0, 0, 1, 1], [], []>} : vector<16x64xbf16>, vector<64x64xbf16>, vector<16x64xf32> -> vector<16x64xf32>
    %498 = vector.broadcast %494 : vector<1x64xf32> to vector<16x64xf32>
    %499 = arith.addf %497, %498 : vector<16x64xf32>
    %500 = arith.addf %499, %459 : vector<16x64xf32>
    %501 = arith.mulf %500, %500 : vector<16x64xf32>
    %502 = arith.mulf %500, %501 : vector<16x64xf32>
    %cst_175 = arith.constant 4.471500e-02 : f32
    %503 = vector.broadcast %cst_175 : f32 to vector<16x64xf32>
    %504 = arith.mulf %503, %502 : vector<16x64xf32>
    %505 = arith.addf %500, %504 : vector<16x64xf32>
    %cst_176 = arith.constant 0.797884583 : f32
    %506 = vector.broadcast %cst_176 : f32 to vector<16x64xf32>
    %507 = arith.mulf %506, %505 : vector<16x64xf32>
    %508 = math.tanh %507 : vector<16x64xf32>
    %cst_177 = arith.constant 1.000000e+00 : f32
    %509 = vector.broadcast %cst_177 : f32 to vector<16x64xf32>
    %510 = arith.addf %509, %508 : vector<16x64xf32>
    %cst_178 = arith.constant 5.000000e-01 : f32
    %511 = vector.broadcast %cst_178 : f32 to vector<16x64xf32>
    %512 = arith.mulf %511, %510 : vector<16x64xf32>
    %513 = arith.mulf %500, %512 : vector<16x64xf32>
    %c8_179 = arith.constant 8 : index
    %c0_180 = arith.constant 0 : index
    %c0_181 = arith.constant 0 : index
    %514 = vector.load %arg4[%c8_179, %c0_180, %c0_181] : memref<21x1x64xf32, #tpu.memory_space<vmem>>, vector<1x1x64xf32>
    %515 = vector.shape_cast %514 : vector<1x1x64xf32> to vector<1x64xf32>
    %516 = arith.truncf %513 : vector<16x64xf32> to vector<16x64xbf16>
    %c1416 = arith.constant 1416 : index
    %c0_182 = arith.constant 0 : index
    %517 = vector.load %arg3[%c1416, %c0_182] : memref<3848x64xbf16, #tpu.memory_space<vmem>>, vector<64x64xbf16>
    %cst_183 = arith.constant dense<0.000000e+00> : vector<16x64xf32>
    %518 = tpu.matmul %516, %517, %cst_183 {dimension_numbers = #tpu.dot_dimension_numbers<[1], [0], [0], [1], [0, 0, 1, 1], [], []>} : vector<16x64xbf16>, vector<64x64xbf16>, vector<16x64xf32> -> vector<16x64xf32>
    %519 = vector.broadcast %515 : vector<1x64xf32> to vector<16x64xf32>
    %520 = arith.addf %518, %519 : vector<16x64xf32>
    %521 = arith.mulf %520, %520 : vector<16x64xf32>
    %522 = arith.mulf %520, %521 : vector<16x64xf32>
    %cst_184 = arith.constant 4.471500e-02 : f32
    %523 = vector.broadcast %cst_184 : f32 to vector<16x64xf32>
    %524 = arith.mulf %523, %522 : vector<16x64xf32>
    %525 = arith.addf %520, %524 : vector<16x64xf32>
    %cst_185 = arith.constant 0.797884583 : f32
    %526 = vector.broadcast %cst_185 : f32 to vector<16x64xf32>
    %527 = arith.mulf %526, %525 : vector<16x64xf32>
    %528 = math.tanh %527 : vector<16x64xf32>
    %cst_186 = arith.constant 1.000000e+00 : f32
    %529 = vector.broadcast %cst_186 : f32 to vector<16x64xf32>
    %530 = arith.addf %529, %528 : vector<16x64xf32>
    %cst_187 = arith.constant 5.000000e-01 : f32
    %531 = vector.broadcast %cst_187 : f32 to vector<16x64xf32>
    %532 = arith.mulf %531, %530 : vector<16x64xf32>
    %533 = arith.mulf %520, %532 : vector<16x64xf32>
    %c18 = arith.constant 18 : index
    %c0_188 = arith.constant 0 : index
    %c0_189 = arith.constant 0 : index
    %534 = vector.load %arg4[%c18, %c0_188, %c0_189] : memref<21x1x64xf32, #tpu.memory_space<vmem>>, vector<1x1x64xf32>
    %535 = vector.shape_cast %534 : vector<1x1x64xf32> to vector<1x64xf32>
    %536 = arith.truncf %533 : vector<16x64xf32> to vector<16x64xbf16>
    %c3336 = arith.constant 3336 : index
    %c0_190 = arith.constant 0 : index
    %537 = vector.load %arg3[%c3336, %c0_190] : memref<3848x64xbf16, #tpu.memory_space<vmem>>, vector<64x64xbf16>
    %cst_191 = arith.constant dense<0.000000e+00> : vector<16x64xf32>
    %538 = tpu.matmul %536, %537, %cst_191 {dimension_numbers = #tpu.dot_dimension_numbers<[1], [0], [0], [1], [0, 0, 1, 1], [], []>} : vector<16x64xbf16>, vector<64x64xbf16>, vector<16x64xf32> -> vector<16x64xf32>
    %539 = vector.broadcast %535 : vector<1x64xf32> to vector<16x64xf32>
    %540 = arith.addf %538, %539 : vector<16x64xf32>
    %541 = arith.addf %540, %500 : vector<16x64xf32>
    %542 = arith.mulf %541, %541 : vector<16x64xf32>
    %543 = arith.mulf %541, %542 : vector<16x64xf32>
    %cst_192 = arith.constant 4.471500e-02 : f32
    %544 = vector.broadcast %cst_192 : f32 to vector<16x64xf32>
    %545 = arith.mulf %544, %543 : vector<16x64xf32>
    %546 = arith.addf %541, %545 : vector<16x64xf32>
    %cst_193 = arith.constant 0.797884583 : f32
    %547 = vector.broadcast %cst_193 : f32 to vector<16x64xf32>
    %548 = arith.mulf %547, %546 : vector<16x64xf32>
    %549 = math.tanh %548 : vector<16x64xf32>
    %cst_194 = arith.constant 1.000000e+00 : f32
    %550 = vector.broadcast %cst_194 : f32 to vector<16x64xf32>
    %551 = arith.addf %550, %549 : vector<16x64xf32>
    %cst_195 = arith.constant 5.000000e-01 : f32
    %552 = vector.broadcast %cst_195 : f32 to vector<16x64xf32>
    %553 = arith.mulf %552, %551 : vector<16x64xf32>
    %554 = arith.mulf %541, %553 : vector<16x64xf32>
    %c9 = arith.constant 9 : index
    %c0_196 = arith.constant 0 : index
    %c0_197 = arith.constant 0 : index
    %555 = vector.load %arg4[%c9, %c0_196, %c0_197] : memref<21x1x64xf32, #tpu.memory_space<vmem>>, vector<1x1x64xf32>
    %556 = vector.shape_cast %555 : vector<1x1x64xf32> to vector<1x64xf32>
    %557 = arith.truncf %554 : vector<16x64xf32> to vector<16x64xbf16>
    %c1608 = arith.constant 1608 : index
    %c0_198 = arith.constant 0 : index
    %558 = vector.load %arg3[%c1608, %c0_198] : memref<3848x64xbf16, #tpu.memory_space<vmem>>, vector<64x64xbf16>
    %cst_199 = arith.constant dense<0.000000e+00> : vector<16x64xf32>
    %559 = tpu.matmul %557, %558, %cst_199 {dimension_numbers = #tpu.dot_dimension_numbers<[1], [0], [0], [1], [0, 0, 1, 1], [], []>} : vector<16x64xbf16>, vector<64x64xbf16>, vector<16x64xf32> -> vector<16x64xf32>
    %560 = vector.broadcast %556 : vector<1x64xf32> to vector<16x64xf32>
    %561 = arith.addf %559, %560 : vector<16x64xf32>
    %562 = arith.mulf %561, %561 : vector<16x64xf32>
    %563 = arith.mulf %561, %562 : vector<16x64xf32>
    %cst_200 = arith.constant 4.471500e-02 : f32
    %564 = vector.broadcast %cst_200 : f32 to vector<16x64xf32>
    %565 = arith.mulf %564, %563 : vector<16x64xf32>
    %566 = arith.addf %561, %565 : vector<16x64xf32>
    %cst_201 = arith.constant 0.797884583 : f32
    %567 = vector.broadcast %cst_201 : f32 to vector<16x64xf32>
    %568 = arith.mulf %567, %566 : vector<16x64xf32>
    %569 = math.tanh %568 : vector<16x64xf32>
    %cst_202 = arith.constant 1.000000e+00 : f32
    %570 = vector.broadcast %cst_202 : f32 to vector<16x64xf32>
    %571 = arith.addf %570, %569 : vector<16x64xf32>
    %cst_203 = arith.constant 5.000000e-01 : f32
    %572 = vector.broadcast %cst_203 : f32 to vector<16x64xf32>
    %573 = arith.mulf %572, %571 : vector<16x64xf32>
    %574 = arith.mulf %561, %573 : vector<16x64xf32>
    %c19 = arith.constant 19 : index
    %c0_204 = arith.constant 0 : index
    %c0_205 = arith.constant 0 : index
    %575 = vector.load %arg4[%c19, %c0_204, %c0_205] : memref<21x1x64xf32, #tpu.memory_space<vmem>>, vector<1x1x64xf32>
    %576 = vector.shape_cast %575 : vector<1x1x64xf32> to vector<1x64xf32>
    %577 = arith.truncf %574 : vector<16x64xf32> to vector<16x64xbf16>
    %c3528 = arith.constant 3528 : index
    %c0_206 = arith.constant 0 : index
    %578 = vector.load %arg3[%c3528, %c0_206] : memref<3848x64xbf16, #tpu.memory_space<vmem>>, vector<64x64xbf16>
    %cst_207 = arith.constant dense<0.000000e+00> : vector<16x64xf32>
    %579 = tpu.matmul %577, %578, %cst_207 {dimension_numbers = #tpu.dot_dimension_numbers<[1], [0], [0], [1], [0, 0, 1, 1], [], []>} : vector<16x64xbf16>, vector<64x64xbf16>, vector<16x64xf32> -> vector<16x64xf32>
    %580 = vector.broadcast %576 : vector<1x64xf32> to vector<16x64xf32>
    %581 = arith.addf %579, %580 : vector<16x64xf32>
    %582 = arith.addf %581, %541 : vector<16x64xf32>
    %583 = arith.mulf %582, %582 : vector<16x64xf32>
    %584 = arith.mulf %582, %583 : vector<16x64xf32>
    %cst_208 = arith.constant 4.471500e-02 : f32
    %585 = vector.broadcast %cst_208 : f32 to vector<16x64xf32>
    %586 = arith.mulf %585, %584 : vector<16x64xf32>
    %587 = arith.addf %582, %586 : vector<16x64xf32>
    %cst_209 = arith.constant 0.797884583 : f32
    %588 = vector.broadcast %cst_209 : f32 to vector<16x64xf32>
    %589 = arith.mulf %588, %587 : vector<16x64xf32>
    %590 = math.tanh %589 : vector<16x64xf32>
    %cst_210 = arith.constant 1.000000e+00 : f32
    %591 = vector.broadcast %cst_210 : f32 to vector<16x64xf32>
    %592 = arith.addf %591, %590 : vector<16x64xf32>
    %cst_211 = arith.constant 5.000000e-01 : f32
    %593 = vector.broadcast %cst_211 : f32 to vector<16x64xf32>
    %594 = arith.mulf %593, %592 : vector<16x64xf32>
    %595 = arith.mulf %582, %594 : vector<16x64xf32>
    %c10 = arith.constant 10 : index
    %c0_212 = arith.constant 0 : index
    %c0_213 = arith.constant 0 : index
    %596 = vector.load %arg4[%c10, %c0_212, %c0_213] : memref<21x1x64xf32, #tpu.memory_space<vmem>>, vector<1x1x64xf32>
    %597 = vector.shape_cast %596 : vector<1x1x64xf32> to vector<1x64xf32>
    %598 = arith.truncf %595 : vector<16x64xf32> to vector<16x64xbf16>
    %c1800 = arith.constant 1800 : index
    %c0_214 = arith.constant 0 : index
    %599 = vector.load %arg3[%c1800, %c0_214] : memref<3848x64xbf16, #tpu.memory_space<vmem>>, vector<64x64xbf16>
    %cst_215 = arith.constant dense<0.000000e+00> : vector<16x64xf32>
    %600 = tpu.matmul %598, %599, %cst_215 {dimension_numbers = #tpu.dot_dimension_numbers<[1], [0], [0], [1], [0, 0, 1, 1], [], []>} : vector<16x64xbf16>, vector<64x64xbf16>, vector<16x64xf32> -> vector<16x64xf32>
    %601 = vector.broadcast %597 : vector<1x64xf32> to vector<16x64xf32>
    %602 = arith.addf %600, %601 : vector<16x64xf32>
    %603 = arith.mulf %602, %602 : vector<16x64xf32>
    %604 = arith.mulf %602, %603 : vector<16x64xf32>
    %cst_216 = arith.constant 4.471500e-02 : f32
    %605 = vector.broadcast %cst_216 : f32 to vector<16x64xf32>
    %606 = arith.mulf %605, %604 : vector<16x64xf32>
    %607 = arith.addf %602, %606 : vector<16x64xf32>
    %cst_217 = arith.constant 0.797884583 : f32
    %608 = vector.broadcast %cst_217 : f32 to vector<16x64xf32>
    %609 = arith.mulf %608, %607 : vector<16x64xf32>
    %610 = math.tanh %609 : vector<16x64xf32>
    %cst_218 = arith.constant 1.000000e+00 : f32
    %611 = vector.broadcast %cst_218 : f32 to vector<16x64xf32>
    %612 = arith.addf %611, %610 : vector<16x64xf32>
    %cst_219 = arith.constant 5.000000e-01 : f32
    %613 = vector.broadcast %cst_219 : f32 to vector<16x64xf32>
    %614 = arith.mulf %613, %612 : vector<16x64xf32>
    %615 = arith.mulf %602, %614 : vector<16x64xf32>
    %c20 = arith.constant 20 : index
    %c0_220 = arith.constant 0 : index
    %c0_221 = arith.constant 0 : index
    %616 = vector.load %arg4[%c20, %c0_220, %c0_221] : memref<21x1x64xf32, #tpu.memory_space<vmem>>, vector<1x1x64xf32>
    %617 = vector.shape_cast %616 : vector<1x1x64xf32> to vector<1x64xf32>
    %618 = arith.truncf %615 : vector<16x64xf32> to vector<16x64xbf16>
    %c3720 = arith.constant 3720 : index
    %c0_222 = arith.constant 0 : index
    %619 = vector.load %arg3[%c3720, %c0_222] : memref<3848x64xbf16, #tpu.memory_space<vmem>>, vector<64x64xbf16>
    %cst_223 = arith.constant dense<0.000000e+00> : vector<16x64xf32>
    %620 = tpu.matmul %618, %619, %cst_223 {dimension_numbers = #tpu.dot_dimension_numbers<[1], [0], [0], [1], [0, 0, 1, 1], [], []>} : vector<16x64xbf16>, vector<64x64xbf16>, vector<16x64xf32> -> vector<16x64xf32>
    %621 = vector.broadcast %617 : vector<1x64xf32> to vector<16x64xf32>
    %622 = arith.addf %620, %621 : vector<16x64xf32>
    %623 = arith.addf %622, %582 : vector<16x64xf32>
    %624 = tpu.iota {dimensions = array<i32: 1>} : vector<1x16xi32>
    %625 = tpu.iota {dimensions = array<i32: 0>} : vector<1x16xi32>
    %c16_i32_224 = arith.constant 16 : i32
    %626 = vector.broadcast %c16_i32_224 : i32 to vector<1x16xi32>
    %627 = arith.muli %625, %626 : vector<1x16xi32>
    %c15_i32_225 = arith.constant 15 : i32
    %628 = vector.broadcast %c15_i32_225 : i32 to vector<1x16xi32>
    %629 = arith.addi %627, %628 : vector<1x16xi32>
    %630 = arith.cmpi eq, %624, %629 : vector<1x16xi32>
    %631 = arith.extui %630 : vector<1x16xi1> to vector<1x16xi32>
    %632 = arith.sitofp %631 : vector<1x16xi32> to vector<1x16xf32>
    %cst_226 = arith.constant dense<0.000000e+00> : vector<1x64xf32>
    %633 = tpu.matmul %632, %623, %cst_226 {dimension_numbers = #tpu.dot_dimension_numbers<[1], [0], [0], [1], [0, 0, 1, 1], [], []>} : vector<1x16xf32>, vector<16x64xf32>, vector<1x64xf32> -> vector<1x64xf32>
    %634 = arith.truncf %633 : vector<1x64xf32> to vector<1x64xbf16>
    %c64 = arith.constant 64 : index
    %c0_227 = arith.constant 0 : index
    %635 = vector.load %arg5[%c64, %c0_227] : memref<448x320xbf16, #tpu.memory_space<vmem>>, vector<64x320xbf16>
    %cst_228 = arith.constant dense<0.000000e+00> : vector<1x320xf32>
    %636 = tpu.matmul %634, %635, %cst_228 {dimension_numbers = #tpu.dot_dimension_numbers<[1], [0], [0], [1], [0, 0, 1, 1], [], []>} : vector<1x64xbf16>, vector<64x320xbf16>, vector<1x320xf32> -> vector<1x320xf32>
    %c1_229 = arith.constant 1 : index
    %c0_230 = arith.constant 0 : index
    %c0_231 = arith.constant 0 : index
    %637 = vector.load %arg6[%c1_229, %c0_230, %c0_231] : memref<3x1x320xf32, #tpu.memory_space<vmem>>, vector<1x1x320xf32>
    %638 = vector.shape_cast %637 : vector<1x1x320xf32> to vector<1x320xf32>
    %639 = arith.addf %636, %638 : vector<1x320xf32>
    %640 = arith.mulf %633, %633 : vector<1x64xf32>
    %641 = arith.mulf %633, %640 : vector<1x64xf32>
    %cst_232 = arith.constant 4.471500e-02 : f32
    %642 = vector.broadcast %cst_232 : f32 to vector<1x64xf32>
    %643 = arith.mulf %642, %641 : vector<1x64xf32>
    %644 = arith.addf %633, %643 : vector<1x64xf32>
    %cst_233 = arith.constant 0.797884583 : f32
    %645 = vector.broadcast %cst_233 : f32 to vector<1x64xf32>
    %646 = arith.mulf %645, %644 : vector<1x64xf32>
    %647 = math.tanh %646 : vector<1x64xf32>
    %cst_234 = arith.constant 1.000000e+00 : f32
    %648 = vector.broadcast %cst_234 : f32 to vector<1x64xf32>
    %649 = arith.addf %648, %647 : vector<1x64xf32>
    %cst_235 = arith.constant 5.000000e-01 : f32
    %650 = vector.broadcast %cst_235 : f32 to vector<1x64xf32>
    %651 = arith.mulf %650, %649 : vector<1x64xf32>
    %652 = arith.mulf %633, %651 : vector<1x64xf32>
    %653 = arith.truncf %652 : vector<1x64xf32> to vector<1x64xbf16>
    %c0_236 = arith.constant 0 : index
    %c0_237 = arith.constant 0 : index
    %654 = vector.load %arg5[%c0_236, %c0_237] : memref<448x320xbf16, #tpu.memory_space<vmem>>, vector<64x320xbf16>
    %cst_238 = arith.constant dense<0.000000e+00> : vector<1x320xf32>
    %655 = tpu.matmul %653, %654, %cst_238 {dimension_numbers = #tpu.dot_dimension_numbers<[1], [0], [0], [1], [0, 0, 1, 1], [], []>} : vector<1x64xbf16>, vector<64x320xbf16>, vector<1x320xf32> -> vector<1x320xf32>
    %c0_239 = arith.constant 0 : index
    %c0_240 = arith.constant 0 : index
    %c0_241 = arith.constant 0 : index
    %656 = vector.load %arg6[%c0_239, %c0_240, %c0_241] : memref<3x1x320xf32, #tpu.memory_space<vmem>>, vector<1x1x320xf32>
    %657 = vector.shape_cast %656 : vector<1x1x320xf32> to vector<1x320xf32>
    %658 = arith.addf %655, %657 : vector<1x320xf32>
    %659 = arith.mulf %658, %658 : vector<1x320xf32>
    %660 = arith.mulf %658, %659 : vector<1x320xf32>
    %cst_242 = arith.constant 4.471500e-02 : f32
    %661 = vector.broadcast %cst_242 : f32 to vector<1x320xf32>
    %662 = arith.mulf %661, %660 : vector<1x320xf32>
    %663 = arith.addf %658, %662 : vector<1x320xf32>
    %cst_243 = arith.constant 0.797884583 : f32
    %664 = vector.broadcast %cst_243 : f32 to vector<1x320xf32>
    %665 = arith.mulf %664, %663 : vector<1x320xf32>
    %666 = math.tanh %665 : vector<1x320xf32>
    %cst_244 = arith.constant 1.000000e+00 : f32
    %667 = vector.broadcast %cst_244 : f32 to vector<1x320xf32>
    %668 = arith.addf %667, %666 : vector<1x320xf32>
    %cst_245 = arith.constant 5.000000e-01 : f32
    %669 = vector.broadcast %cst_245 : f32 to vector<1x320xf32>
    %670 = arith.mulf %669, %668 : vector<1x320xf32>
    %671 = arith.mulf %658, %670 : vector<1x320xf32>
    %672 = arith.truncf %671 : vector<1x320xf32> to vector<1x320xbf16>
    %c128 = arith.constant 128 : index
    %c0_246 = arith.constant 0 : index
    %673 = vector.load %arg5[%c128, %c0_246] : memref<448x320xbf16, #tpu.memory_space<vmem>>, vector<320x320xbf16>
    %cst_247 = arith.constant dense<0.000000e+00> : vector<1x320xf32>
    %674 = tpu.matmul %672, %673, %cst_247 {dimension_numbers = #tpu.dot_dimension_numbers<[1], [0], [0], [1], [0, 0, 1, 1], [], []>} : vector<1x320xbf16>, vector<320x320xbf16>, vector<1x320xf32> -> vector<1x320xf32>
    %c2_248 = arith.constant 2 : index
    %c0_249 = arith.constant 0 : index
    %c0_250 = arith.constant 0 : index
    %675 = vector.load %arg6[%c2_248, %c0_249, %c0_250] : memref<3x1x320xf32, #tpu.memory_space<vmem>>, vector<1x1x320xf32>
    %676 = vector.shape_cast %675 : vector<1x1x320xf32> to vector<1x320xf32>
    %677 = arith.addf %674, %676 : vector<1x320xf32>
    %678 = arith.addf %677, %639 : vector<1x320xf32>
    %679 = arith.truncf %678 : vector<1x320xf32> to vector<1x320xbf16>
    %c0_251 = arith.constant 0 : index
    %c0_252 = arith.constant 0 : index
    %680 = vector.load %arg7[%c0_251, %c0_252] : memref<320x32xbf16, #tpu.memory_space<vmem>>, vector<320x32xbf16>
    %cst_253 = arith.constant dense<0.000000e+00> : vector<1x32xf32>
    %681 = tpu.matmul %679, %680, %cst_253 {dimension_numbers = #tpu.dot_dimension_numbers<[1], [0], [0], [1], [0, 0, 1, 1], [], []>} : vector<1x320xbf16>, vector<320x32xbf16>, vector<1x32xf32> -> vector<1x32xf32>
    %c0_254 = arith.constant 0 : index
    %c0_255 = arith.constant 0 : index
    %682 = vector.load %arg8[%c0_254, %c0_255] : memref<1x32xf32, #tpu.memory_space<vmem>>, vector<1x32xf32>
    %683 = arith.addf %681, %682 : vector<1x32xf32>
    %c0_256 = arith.constant 0 : index
    %c0_257 = arith.constant 0 : index
    %c0_258 = arith.constant 0 : index
    %684 = vector.load %arg9[%c0_256, %c0_257, %c0_258] : memref<1x1x32xf32, #tpu.memory_space<vmem>>, vector<1x1x32xf32>
    %685 = vector.shape_cast %684 : vector<1x1x32xf32> to vector<1x32xf32>
    %686 = vector.shape_cast %683 : vector<1x32xf32> to vector<1x1x32xf32>
    tpu.vector_store %arg9[%c0_256, %c0_257, %c0_258], %686 {strides = array<i32>} : memref<1x1x32xf32, #tpu.memory_space<vmem>>, vector<1x1x32xf32>,
    return
  }
  func.func @transform_0(%arg0: i32) -> (i32, i32, i32) {
    %c0_i32 = arith.constant 0 : i32
    %c0_i32_0 = arith.constant 0 : i32
    %c0_i32_1 = arith.constant 0 : i32
    return %arg0, %c0_i32, %c0_i32_0 : i32, i32, i32
  }
  func.func @transform_1(%arg0: i32) -> (i32, i32, i32) {
    %c0_i32 = arith.constant 0 : i32
    %c0_i32_0 = arith.constant 0 : i32
    %c0_i32_1 = arith.constant 0 : i32
    return %arg0, %c0_i32, %c0_i32_0 : i32, i32, i32
  }
  func.func @transform_2(%arg0: i32) -> (i32, i32) {
    %c0_i32 = arith.constant 0 : i32
    %c0_i32_0 = arith.constant 0 : i32
    %c0_i32_1 = arith.constant 0 : i32
    return %c0_i32, %c0_i32_0 : i32, i32
  }
  func.func @transform_3(%arg0: i32) -> (i32, i32, i32) {
    %c0_i32 = arith.constant 0 : i32
    %c0_i32_0 = arith.constant 0 : i32
    %c0_i32_1 = arith.constant 0 : i32
    %c0_i32_2 = arith.constant 0 : i32
    return %c0_i32, %c0_i32_0, %c0_i32_1 : i32, i32, i32
  }
  func.func @transform_4(%arg0: i32) -> (i32, i32) {
    %c0_i32 = arith.constant 0 : i32
    %c0_i32_0 = arith.constant 0 : i32
    %c0_i32_1 = arith.constant 0 : i32
    return %c0_i32, %c0_i32_0 : i32, i32
  }
  func.func @transform_5(%arg0: i32) -> (i32, i32, i32) {
    %c0_i32 = arith.constant 0 : i32
    %c0_i32_0 = arith.constant 0 : i32
    %c0_i32_1 = arith.constant 0 : i32
    %c0_i32_2 = arith.constant 0 : i32
    return %c0_i32, %c0_i32_0, %c0_i32_1 : i32, i32, i32
  }
  func.func @transform_6(%arg0: i32) -> (i32, i32) {
    %c0_i32 = arith.constant 0 : i32
    %c0_i32_0 = arith.constant 0 : i32
    %c0_i32_1 = arith.constant 0 : i32
    return %c0_i32, %c0_i32_0 : i32, i32
  }
  func.func @transform_7(%arg0: i32) -> (i32, i32) {
    %c0_i32 = arith.constant 0 : i32
    %c0_i32_0 = arith.constant 0 : i32
    %c0_i32_1 = arith.constant 0 : i32
    return %c0_i32, %c0_i32_0 : i32, i32
  }
  func.func @transform_8(%arg0: i32) -> (i32, i32, i32) {
    %c0_i32 = arith.constant 0 : i32
    %c0_i32_0 = arith.constant 0 : i32
    %c0_i32_1 = arith.constant 0 : i32
    return %arg0, %c0_i32, %c0_i32_0 : i32, i32, i32
  }
}

</mosaic_0001>

<bundles_post_ra>
// kernel: model_forward.1
= control target key start
LH: loop header
LB: loop body
LE: loop exit
PB: predicated region body
PF: predicated region fallthrough
CT: control target
= control target key end

     0   :  { %s5692_s27 = smov 0   ;;  %s7186_s0 = inlined_call_operand.vmem [shape: f32[2,16,8], index: 0, kind: input, shape index: {}]   ;;  %s7187_s1 = inlined_call_operand.vmem [shape: f32[2,16,1], index: 1, kind: input, shape index: {}]   ;;  %s7188_s2 = inlined_call_operand.vmem [shape: bf16[3848,64], index: 2, kind: input, shape index: {}]   ;;  %s7189_s3 = inlined_call_operand.vmem [shape: f32[21,1,64], index: 3, kind: input, shape index: {}]   ;;  %s7190_s4 = inlined_call_operand.vmem [shape: bf16[448,320], index: 4, kind: input, shape index: {}]   ;;  %s7191_s5 = inlined_call_operand.vmem [shape: f32[3,1,320], index: 5, kind: input, shape index: {}]   ;;  %s7192_s6 = inlined_call_operand.vmem [shape: bf16[320,32], index: 6, kind: input, shape index: {}]   ;;  %s7193_s7 = inlined_call_operand.vmem [shape: f32[1,32], index: 7, kind: input, shape index: {}]   ;;  %s7194_s8 = inlined_call_operand.vmem [shape: f32[2,1,32], index: 8, kind: output, shape index: {}]  }
   0x1 LB: > { %s4173_s28 = sadd.s32 4294967295, %s5641_s27   ;;  %p4177_p0 = scmp.ge.s32.totalorder %s5641_s27, 1  ;;  %s5641_s27 = sphi %s5692_s27, %s18_s27  }
   0x2   : > { %p272_p1 = scmp.lt.s32.totalorder %s5641_s27, 3 }
   0x4   : > { %p273_p2 = pnand %p4177_p0, %p272_p1 }
   0x5   : > { %p309_p3 = scmp.lt.s32.totalorder (!%p273_p2), %s4173_s28, 1 }
   0x6   : > { %276 = sbr.rel (%p273_p2) target bundleno = 4176 (0x1050), region = 52 }
   0xb   : > { %v355_v0 = vld [vmem:[%s7188_s2] sm:$0xf]  ;;  %vm364_vm0 = vcmask 1043456   ;;  %v5643_v2 = vmov 0   ;;  %s7216_s28 = smov (!%p309_p3, %s4173_s28), 1  ;;  %vm360_vm1 = vcmask 64512   ;;  %v325_v29 = vlaneseq }
   0xc   : > { %v366_v1 = vsel %vm364_vm0, %v355_v0, 0  ;;  %5525 = vset.pattern.permute.xlu0 %v5643_v2  ;;  %s5263_s9 = sshll.u32 %s7216_s28, 4  ;;  %v5268_v8 = vld [vmem:[%s7188_s2 + $0x3c] sm:$0xff]  ;;  %v5267_v11 = vld [vmem:[%s7188_s2 + $0x34] sm:$0xff]  ;;  %v5266_v14 = vld [vmem:[%s7188_s2 + $0x2c] sm:$0xff]  ;;  %vm5644_vm5 = vmmov 1   ;;  %v5784_v63 = vunpack.c.l.b16 %v5643_v2  ;;  %v5787_v0 = vunpack.c.h.b16 %v5643_v2 }
   0xd   : > { %375 = vmatpush.bf16.msra.mxu3 %v366_v1  ;;  %s313_s12 = scalar_lea.vmem %s7186_s0, %s5263_s9  ;;  %s318_s15 = scalar_lea.vmem %s7187_s1, %s5263_s9  ;;  %v5272_v9 = vld [vmem:[%s7188_s2 + $0x1c] sm:$0xff]  ;;  %584 = vmatpush.bf16.msra.mxu2 %v5268_v8  ;;  %v5271_v12 = vld [vmem:[%s7188_s2 + $0x14] sm:$0xff]  ;;  %v5265_v15 = vld [vmem:[%s7188_s2 + $0x24] sm:$0xff]  ;;  %v5764_v36 = vshrl.u32 %v325_v29, 7  ;;  %vm536_vm8 = vcmask 523264   ;;  %vm447_vm9 = vcmask 1040384  }
   0xe   : > { %v352_v3 = vld [vmem:[%s313_s12] sm:$0xff]  ;;  %v353_v4 = vld [vmem:[%s313_s12 + $0x8] sm:$0xff]  ;;  %544 = vmatpush.bf16.msra.mxu1 %v5272_v9  ;;  %v5275_v13 = vld [vmem:[%s7188_s2 + $0x54] sm:$0xff]  ;;  %vm448_vm10 = vsmask.f32 256  ;;  %vm481_vm13 = vcmask 1047552   ;;  %s321_s12 = scalar_lea.vmem %s7194_s8, %s7216_s28 }
   0xf   : > { %v382_v5 = vld [vmem:[%s318_s15] sm:$0xff]  ;;  %v354_v6 = vpack.c.bf16 %v353_v4, %v352_v3  ;;  %v383_v7 = vld [vmem:[%s318_s15 + $0x8] sm:$0xff]  ;;  %v327_v39 = vadd.s32 8, %v5764_v36  ;;  %v5770_v41 = vand.u32 15, %v5764_v36  ;;  %vm456_vm6 = vmpackc.low %vm5644_vm5, %vm5644_vm5  ;;  %vm482_vm14 = vsmask.f32 7424 }
  0x10   : > { %386 = vperm.xlu0 %5525, %v382_v5   ;;  %v5276_v10 = vld [vmem:[%s7188_s2 + $0x5c] sm:$0xff]  ;;  %v5270_v26 = vld [vmem:[%s7188_s2 + $0xc] sm:$0xff]  ;;  %v5269_v32 = vld [vmem:[%s7188_s2 + $0x4] sm:$0xff]  ;;  %v458_v52 = vsel %vm456_vm6, 65537, %v5643_v2 }
  0x11   : > { %4182 = vmatmul.msk.bf16.vlgmr.msra.gmra.mxu3 %vm360_vm1, %v354_v6  ;;  %585 = vmatpush.bf16.msra.mxu2 %v5267_v11  ;;  %v5526_v16 = vld [vmem:[%s7189_s3] ss:$0 sm:$0xff]  ;;  %v5274_v27 = vld [vmem:[%s7188_s2 + $0x4c] sm:$0xff]  ;;  %v5273_v33 = vld [vmem:[%s7188_s2 + $0x44] sm:$0xff]  ;;  %v5772_v45 = vand.u32 15, %v327_v39  ;;  %vm426_vm2 = vcmp.ge.s32.totalorder %v5770_v41, 1  ;;  %v460_v56 = vunpack.c.l.b16 %v458_v52 }
  0x12   : > { %633 = vmatpush.bf16.msrb.mxu3 %v5276_v10  ;;  %545 = vmatpush.bf16.msra.mxu1 %v5271_v12  ;;  %vm455_vm3 = vmpackc.low %vm426_vm2, %vm426_vm2  ;;  %v5527_v39 = vld [vmem:[%s7189_s3 + $0x1] ss:$0 sm:$0xff]  ;;  %vm889_vm6 = vcmp.ge.s32.totalorder %v5770_v41, 2 }
  0x13   : > { %vm471_vm4 = vcmp.lt.s32.totalorder %v5772_v45, 15  ;;  %v457_v51 = vsel %vm455_vm3, 65537, %v5643_v2  ;;  %v5781_v62 = vunpack.i.l.s16 %v460_v56  ;;  %vm5794_vm15 = vmand %vm447_vm9, %vm448_vm10  ;;  %v5296_v11 = vld [vmem:[%s7188_s2 + $0x7c] sm:$0xff] }
  0x14   : > { %vm490_vm7 = vmpackc.low %vm471_vm4, %vm471_vm4  ;;  %v459_v55 = vunpack.c.l.b16 %v457_v51 }
  0x15   : > { %586 = vmatpush.bf16.msra.mxu2 %v5266_v14  ;;  %v492_v54 = vsel %vm490_vm7, 65537, %v5643_v2  ;;  %vm467_vm12 = vcmp.ne.s32.totalorder %v5781_v62, %v5787_v0  ;;  %vm500_vm1 = vcmp.ne.s32.totalorder %v5781_v62, %v5784_v63  ;;  %vm5808_vm4 = vmand %vm481_vm13, %vm482_vm14  ;;  %v5300_v14 = vld [vmem:[%s7188_s2 + $0xbc] sm:$0xff]  ;;  %vm924_vm7 = vcmp.lt.s32.totalorder %v5772_v45, 14 }
  0x16   : > { %634 = vmatpush.bf16.msrb.mxu3 %v5275_v13  ;;  %546 = vmatpush.bf16.msra.mxu1 %v5270_v26  ;;  %v494_v59 = vunpack.c.l.b16 %v492_v54  ;;  %v4184_v61 = vunpack.i.l.s16 %v459_v55  ;;  %v5280_v26 = vld [vmem:[%s7188_s2 + $0x3fc] sm:$0xff]  ;;  %v5282_v54 = vld [vmem:[%s7188_s2 + $0x3cc] sm:$0xff]  ;;  %vm908_vm10 = vmpackc.low %vm889_vm6, %vm889_vm6 }
  0x17   : > { %v5286_v55 = vld [vmem:[%s7188_s2 + $0x40c] sm:$0xff]  ;;  %v5356_v62 = vld [vmem:[%s7188_s2 + $0x4fc] sm:$0xff] }
  0x18   : > { %391 = vperm.xlu0 %5525, %v383_v7   ;;  %v4187_v4 = vunpack.i.l.s16 %v494_v59  ;;  %vm466_vm11 = vcmp.ne.s32.totalorder %v4184_v61, %v5784_v63  ;;  %v5285_v59 = vld [vmem:[%s7188_s2 + $0x404] sm:$0xff] }
  0x19   : > { %587 = vmatpush.bf16.msra.mxu2 %v5265_v15  ;;  %vm5804_vm3 = vmpackc.low %vm467_vm12, %vm466_vm11  ;;  %v5291_v15 = vld [vmem:[%s7188_s2 + $0x94] sm:$0xff] }
  0x1a   : > { %635 = vmatpush.bf16.msrb.mxu3 %v5274_v27  ;;  %547 = vmatpush.bf16.msra.mxu1 %v5269_v32  ;;  %vm501_vm2 = vcmp.ne.s32.totalorder %v4187_v4, %v5787_v0  ;;  %v5284_v27 = vld [vmem:[%s7188_s2 + $0x3dc] sm:$0xff]  ;;  %v5283_v32 = vld [vmem:[%s7188_s2 + $0x3d4] sm:$0xff]  ;;  %vm938_vm11 = vmpackc.low %vm924_vm7, %vm924_vm7 }
  0x1b   : > { %vm5815_vm5 = vmpackc.low %vm501_vm2, %vm500_vm1  ;;  %751 = vmatpush.bf16.msra.mxu0 %v5284_v27  ;;  %vm928_vm2 = vcmask 1046528  }
  0x1e   : > { %636 = vmatpush.bf16.msrb.mxu3 %v5273_v33  ;;  %791 = vmatpush.bf16.msrb.mxu1 %v5280_v26 }
  0x1f   : > { %752 = vmatpush.bf16.msra.mxu0 %v5283_v32 }
  0x22   : > { %991 = vmatpush.bf16.msra.mxu3 %v5296_v11 }
  0x23   : > { %753 = vmatpush.bf16.msra.mxu0 %v5282_v54  ;;  %v5528_v54 = vld [vmem:[%s7189_s3 + $0xb] ss:$0 sm:$0xff] }
  0x82   : > { %v387_v17 = vpop.permute.xlu0 %386 }
  0x8a   : > { %v392_v28 = vpop.permute.xlu0 %391 }
  0x94   : > { %v377_v18 = vpop.f32.mrf.mxu3 }
  0x95   : > { %v378_v19 = vadd.f32 %v5526_v16, %v377_v18 }
  0x97   : > { %v5741_v20 = vmul.f32 %v387_v17, %v378_v19 }
  0x99   : > { %v396_v21 = vmul.f32 %v5741_v20, %v5741_v20 }
  0x9b   : > { %v398_v22 = vmul.f32 %v396_v21, %v5741_v20  ;;  %v5295_v21 = vld [vmem:[%s7188_s2 + $0x74] sm:$0xff] }
  0x9c   : > { %v379_v23 = vpop.f32.mrf.mxu3  ;;  %992 = vmatpush.bf16.msra.mxu3 %v5295_v21 }
  0x9d   : > { %v380_v24 = vadd.f32 %v5526_v16, %v379_v23  ;;  %v400_v25 = vmul.f32 0.044715, %v398_v22 }
  0x9f   : > { %v5752_v30 = vmul.f32 %v392_v28, %v380_v24  ;;  %v402_v31 = vadd.f32 %v400_v25, %v5741_v20  ;;  %v5288_v28 = vld [vmem:[%s7188_s2 + $0x41c] sm:$0xff] }
  0xa0   : > { %840 = vmatpush.bf16.msrb.mxu2 %v5288_v28 }
  0xa1   : > { %v397_v34 = vmul.f32 %v5752_v30, %v5752_v30  ;;  %v404_v35 = vmul.f32 0.7978846, %v402_v31  ;;  %v5279_v31 = vld [vmem:[%s7188_s2 + $0x3f4] sm:$0xff] }
  0xa2   : > { %792 = vmatpush.bf16.msrb.mxu1 %v5279_v31 }
  0xa3   : > { %v399_v37 = vmul.f32 %v397_v34, %v5752_v30  ;;  %5547 = vtanh.f32 %v404_v35  ;;  %v5287_v34 = vld [vmem:[%s7188_s2 + $0x414] sm:$0xff] }
  0xa4   : > { %841 = vmatpush.bf16.msrb.mxu2 %v5287_v34 }
  0xa5   : > { %v401_v38 = vmul.f32 0.044715, %v399_v37  ;;  %v5278_v37 = vld [vmem:[%s7188_s2 + $0x3ec] sm:$0xff] }
  0xa6   : > { %793 = vmatpush.bf16.msrb.mxu1 %v5278_v37 }
  0xa7   : > { %v403_v40 = vadd.f32 %v401_v38, %v5752_v30 }
  0xa8   : > { %842 = vmatpush.bf16.msrb.mxu2 %v5286_v55 }
  0xa9   : > { %v5548_v42 = vpop.eup %5547  ;;  %v405_v43 = vmul.f32 0.7978846, %v403_v40 }
  0xaa   : > { %v408_v44 = vadd.f32 1.0, %v5548_v42 }
  0xab   : > { %5549 = vtanh.f32 %v405_v43  ;;  %v5277_v43 = vld [vmem:[%s7188_s2 + $0x3e4] sm:$0xff] }
  0xac   : > { %v410_v46 = vmul.f32 0.5, %v408_v44  ;;  %794 = vmatpush.bf16.msrb.mxu1 %v5277_v43  ;;  %843 = vmatpush.bf16.msrb.mxu2 %v5285_v59 }
  0xae   : > { %v412_v47 = vmul.f32 %v410_v46, %v5741_v20 }
  0xb0   : > { %v416_v50 = vpack.c.bf16 %v412_v47, %v412_v47 }
  0xb1   : > { %v5550_v48 = vpop.eup %5549 }
  0xb2   : > { %v409_v49 = vadd.f32 1.0, %v5550_v48  ;;  %v437_v58 = vunpack.c.l.b16 %v416_v50 }
  0xb4   : > { %v411_v53 = vmul.f32 0.5, %v409_v49  ;;  %v475_v3 = vpack.c.b16 %v437_v58, %v437_v58 }
  0xb6   : > { %v413_v57 = vmul.f32 %v411_v53, %v5752_v30  ;;  %v477_v9 = vshll.u32 %v475_v3, 16 }
  0xb8   : > { %v417_v60 = vpack.c.bf16 %v413_v57, %v413_v57  ;;  %v479_v19 = vrot.slane %v477_v9, 1 }
  0xba   : > { %v429_v1 = vunpack.c.l.b16 %v417_v60 }
  0xbc   : > { %v430_v5 = vpack.c.b16 %v429_v1, %v429_v1  ;;  %v438_v6 = vpack.c.b16 %v429_v1, %v437_v58  ;;  %v5281_v58 = vld [vmem:[%s7188_s2 + $0x3c4] sm:$0xff] }
  0xbd   : > { %754 = vmatpush.bf16.msra.mxu0 %v5281_v58 }
  0xbe   : > { %v440_v7 = vshrl.u32 %v438_v6, 16  ;;  %v443_v8 = vshll.u32 %v438_v6, 16  ;;  %4221 = vmatmul.msk.bf16.vlgmr.msra.gmra.mxu2 %vm536_vm8, %v438_v6  ;;  %v432_v10 = vshrl.u32 %v430_v5, 16 }
  0xc0   : > { %v472_v12 = vrot.slane %v443_v8, 1  ;;  %v442_v13 = vrot.slane %v440_v7, 7  ;;  %v434_v16 = vrot.slane %v432_v10, 3 }
  0xc2   : > { %v445_v17 = vor.u32 %v443_v8, %v442_v13  ;;  %v473_v18 = vor.u32 %v472_v12, %v440_v7 }
  0xc4   : > { %v450_v22 = vsel %vm5794_vm15, %v434_v16, %v445_v17  ;;  %v484_v23 = vsel %vm5808_vm4, %v473_v18, %v479_v19 }
  0xc5   : > { %v469_v24 = vsel %vm5804_vm3, %v450_v22, 0  ;;  %v503_v25 = vsel %vm5815_vm5, %v484_v23, 0 }
  0xc6   : > { %4204 = vmatmul.msk.bf16.vlgmr.msra.gmra.mxu1 %vm536_vm8, %v469_v24  ;;  %4238 = vmatmul.msk.bf16.vlgmr.msrb.gmra.mxu3 %vm536_vm8, %v503_v25 }
  0xc7   : > { %1081 = vmatpush.bf16.msra.mxu1 %v5300_v14  ;;  %v5324_v14 = vld [vmem:[%s7188_s2 + $0x11c] sm:$0xff] }
 0x141   : > { %v589_v35 = vpop.f32.mrf.mxu2 }
 0x143   : > { %v549_v33 = vpop.f32.mrf.mxu1 }
 0x144   : > { %v590_v38 = vadd.f32 %v589_v35, %v549_v33 }
 0x149   : > { %v638_v40 = vpop.f32.mrf.mxu3  ;;  %v591_v48 = vpop.f32.mrf.mxu2 }
 0x14a   : > { %v643_v42 = vadd.f32 %v638_v40, %v590_v38 }
 0x14b   : > { %v551_v46 = vpop.f32.mrf.mxu1 }
 0x14c   : > { %v648_v44 = vadd.f32 %v5527_v39, %v643_v42  ;;  %v592_v50 = vadd.f32 %v591_v48, %v551_v46  ;;  %v5299_v46 = vld [vmem:[%s7188_s2 + $0xb4] sm:$0xff]  ;;  %v5294_v48 = vld [vmem:[%s7188_s2 + $0x6c] sm:$0xff] }
 0x14d   : > { %1082 = vmatpush.bf16.msra.mxu1 %v5299_v46  ;;  %993 = vmatpush.bf16.msra.mxu3 %v5294_v48  ;;  %v5315_v48 = vld [vmem:[%s7188_s2 + $0xf4] sm:$0xff] }
 0x14e   : > { %v650_v47 = vmul.f32 %v648_v44, %v648_v44 }
 0x150   : > { %v652_v49 = vmul.f32 %v650_v47, %v648_v44  ;;  %v5290_v47 = vld [vmem:[%s7188_s2 + $0x8c] sm:$0xff] }
 0x151   : > { %v640_v51 = vpop.f32.mrf.mxu3 }
 0x152   : > { %v654_v52 = vmul.f32 0.044715, %v652_v49  ;;  %v644_v53 = vadd.f32 %v640_v51, %v592_v50  ;;  %v5298_v49 = vld [vmem:[%s7188_s2 + $0xac] sm:$0xff]  ;;  %v5289_v50 = vld [vmem:[%s7188_s2 + $0x84] sm:$0xff] }
 0x153   : > { %1083 = vmatpush.bf16.msra.mxu1 %v5298_v49 }
 0x154   : > { %v656_v56 = vadd.f32 %v654_v52, %v648_v44  ;;  %v649_v57 = vadd.f32 %v5527_v39, %v644_v53 }
 0x156   : > { %v658_v60 = vmul.f32 0.7978846, %v656_v56  ;;  %v651_v61 = vmul.f32 %v649_v57, %v649_v57 }
 0x158   : > { %5551 = vtanh.f32 %v658_v60  ;;  %v653_v1 = vmul.f32 %v651_v61, %v649_v57 }
 0x15a   : > { %v655_v3 = vmul.f32 0.044715, %v653_v1 }
 0x15c   : > { %v657_v4 = vadd.f32 %v655_v3, %v649_v57 }
 0x15e   : > { %v5552_v5 = vpop.eup %5551  ;;  %v659_v6 = vmul.f32 0.7978846, %v657_v4 }
 0x15f   : > { %v662_v7 = vadd.f32 1.0, %v5552_v5 }
 0x160   : > { %5553 = vtanh.f32 %v659_v6 }
 0x161   : > { %v664_v8 = vmul.f32 0.5, %v662_v7 }
 0x163   : > { %v666_v9 = vmul.f32 %v664_v8, %v648_v44  ;;  %v5292_v44 = vld [vmem:[%s7188_s2 + $0x9c] sm:$0xff]  ;;  %v5293_v8 = vld [vmem:[%s7188_s2 + $0x64] sm:$0xff] }
 0x164   : > { %1032 = vmatpush.bf16.msrb.mxu0 %v5292_v44  ;;  %994 = vmatpush.bf16.msra.mxu3 %v5293_v8 }
 0x165   : > { %v670_v13 = vpack.c.bf16 %v666_v9, %v666_v9 }
 0x166   : > { %v5554_v10 = vpop.eup %5553 }
 0x167   : > { %v663_v12 = vadd.f32 1.0, %v5554_v10  ;;  %v689_v18 = vunpack.c.l.b16 %v670_v13 }
 0x168   : > { %1033 = vmatpush.bf16.msrb.mxu0 %v5291_v15 }
 0x169   : > { %v665_v16 = vmul.f32 0.5, %v663_v12  ;;  %v704_v23 = vpack.c.b16 %v689_v18, %v689_v18 }
 0x16b   : > { %v667_v17 = vmul.f32 %v665_v16, %v649_v57  ;;  %v706_v31 = vshll.u32 %v704_v23, 16 }
 0x16c   : > { %1034 = vmatpush.bf16.msrb.mxu0 %v5290_v47 }
 0x16d   : > { %v671_v19 = vpack.c.bf16 %v667_v17, %v667_v17  ;;  %v708_v38 = vrot.slane %v706_v31, 1 }
 0x16f   : > { %v681_v22 = vunpack.c.l.b16 %v671_v19 }
 0x170   : > { %1035 = vmatpush.bf16.msrb.mxu0 %v5289_v50 }
 0x171   : > { %v690_v24 = vpack.c.b16 %v681_v22, %v689_v18  ;;  %v682_v25 = vpack.c.b16 %v681_v22, %v681_v22 }
 0x173   : > { %4273 = vmatmul.msk.bf16.vlgmr.msrb.gmra.mxu1 %vm536_vm8, %v690_v24  ;;  %v684_v26 = vshrl.u32 %v682_v25, 16  ;;  %v692_v27 = vshrl.u32 %v690_v24, 16  ;;  %v695_v28 = vshll.u32 %v690_v24, 16  ;;  %v910_v25 = vsel %vm908_vm10, 65537, %v5643_v2 }
 0x175   : > { %v694_v32 = vrot.slane %v692_v27, 7  ;;  %v701_v33 = vrot.slane %v695_v28, 1  ;;  %v686_v34 = vrot.slane %v684_v26, 3  ;;  %v940_v26 = vsel %vm938_vm11, 65537, %v5643_v2 }
 0x176   : > { %vm1337_vm11 = vcmask 1041408  }
 0x177   : > { %v697_v35 = vor.u32 %v695_v28, %v694_v32  ;;  %v702_v37 = vor.u32 %v701_v33, %v692_v27  ;;  %v912_v32 = vunpack.c.l.b16 %v910_v25  ;;  %v942_v33 = vunpack.c.l.b16 %v940_v26 }
 0x179   : > { %v699_v39 = vsel %vm5794_vm15, %v686_v34, %v697_v35  ;;  %v710_v40 = vsel %vm5808_vm4, %v702_v37, %v708_v38  ;;  %v4292_v38 = vunpack.i.l.s16 %v912_v32  ;;  %vm1362_vm4 = vcmp.lt.s32.totalorder %v5772_v45, 12 }
 0x17a   : > { %v700_v42 = vsel %vm5804_vm3, %v699_v39, 0  ;;  %v711_v43 = vsel %vm5815_vm5, %v710_v40, 0  ;;  %v4295_v39 = vunpack.i.l.s16 %v942_v33  ;;  %vm1376_vm6 = vmpackc.low %vm1362_vm4, %vm1362_vm4 }
 0x17b   : > { %4256 = vmatmul.msk.bf16.vlgmr.msra.gmra.mxu0 %vm536_vm8, %v700_v42  ;;  %4290 = vmatmul.msk.bf16.vlgmr.msrb.gmra.mxu2 %vm536_vm8, %v711_v43  ;;  %vm919_vm13 = vcmp.ne.s32.totalorder %v4292_v38, %v5784_v63 }
 0x17c   : > { %vm949_vm14 = vcmp.ne.s32.totalorder %v4295_v39, %v5787_v0  ;;  %vm5943_vm15 = vmpackc.low %vm467_vm12, %vm919_vm13 }
 0x17d   : > { %vm5951_vm3 = vmpackc.low %vm949_vm14, %vm500_vm1  ;;  %vm1366_vm14 = vcmask 1045504  }
 0x1f0   : > { %v796_v52 = vpop.f32.mrf.mxu1 }
 0x1f8   : > { %v756_v51 = vpop.f32.mrf.mxu0  ;;  %v798_v60 = vpop.f32.mrf.mxu1 }
 0x1f9   : > { %v797_v53 = vadd.f32 %v796_v52, %v756_v51 }
 0x1fe   : > { %v845_v55 = vpop.f32.mrf.mxu2 }
 0x1ff   : > { %v850_v56 = vadd.f32 %v845_v55, %v797_v53  ;;  %v5304_v53 = vld [vmem:[%s7188_s2 + $0x45c] sm:$0xff] }
 0x200   : > { %v758_v58 = vpop.f32.mrf.mxu0  ;;  %1229 = vmatpush.bf16.msrb.mxu3 %v5304_v53  ;;  %v5308_v55 = vld [vmem:[%s7188_s2 + $0x43c] sm:$0xff] }
 0x201   : > { %v855_v57 = vadd.f32 %v5528_v54, %v850_v56  ;;  %v799_v1 = vadd.f32 %v798_v60, %v758_v58  ;;  %v5303_v56 = vld [vmem:[%s7188_s2 + $0x454] sm:$0xff]  ;;  %1188 = vmatpush.bf16.msra.mxu2 %v5308_v55 }
 0x203   : > { %v5913_v59 = vadd.f32 %v855_v57, %v5741_v20  ;;  %v5297_v20 = vld [vmem:[%s7188_s2 + $0xa4] sm:$0xff]  ;;  %v5312_v57 = vld [vmem:[%s7188_s2 + $0x47c] sm:$0xff] }
 0x204   : > { %1084 = vmatpush.bf16.msra.mxu1 %v5297_v20  ;;  %1230 = vmatpush.bf16.msrb.mxu3 %v5303_v56  ;;  %v5306_v20 = vld [vmem:[%s7188_s2 + $0x42c] sm:$0xff] }
 0x205   : > { %v859_v61 = vmul.f32 %v5913_v59, %v5913_v59  ;;  %1278 = vmatpush.bf16.msra.mxu0 %v5312_v57 }
 0x206   : > { %v847_v3 = vpop.f32.mrf.mxu2 }
 0x207   : > { %v861_v4 = vmul.f32 %v859_v61, %v5913_v59  ;;  %v851_v5 = vadd.f32 %v847_v3, %v799_v1  ;;  %v5529_v1 = vld [vmem:[%s7189_s3 + $0x2] ss:$0 sm:$0xff] }
 0x209   : > { %v863_v6 = vmul.f32 0.044715, %v861_v4  ;;  %v856_v7 = vadd.f32 %v5528_v54, %v851_v5  ;;  %v5307_v4 = vld [vmem:[%s7188_s2 + $0x434] sm:$0xff]  ;;  %v5302_v5 = vld [vmem:[%s7188_s2 + $0x44c] sm:$0xff] }
 0x20a   : > { %1189 = vmatpush.bf16.msra.mxu2 %v5307_v4  ;;  %1231 = vmatpush.bf16.msrb.mxu3 %v5302_v5  ;;  %v5314_v5 = vld [vmem:[%s7188_s2 + $0xec] sm:$0xff] }
 0x20b   : > { %v5925_v9 = vadd.f32 %v856_v7, %v5752_v30  ;;  %v865_v10 = vadd.f32 %v863_v6, %v5913_v59  ;;  %v5311_v6 = vld [vmem:[%s7188_s2 + $0x474] sm:$0xff] }
 0x20c   : > { %1279 = vmatpush.bf16.msra.mxu0 %v5311_v6  ;;  %v5318_v6 = vld [vmem:[%s7188_s2 + $0xcc] sm:$0xff] }
 0x20d   : > { %v860_v12 = vmul.f32 %v5925_v9, %v5925_v9  ;;  %v867_v13 = vmul.f32 0.7978846, %v865_v10  ;;  %v5301_v10 = vld [vmem:[%s7188_s2 + $0x444] sm:$0xff] }
 0x20e   : > { %1190 = vmatpush.bf16.msra.mxu2 %v5306_v20  ;;  %1232 = vmatpush.bf16.msrb.mxu3 %v5301_v10  ;;  %v5322_v20 = vld [vmem:[%s7188_s2 + $0x10c] sm:$0xff] }
 0x20f   : > { %v862_v16 = vmul.f32 %v860_v12, %v5925_v9  ;;  %5555 = vtanh.f32 %v867_v13  ;;  %v5310_v12 = vld [vmem:[%s7188_s2 + $0x46c] sm:$0xff] }
 0x210   : > { %1280 = vmatpush.bf16.msra.mxu0 %v5310_v12  ;;  %v5530_v12 = vld [vmem:[%s7189_s3 + $0xc] ss:$0 sm:$0xff] }
 0x211   : > { %v864_v17 = vmul.f32 0.044715, %v862_v16 }
 0x213   : > { %v866_v18 = vadd.f32 %v864_v17, %v5925_v9 }
 0x215   : > { %v5556_v19 = vpop.eup %5555  ;;  %v868_v22 = vmul.f32 0.7978846, %v866_v18 }
 0x216   : > { %v871_v30 = vadd.f32 1.0, %v5556_v19 }
 0x217   : > { %5557 = vtanh.f32 %v868_v22 }
 0x218   : > { %v873_v23 = vmul.f32 0.5, %v871_v30 }
 0x21a   : > { %v875_v24 = vmul.f32 %v873_v23, %v5913_v59  ;;  %v5305_v23 = vld [vmem:[%s7188_s2 + $0x424] sm:$0xff] }
 0x21b   : > { %1191 = vmatpush.bf16.msra.mxu2 %v5305_v23 }
 0x21c   : > { %v879_v31 = vpack.c.bf16 %v875_v24, %v875_v24  ;;  %v5309_v24 = vld [vmem:[%s7188_s2 + $0x464] sm:$0xff] }
 0x21d   : > { %v5558_v27 = vpop.eup %5557  ;;  %1281 = vmatpush.bf16.msra.mxu0 %v5309_v24 }
 0x21e   : > { %v872_v28 = vadd.f32 1.0, %v5558_v27  ;;  %v896_v37 = vunpack.c.l.b16 %v879_v31 }
 0x220   : > { %v874_v34 = vmul.f32 0.5, %v872_v28  ;;  %v926_v43 = vpack.c.b16 %v896_v37, %v896_v37 }
 0x222   : > { %v876_v35 = vmul.f32 %v874_v34, %v5925_v9  ;;  %v927_v47 = vrot.slane %v926_v43, 1 }
 0x224   : > { %v880_v40 = vpack.c.bf16 %v876_v35, %v876_v35 }
 0x226   : > { %v892_v42 = vunpack.c.l.b16 %v880_v40 }
 0x228   : > { %v893_v44 = vpack.c.b16 %v892_v42, %v892_v42  ;;  %v897_v11 = vpack.c.b16 %v892_v42, %v896_v37 }
 0x22a   : > { %4329 = vmatmul.msk.bf16.vlgmr.msrb.gmra.mxu0 %vm536_vm8, %v897_v11  ;;  %v894_v15 = vrot.slane %v893_v44, 3  ;;  %v898_v21 = vrot.slane %v897_v11, 7  ;;  %v925_v46 = vrot.slane %v897_v11, 1 }
 0x22c   : > { %v902_v49 = vsel %vm447_vm9, %v894_v15, %v898_v21  ;;  %v931_v50 = vsel %vm928_vm2, %v925_v46, %v927_v47 }
 0x22d   : > { %v922_v51 = vsel %vm5943_vm15, %v902_v49, 0  ;;  %v951_v52 = vsel %vm5951_vm3, %v931_v50, 0 }
 0x22e   : > { %4312 = vmatmul.msk.bf16.vlgmr.msra.gmra.mxu3 %vm536_vm8, %v922_v51  ;;  %4346 = vmatmul.msk.bf16.vlgmr.msra.gmra.mxu1 %vm536_vm8, %v951_v52 }
 0x22f   : > { %1519 = vmatpush.bf16.msra.mxu3 %v5324_v14 }
 0x2a7   : > { %v1037_v54 = vpop.f32.mrf.mxu0 }
 0x2ab   : > { %v1086_v58 = vpop.f32.mrf.mxu1 }
 0x2af   : > { %v1039_v13 = vpop.f32.mrf.mxu0 }
 0x2b1   : > { %v996_v60 = vpop.f32.mrf.mxu3 }
 0x2b2   : > { %v1038_v61 = vadd.f32 %v1037_v54, %v996_v60  ;;  %v5316_v60 = vld [vmem:[%s7188_s2 + $0xfc] sm:$0xff] }
 0x2b3   : > { %v1088_v19 = vpop.f32.mrf.mxu1  ;;  %1470 = vmatpush.bf16.msrb.mxu2 %v5316_v60  ;;  %v5340_v60 = vld [vmem:[%s7188_s2 + $0x15c] sm:$0xff] }
 0x2b4   : > { %v1091_v3 = vadd.f32 %v1086_v58, %v1038_v61  ;;  %v5320_v61 = vld [vmem:[%s7188_s2 + $0xdc] sm:$0xff] }
 0x2b5   : > { %1429 = vmatpush.bf16.msrb.mxu1 %v5320_v61 }
 0x2b6   : > { %v1096_v7 = vadd.f32 %v5529_v1, %v1091_v3  ;;  %v5323_v3 = vld [vmem:[%s7188_s2 + $0x114] sm:$0xff] }
 0x2b7   : > { %1471 = vmatpush.bf16.msrb.mxu2 %v5315_v48  ;;  %1520 = vmatpush.bf16.msra.mxu3 %v5323_v3  ;;  %v5343_v3 = vld [vmem:[%s7188_s2 + $0x134] sm:$0xff] }
 0x2b8   : > { %v1098_v8 = vmul.f32 %v1096_v7, %v1096_v7 }
 0x2b9   : > { %v998_v16 = vpop.f32.mrf.mxu3 }
 0x2ba   : > { %v1100_v17 = vmul.f32 %v1098_v8, %v1096_v7  ;;  %v1040_v18 = vadd.f32 %v1039_v13, %v998_v16  ;;  %v5313_v16 = vld [vmem:[%s7188_s2 + $0xe4] sm:$0xff] }
 0x2bb   : > { %1472 = vmatpush.bf16.msrb.mxu2 %v5314_v5  ;;  %1521 = vmatpush.bf16.msra.mxu3 %v5322_v20 }
 0x2bc   : > { %v1102_v22 = vmul.f32 0.044715, %v1100_v17  ;;  %v1092_v30 = vadd.f32 %v1088_v19, %v1040_v18 }
 0x2be   : > { %v1104_v25 = vadd.f32 %v1102_v22, %v1096_v7  ;;  %v1097_v26 = vadd.f32 %v5529_v1, %v1092_v30  ;;  %v5319_v1 = vld [vmem:[%s7188_s2 + $0xd4] sm:$0xff] }
 0x2bf   : > { %1430 = vmatpush.bf16.msrb.mxu1 %v5319_v1  ;;  %1473 = vmatpush.bf16.msrb.mxu2 %v5313_v16  ;;  %v5336_v16 = vld [vmem:[%s7188_s2 + $0x4dc] sm:$0xff] }
 0x2c0   : > { %v1106_v27 = vmul.f32 0.7978846, %v1104_v25  ;;  %v1099_v28 = vmul.f32 %v1097_v26, %v1097_v26 }
 0x2c2   : > { %5559 = vtanh.f32 %v1106_v27  ;;  %v1101_v31 = vmul.f32 %v1099_v28, %v1097_v26 }
 0x2c3   : > { %1431 = vmatpush.bf16.msrb.mxu1 %v5318_v6 }
 0x2c4   : > { %v1103_v32 = vmul.f32 0.044715, %v1101_v31  ;;  %v5317_v31 = vld [vmem:[%s7188_s2 + $0xc4] sm:$0xff] }
 0x2c6   : > { %v1105_v33 = vadd.f32 %v1103_v32, %v1097_v26 }
 0x2c7   : > { %1432 = vmatpush.bf16.msrb.mxu1 %v5317_v31  ;;  %v5330_v31 = vld [vmem:[%s7188_s2 + $0x48c] sm:$0xff] }
 0x2c8   : > { %v5560_v34 = vpop.eup %5559  ;;  %v1107_v35 = vmul.f32 0.7978846, %v1105_v33 }
 0x2c9   : > { %v1110_v37 = vadd.f32 1.0, %v5560_v34 }
 0x2ca   : > { %5561 = vtanh.f32 %v1107_v35 }
 0x2cb   : > { %v1112_v38 = vmul.f32 0.5, %v1110_v37 }
 0x2cd   : > { %v1114_v39 = vmul.f32 %v1112_v38, %v1096_v7 }
 0x2cf   : > { %v1118_v42 = vpack.c.bf16 %v1114_v39, %v1114_v39 }
 0x2d0   : > { %v5562_v40 = vpop.eup %5561 }
 0x2d1   : > { %v1111_v43 = vadd.f32 1.0, %v5562_v40  ;;  %v1133_v11 = vunpack.c.l.b16 %v1118_v42 }
 0x2d3   : > { %v1113_v44 = vmul.f32 0.5, %v1111_v43  ;;  %v1142_v47 = vpack.c.b16 %v1133_v11, %v1133_v11 }
 0x2d5   : > { %v1115_v15 = vmul.f32 %v1113_v44, %v1097_v26  ;;  %v1143_v54 = vrot.slane %v1142_v47, 1 }
 0x2d7   : > { %v1119_v21 = vpack.c.bf16 %v1115_v15, %v1115_v15  ;;  %v1378_v15 = vsel %vm1376_vm6, 65537, %v5643_v2 }
 0x2d9   : > { %v1129_v46 = vunpack.c.l.b16 %v1119_v21 }
 0x2db   : > { %v1134_v49 = vpack.c.b16 %v1129_v46, %v1133_v11  ;;  %v1130_v50 = vpack.c.b16 %v1129_v46, %v1129_v46 }
 0x2dd   : > { %4381 = vmatmul.msk.bf16.vlgmr.msrb.gmra.mxu3 %vm536_vm8, %v1134_v49  ;;  %v1131_v51 = vrot.slane %v1130_v50, 3  ;;  %v1135_v52 = vrot.slane %v1134_v49, 7  ;;  %v1141_v53 = vrot.slane %v1134_v49, 1  ;;  %v1380_v50 = vunpack.c.l.b16 %v1378_v15 }
 0x2df   : > { %v1138_v55 = vsel %vm447_vm9, %v1131_v51, %v1135_v52  ;;  %v1146_v56 = vsel %vm928_vm2, %v1141_v53, %v1143_v54  ;;  %vm1327_vm9 = vcmp.ge.s32.totalorder %v5770_v41, 4  ;;  %v4403_v53 = vunpack.i.l.s16 %v1380_v50 }
 0x2e0   : > { %v1140_v57 = vsel %vm5943_vm15, %v1138_v55, 0  ;;  %v1148_v58 = vsel %vm5951_vm3, %v1146_v56, 0  ;;  %vm1346_vm5 = vmpackc.low %vm1327_vm9, %vm1327_vm9  ;;  %vm5645_vm2 = vmmov 0  }
 0x2e1   : > { %4364 = vmatmul.msk.bf16.vlgmr.msra.gmra.mxu2 %vm536_vm8, %v1140_v57  ;;  %4398 = vmatmul.msk.bf16.vlgmr.msra.gmra.mxu0 %vm536_vm8, %v1148_v58  ;;  %v1348_v11 = vsel %vm1346_vm5, 65537, %v5643_v2  ;;  %vm1387_vm10 = vcmp.ne.s32.totalorder %v4403_v53, %v5787_v0  ;;  %vm1778_vm3 = vmpackc.low %vm5645_vm2, %vm5645_vm2 }
 0x2e2   : > { %v1350_v49 = vunpack.c.l.b16 %v1348_v11  ;;  %vm6083_vm15 = vmpackc.low %vm1387_vm10, %vm500_vm1  ;;  %1716 = vmatpush.bf16.msra.mxu2 %v5336_v16  ;;  %v5348_v16 = vld [vmem:[%s7188_s2 + $0x17c] sm:$0xff] }
 0x2e4   : > { %v4400_v45 = vunpack.i.l.s16 %v1350_v49 }
 0x2e6   : > { %vm1357_vm7 = vcmp.ne.s32.totalorder %v4400_v45, %v5784_v63 }
 0x2e7   : > { %vm6075_vm13 = vmpackc.low %vm467_vm12, %vm1357_vm7 }
 0x35e   : > { %v1283_v7 = vpop.f32.mrf.mxu0 }
 0x360   : > { %v1234_v4 = vpop.f32.mrf.mxu3 }
 0x364   : > { %v1193_v8 = vpop.f32.mrf.mxu2 }
 0x365   : > { %v1235_v10 = vadd.f32 %v1234_v4, %v1193_v8  ;;  %v5328_v8 = vld [vmem:[%s7188_s2 + $0x4bc] sm:$0xff] }
 0x366   : > { %v1285_v24 = vpop.f32.mrf.mxu0  ;;  %1667 = vmatpush.bf16.msra.mxu1 %v5328_v8 }
 0x367   : > { %v1288_v13 = vadd.f32 %v1283_v7, %v1235_v10 }
 0x368   : > { %v1236_v19 = vpop.f32.mrf.mxu3 }
 0x369   : > { %v1293_v17 = vadd.f32 %v5530_v12, %v1288_v13  ;;  %v5327_v13 = vld [vmem:[%s7188_s2 + $0x4b4] sm:$0xff] }
 0x36a   : > { %1668 = vmatpush.bf16.msra.mxu1 %v5327_v13  ;;  %v5344_v13 = vld [vmem:[%s7188_s2 + $0x13c] sm:$0xff] }
 0x36b   : > { %v6045_v18 = vadd.f32 %v1293_v17, %v5913_v59  ;;  %v5321_v59 = vld [vmem:[%s7188_s2 + $0x104] sm:$0xff] }
 0x36c   : > { %v1195_v22 = vpop.f32.mrf.mxu2  ;;  %1522 = vmatpush.bf16.msra.mxu3 %v5321_v59  ;;  %v5325_v59 = vld [vmem:[%s7188_s2 + $0x4a4] sm:$0xff] }
 0x36d   : > { %v1297_v30 = vmul.f32 %v6045_v18, %v6045_v18  ;;  %v1237_v23 = vadd.f32 %v1236_v19, %v1195_v22  ;;  %v5531_v19 = vld [vmem:[%s7189_s3 + $0x3] ss:$0 sm:$0xff] }
 0x36f   : > { %v1299_v25 = vmul.f32 %v1297_v30, %v6045_v18  ;;  %v1289_v26 = vadd.f32 %v1285_v24, %v1237_v23  ;;  %v5331_v23 = vld [vmem:[%s7188_s2 + $0x494] sm:$0xff]  ;;  %v5326_v24 = vld [vmem:[%s7188_s2 + $0x4ac] sm:$0xff] }
 0x370   : > { %1669 = vmatpush.bf16.msra.mxu1 %v5326_v24  ;;  %1853 = vmatpush.bf16.msrb.mxu3 %v5344_v13  ;;  %v5338_v24 = vld [vmem:[%s7188_s2 + $0x14c] sm:$0xff]  ;;  %v5355_v13 = vld [vmem:[%s7188_s2 + $0x4f4] sm:$0xff] }
 0x371   : > { %v1301_v27 = vmul.f32 0.044715, %v1299_v25  ;;  %v1294_v28 = vadd.f32 %v5530_v12, %v1289_v26  ;;  %v5332_v12 = vld [vmem:[%s7188_s2 + $0x49c] sm:$0xff]  ;;  %v5335_v25 = vld [vmem:[%s7188_s2 + $0x4d4] sm:$0xff] }
 0x372   : > { %1626 = vmatpush.bf16.msrb.mxu0 %v5332_v12  ;;  %1717 = vmatpush.bf16.msra.mxu2 %v5335_v25 }
 0x373   : > { %v1303_v32 = vadd.f32 %v1301_v27, %v6045_v18  ;;  %v6058_v33 = vadd.f32 %v1294_v28, %v5925_v9 }
 0x374   : > { %1670 = vmatpush.bf16.msra.mxu1 %v5325_v59  ;;  %1854 = vmatpush.bf16.msrb.mxu3 %v5343_v3  ;;  %v5532_v59 = vld [vmem:[%s7189_s3 + $0xd] ss:$0 sm:$0xff]  ;;  %v5351_v3 = vld [vmem:[%s7188_s2 + $0x514] sm:$0xff] }
 0x375   : > { %v1305_v34 = vmul.f32 0.7978846, %v1303_v32  ;;  %v1298_v35 = vmul.f32 %v6058_v33, %v6058_v33  ;;  %v5334_v32 = vld [vmem:[%s7188_s2 + $0x4cc] sm:$0xff] }
 0x376   : > { %1627 = vmatpush.bf16.msrb.mxu0 %v5331_v23  ;;  %1718 = vmatpush.bf16.msra.mxu2 %v5334_v32 }
 0x377   : > { %v1300_v37 = vmul.f32 %v1298_v35, %v6058_v33  ;;  %5563 = vtanh.f32 %v1305_v34 }
 0x379   : > { %v1302_v38 = vmul.f32 0.044715, %v1300_v37 }
 0x37a   : > { %1628 = vmatpush.bf16.msrb.mxu0 %v5330_v31 }
 0x37b   : > { %v1304_v39 = vadd.f32 %v1302_v38, %v6058_v33 }
 0x37d   : > { %v5564_v40 = vpop.eup %5563  ;;  %v1306_v42 = vmul.f32 0.7978846, %v1304_v39 }
 0x37e   : > { %v1309_v43 = vadd.f32 1.0, %v5564_v40 }
 0x37f   : > { %5565 = vtanh.f32 %v1306_v42  ;;  %v5329_v42 = vld [vmem:[%s7188_s2 + $0x484] sm:$0xff] }
 0x380   : > { %v1311_v9 = vmul.f32 0.5, %v1309_v43  ;;  %v5333_v43 = vld [vmem:[%s7188_s2 + $0x4c4] sm:$0xff]  ;;  %1629 = vmatpush.bf16.msrb.mxu0 %v5329_v42 }
 0x381   : > { %1719 = vmatpush.bf16.msra.mxu2 %v5333_v43 }
 0x382   : > { %v1313_v44 = vmul.f32 %v1311_v9, %v6045_v18 }
 0x384   : > { %v1317_v47 = vpack.c.bf16 %v1313_v44, %v1313_v44  ;;  %1897 = vmatpush.bf16.msra.mxu0 %v5340_v60 }
 0x385   : > { %v5566_v21 = vpop.eup %5565 }
 0x386   : > { %v1310_v46 = vadd.f32 1.0, %v5566_v21  ;;  %v1334_v52 = vunpack.c.l.b16 %v1317_v47 }
 0x388   : > { %v1312_v51 = vmul.f32 0.5, %v1310_v46  ;;  %v1364_v56 = vpack.c.b16 %v1334_v52, %v1334_v52 }
 0x38a   : > { %v1314_v41 = vmul.f32 %v1312_v51, %v6058_v33  ;;  %v1365_v1 = vrot.slane %v1364_v56, 2 }
 0x38c   : > { %v1318_v54 = vpack.c.bf16 %v1314_v41, %v1314_v41 }
 0x38e   : > { %v1330_v55 = vunpack.c.l.b16 %v1318_v54 }
 0x390   : > { %v1335_v57 = vpack.c.b16 %v1330_v55, %v1334_v52  ;;  %v1331_v58 = vpack.c.b16 %v1330_v55, %v1330_v55 }
 0x392   : > { %4437 = vmatmul.msk.bf16.vlgmr.msrb.gmra.mxu2 %vm536_vm8, %v1335_v57  ;;  %v1332_v61 = vrot.slane %v1331_v58, 2  ;;  %v1336_v14 = vrot.slane %v1335_v57, 6  ;;  %v1363_v48 = vrot.slane %v1335_v57, 2 }
 0x393   : > { %2041 = vmatpush.bf16.msrb.mxu2 %v5356_v62  ;;  %v5361_v62 = vld [vmem:[%s7188_s2 + $0x1a4] sm:$0xff] }
 0x394   : > { %v1340_v4 = vsel %vm1337_vm11, %v1332_v61, %v1336_v14  ;;  %v1369_v5 = vsel %vm1366_vm14, %v1363_v48, %v1365_v1 }
 0x395   : > { %v1360_v6 = vsel %vm6075_vm13, %v1340_v4, 0  ;;  %v1389_v7 = vsel %vm6083_vm15, %v1369_v5, 0 }
 0x396   : > { %4420 = vmatmul.msk.bf16.vlgmr.msrb.gmra.mxu1 %vm536_vm8, %v1360_v6  ;;  %4454 = vmatmul.msk.bf16.vlgmr.msra.gmra.mxu3 %vm536_vm8, %v1389_v7 }
 0x397   : > { %1946 = vmatpush.bf16.msrb.mxu1 %v5348_v16  ;;  %v5359_v16 = vld [vmem:[%s7188_s2 + $0x534] sm:$0xff]  ;;  %2042 = vmatpush.bf16.msrb.mxu2 %v5355_v13 }
 0x413   : > { %v1434_v20 = vpop.f32.mrf.mxu1 }
 0x415   : > { %v1475_v10 = vpop.f32.mrf.mxu2 }
 0x416   : > { %v1476_v17 = vadd.f32 %v1475_v10, %v1434_v20 }
 0x419   : > { %v1524_v22 = vpop.f32.mrf.mxu3 }
 0x41a   : > { %v1529_v30 = vadd.f32 %v1524_v22, %v1476_v17  ;;  %v5347_v17 = vld [vmem:[%s7188_s2 + $0x174] sm:$0xff]  ;;  %v5342_v22 = vld [vmem:[%s7188_s2 + $0x12c] sm:$0xff] }
 0x41b   : > { %v1436_v34 = vpop.f32.mrf.mxu1  ;;  %1947 = vmatpush.bf16.msrb.mxu1 %v5347_v17  ;;  %1855 = vmatpush.bf16.msrb.mxu3 %v5342_v22  ;;  %v5354_v17 = vld [vmem:[%s7188_s2 + $0x4ec] sm:$0xff] }
 0x41c   : > { %v1534_v26 = vadd.f32 %v5531_v19, %v1529_v30  ;;  %v5346_v30 = vld [vmem:[%s7188_s2 + $0x16c] sm:$0xff]  ;;  %2043 = vmatpush.bf16.msrb.mxu2 %v5354_v17 }
 0x41d   : > { %v1477_v27 = vpop.f32.mrf.mxu2 }
 0x41e   : > { %v1536_v28 = vmul.f32 %v1534_v26, %v1534_v26  ;;  %v1478_v37 = vadd.f32 %v1477_v27, %v1436_v34  ;;  %v5345_v27 = vld [vmem:[%s7188_s2 + $0x164] sm:$0xff] }
 0x41f   : > { %1948 = vmatpush.bf16.msrb.mxu1 %v5346_v30 }
 0x420   : > { %v1538_v35 = vmul.f32 %v1536_v28, %v1534_v26  ;;  %v5337_v28 = vld [vmem:[%s7188_s2 + $0x144] sm:$0xff] }
 0x421   : > { %v1526_v38 = vpop.f32.mrf.mxu3 }
 0x422   : > { %v1540_v39 = vmul.f32 0.044715, %v1538_v35  ;;  %v1530_v40 = vadd.f32 %v1526_v38, %v1478_v37 }
 0x423   : > { %1949 = vmatpush.bf16.msrb.mxu1 %v5345_v27  ;;  %v5353_v27 = vld [vmem:[%s7188_s2 + $0x4e4] sm:$0xff] }
 0x424   : > { %v1542_v9 = vadd.f32 %v1540_v39, %v1534_v26  ;;  %v1535_v44 = vadd.f32 %v5531_v19, %v1530_v40  ;;  %v5339_v19 = vld [vmem:[%s7188_s2 + $0x154] sm:$0xff]  ;;  %2044 = vmatpush.bf16.msrb.mxu2 %v5353_v27 }
 0x425   : > { %1898 = vmatpush.bf16.msra.mxu0 %v5339_v19  ;;  %v5358_v19 = vld [vmem:[%s7188_s2 + $0x52c] sm:$0xff] }
 0x426   : > { %v1544_v11 = vmul.f32 0.7978846, %v1542_v9  ;;  %v1537_v15 = vmul.f32 %v1535_v44, %v1535_v44 }
 0x428   : > { %5567 = vtanh.f32 %v1544_v11  ;;  %v1539_v21 = vmul.f32 %v1537_v15, %v1535_v44 }
 0x429   : > { %1899 = vmatpush.bf16.msra.mxu0 %v5338_v24  ;;  %v5533_v24 = vld [vmem:[%s7189_s3 + $0x4] ss:$0 sm:$0xff] }
 0x42a   : > { %v1541_v46 = vmul.f32 0.044715, %v1539_v21 }
 0x42c   : > { %v1543_v47 = vadd.f32 %v1541_v46, %v1535_v44 }
 0x42d   : > { %1900 = vmatpush.bf16.msra.mxu0 %v5337_v28  ;;  %v5357_v28 = vld [vmem:[%s7188_s2 + $0x524] sm:$0xff] }
 0x42e   : > { %v5568_v49 = vpop.eup %5567  ;;  %v1545_v50 = vmul.f32 0.7978846, %v1543_v47 }
 0x42f   : > { %v1548_v51 = vadd.f32 1.0, %v5568_v49 }
 0x430   : > { %5569 = vtanh.f32 %v1545_v50 }
 0x431   : > { %v1550_v41 = vmul.f32 0.5, %v1548_v51 }
 0x433   : > { %v1552_v52 = vmul.f32 %v1550_v41, %v1534_v26  ;;  %v5341_v26 = vld [vmem:[%s7188_s2 + $0x124] sm:$0xff] }
 0x434   : > { %1856 = vmatpush.bf16.msrb.mxu3 %v5341_v26 }
 0x435   : > { %v1556_v53 = vpack.c.bf16 %v1552_v52, %v1552_v52 }
 0x436   : > { %v5570_v45 = vpop.eup %5569 }
 0x437   : > { %v1549_v54 = vadd.f32 1.0, %v5570_v45  ;;  %v1571_v56 = vunpack.c.l.b16 %v1556_v53  ;;  %v1780_v45 = vsel %vm1778_vm3, 65537, %v5643_v2  ;;  %v5363_v2 = vld [vmem:[%s7188_s2 + $0x1b4] sm:$0xff] }
 0x439   : > { %v1551_v55 = vmul.f32 0.5, %v1549_v54  ;;  %v1580_v14 = vpack.c.b16 %v1571_v56, %v1571_v56  ;;  %v1782_v54 = vunpack.c.l.b16 %v1780_v45 }
 0x43b   : > { %v1553_v57 = vmul.f32 %v1551_v55, %v1535_v44  ;;  %v1581_v7 = vrot.slane %v1580_v14, 2 }
 0x43d   : > { %v1557_v58 = vpack.c.bf16 %v1553_v57, %v1553_v57  ;;  %v4508_v57 = vunpack.i.l.s16 %v1782_v54 }
 0x43f   : > { %v1567_v61 = vunpack.c.l.b16 %v1557_v58  ;;  %vm1789_vm9 = vcmp.ne.s32.totalorder %v4508_v57, %v5784_v63  ;;  %vm1811_vm4 = vcmp.ne.s32.totalorder %v4508_v57, %v5787_v0  ;;  %v5360_v63 = vld [vmem:[%s7188_s2 + $0x53c] sm:$0xff] }
 0x440   : > { %vm6204_vm5 = vmpackc.low %vm467_vm12, %vm1789_vm9  ;;  %vm3048_vm12 = vcmask 130048  }
 0x441   : > { %v1572_v48 = vpack.c.b16 %v1567_v61, %v1571_v56  ;;  %v1568_v1 = vpack.c.b16 %v1567_v61, %v1567_v61  ;;  %vm6211_vm6 = vmpackc.low %vm1811_vm4, %vm500_vm1  ;;  %vm4112_vm1 = vcmask 253952  }
 0x443   : > { %4489 = vmatmul.msk.bf16.vlgmr.msra.gmra.mxu1 %vm536_vm8, %v1572_v48  ;;  %v1569_v4 = vrot.slane %v1568_v1, 2  ;;  %v1573_v5 = vrot.slane %v1572_v48, 6  ;;  %v1579_v6 = vrot.slane %v1572_v48, 2 }
 0x445   : > { %v1576_v8 = vsel %vm1337_vm11, %v1569_v4, %v1573_v5  ;;  %v1584_v20 = vsel %vm1366_vm14, %v1579_v6, %v1581_v7  ;;  %v5362_v6 = vld [vmem:[%s7188_s2 + $0x1ac] sm:$0xff] }
 0x446   : > { %v1578_v10 = vsel %vm6075_vm13, %v1576_v8, 0  ;;  %v1586_v12 = vsel %vm6083_vm15, %v1584_v20, 0 }
 0x447   : > { %4472 = vmatmul.msk.bf16.vlgmr.msrb.gmra.mxu0 %vm536_vm8, %v1578_v10  ;;  %4506 = vmatmul.msk.bf16.vlgmr.msra.gmra.mxu2 %vm536_vm8, %v1586_v12  ;;  %v5352_v12 = vld [vmem:[%s7188_s2 + $0x51c] sm:$0xff] }
 0x448   : > { %2134 = vmatpush.bf16.msrb.mxu0 %v5360_v63  ;;  %2085 = vmatpush.bf16.msra.mxu3 %v5352_v12 }
 0x44c   : > { %2135 = vmatpush.bf16.msrb.mxu0 %v5359_v16  ;;  %2086 = vmatpush.bf16.msra.mxu3 %v5351_v3 }
 0x450   : > { %2136 = vmatpush.bf16.msrb.mxu0 %v5358_v19 }
 0x454   : > { %2137 = vmatpush.bf16.msrb.mxu0 %v5357_v28 }
 0x4c0   : > { %v1672_v25 = vpop.f32.mrf.mxu1 }
 0x4c4   : > { %v1631_v23 = vpop.f32.mrf.mxu0 }
 0x4c5   : > { %v1673_v31 = vadd.f32 %v1672_v25, %v1631_v23  ;;  %v5350_v25 = vld [vmem:[%s7188_s2 + $0x50c] sm:$0xff] }
 0x4c6   : > { %2087 = vmatpush.bf16.msra.mxu3 %v5350_v25 }
 0x4c8   : > { %v1674_v39 = vpop.f32.mrf.mxu1 }
 0x4ca   : > { %v1721_v32 = vpop.f32.mrf.mxu2 }
 0x4cb   : > { %v1726_v34 = vadd.f32 %v1721_v32, %v1673_v31 }
 0x4cc   : > { %v1633_v37 = vpop.f32.mrf.mxu0 }
 0x4cd   : > { %v1731_v35 = vadd.f32 %v5532_v59, %v1726_v34  ;;  %v1675_v42 = vadd.f32 %v1674_v39, %v1633_v37 }
 0x4cf   : > { %v6183_v38 = vadd.f32 %v1731_v35, %v6045_v18 }
 0x4d1   : > { %v1735_v40 = vmul.f32 %v6183_v38, %v6183_v38 }
 0x4d2   : > { %v1723_v43 = vpop.f32.mrf.mxu2 }
 0x4d3   : > { %v1737_v9 = vmul.f32 %v1735_v40, %v6183_v38  ;;  %v1727_v44 = vadd.f32 %v1723_v43, %v1675_v42 }
 0x4d5   : > { %v1739_v11 = vmul.f32 0.044715, %v1737_v9  ;;  %v1732_v15 = vadd.f32 %v5532_v59, %v1727_v44  ;;  %v5349_v59 = vld [vmem:[%s7188_s2 + $0x504] sm:$0xff] }
 0x4d6   : > { %2088 = vmatpush.bf16.msra.mxu3 %v5349_v59 }
 0x4d7   : > { %v1741_v21 = vadd.f32 %v1739_v11, %v6183_v38  ;;  %v6190_v46 = vadd.f32 %v1732_v15, %v6058_v33 }
 0x4d9   : > { %v1743_v47 = vmul.f32 0.7978846, %v1741_v21  ;;  %v1736_v18 = vmul.f32 %v6190_v46, %v6190_v46 }
 0x4db   : > { %5571 = vtanh.f32 %v1743_v47  ;;  %v1738_v49 = vmul.f32 %v1736_v18, %v6190_v46 }
 0x4dd   : > { %v1740_v50 = vmul.f32 0.044715, %v1738_v49 }
 0x4df   : > { %v1742_v51 = vadd.f32 %v1740_v50, %v6190_v46 }
 0x4e1   : > { %v5572_v41 = vpop.eup %5571  ;;  %v1744_v52 = vmul.f32 0.7978846, %v1742_v51 }
 0x4e2   : > { %v1747_v53 = vadd.f32 1.0, %v5572_v41 }
 0x4e3   : > { %5573 = vtanh.f32 %v1744_v52 }
 0x4e4   : > { %v1749_v33 = vmul.f32 0.5, %v1747_v53 }
 0x4e6   : > { %v1751_v55 = vmul.f32 %v1749_v33, %v6183_v38 }
 0x4e8   : > { %v1755_v56 = vpack.c.bf16 %v1751_v55, %v1751_v55 }
 0x4e9   : > { %v5574_v58 = vpop.eup %5573 }
 0x4ea   : > { %v1748_v61 = vadd.f32 1.0, %v5574_v58  ;;  %v1768_v48 = vunpack.c.l.b16 %v1755_v56 }
 0x4ec   : > { %v1750_v14 = vmul.f32 0.5, %v1748_v61  ;;  %v1769_v5 = vpack.c.b16 %v1768_v48, %v1768_v48 }
 0x4ee   : > { %v1752_v1 = vmul.f32 %v1750_v14, %v6190_v46 }
 0x4f0   : > { %v1756_v4 = vpack.c.bf16 %v1752_v1, %v1752_v1 }
 0x4f2   : > { %v1772_v7 = vsel %vm364_vm0, %v1756_v4, %v1769_v5  ;;  %v1864_v8 = vunpack.c.l.b16 %v1756_v4  ;;  %v5364_v5 = vld [vmem:[%s7188_s2 + $0x1bc] sm:$0xff] }
 0x4f3   : > { %v1792_v20 = vsel %vm6204_vm5, %v1772_v7, 0  ;;  %v1813_v0 = vsel %vm6211_vm6, %v1772_v7, 0  ;;  %2216 = vmatpush.bf16.msra.mxu1 %v5364_v5 }
 0x4f4   : > { %4528 = vmatmul.msk.bf16.vlgmr.msrb.gmra.mxu3 %vm536_vm8, %v1792_v20  ;;  %4562 = vmatmul.msk.bf16.vlgmr.msrb.gmra.mxu1 %vm536_vm8, %v1813_v0  ;;  %v1865_v10 = vpack.c.b16 %v1864_v8, %v1768_v48 }
 0x4f6   : > { %4545 = vmatmul.msk.bf16.vlgmr.msra.gmra.mxu0 %vm536_vm8, %v1865_v10  ;;  %v5534_v10 = vld [vmem:[%s7189_s3 + $0xe] ss:$0 sm:$0xff] }
 0x4f7   : > { %2217 = vmatpush.bf16.msra.mxu1 %v5363_v2 }
 0x4fb   : > { %2218 = vmatpush.bf16.msra.mxu1 %v5362_v6 }
 0x4ff   : > { %2219 = vmatpush.bf16.msra.mxu1 %v5361_v62  ;;  %v5369_v62 = vld [vmem:[%s7188_s2 + $0x204] sm:$0xff] }
 0x571   : > { %v1951_v22 = vpop.f32.mrf.mxu1 }
 0x573   : > { %v1902_v60 = vpop.f32.mrf.mxu0 }
 0x577   : > { %v1858_v30 = vpop.f32.mrf.mxu3 }
 0x578   : > { %v1903_v23 = vadd.f32 %v1902_v60, %v1858_v30 }
 0x579   : > { %v1953_v40 = vpop.f32.mrf.mxu1 }
 0x57a   : > { %v1956_v26 = vadd.f32 %v1951_v22, %v1903_v23 }
 0x57b   : > { %v1904_v34 = vpop.f32.mrf.mxu0 }
 0x57c   : > { %v1961_v31 = vadd.f32 %v5533_v24, %v1956_v26 }
 0x57e   : > { %v1963_v32 = vmul.f32 %v1961_v31, %v1961_v31 }
 0x57f   : > { %v1860_v35 = vpop.f32.mrf.mxu3 }
 0x580   : > { %v1965_v37 = vmul.f32 %v1963_v32, %v1961_v31  ;;  %v1905_v39 = vadd.f32 %v1904_v34, %v1860_v35 }
 0x582   : > { %v1967_v42 = vmul.f32 0.044715, %v1965_v37  ;;  %v1957_v43 = vadd.f32 %v1953_v40, %v1905_v39 }
 0x584   : > { %v1969_v9 = vadd.f32 %v1967_v42, %v1961_v31  ;;  %v1962_v44 = vadd.f32 %v5533_v24, %v1957_v43 }
 0x586   : > { %v1971_v11 = vmul.f32 0.7978846, %v1969_v9  ;;  %v1964_v15 = vmul.f32 %v1962_v44, %v1962_v44 }
 0x588   : > { %5575 = vtanh.f32 %v1971_v11  ;;  %v1966_v21 = vmul.f32 %v1964_v15, %v1962_v44  ;;  %v5367_v11 = vld [vmem:[%s7188_s2 + $0x574] sm:$0xff]  ;;  %v5366_v15 = vld [vmem:[%s7188_s2 + $0x56c] sm:$0xff] }
 0x58a   : > { %v1968_v47 = vmul.f32 0.044715, %v1966_v21  ;;  %v5535_v21 = vld [vmem:[%s7189_s3 + $0x5] ss:$0 sm:$0xff] }
 0x58c   : > { %v1970_v18 = vadd.f32 %v1968_v47, %v1962_v44  ;;  %v5365_v47 = vld [vmem:[%s7188_s2 + $0x564] sm:$0xff] }
 0x58e   : > { %v5576_v49 = vpop.eup %5575  ;;  %v1972_v50 = vmul.f32 0.7978846, %v1970_v18 }
 0x58f   : > { %v1975_v51 = vadd.f32 1.0, %v5576_v49 }
 0x590   : > { %5577 = vtanh.f32 %v1972_v50 }
 0x591   : > { %v1977_v41 = vmul.f32 0.5, %v1975_v51 }
 0x593   : > { %v1979_v52 = vmul.f32 %v1977_v41, %v1961_v31 }
 0x595   : > { %v1983_v45 = vpack.c.bf16 %v1979_v52, %v1979_v52 }
 0x596   : > { %v5578_v53 = vpop.eup %5577 }
 0x597   : > { %v1976_v33 = vadd.f32 1.0, %v5578_v53  ;;  %v1994_v55 = vunpack.c.l.b16 %v1983_v45 }
 0x599   : > { %v1978_v54 = vmul.f32 0.5, %v1976_v33  ;;  %v1995_v58 = vpack.c.b16 %v1994_v55, %v1994_v55 }
 0x59b   : > { %v1980_v56 = vmul.f32 %v1978_v54, %v1962_v44  ;;  %v5368_v44 = vld [vmem:[%s7188_s2 + $0x57c] sm:$0xff] }
 0x59c   : > { %2289 = vmatpush.bf16.msra.mxu2 %v5368_v44  ;;  %v5373_v44 = vld [vmem:[%s7188_s2 + $0x5c4] sm:$0xff] }
 0x59d   : > { %v1984_v57 = vpack.c.bf16 %v1980_v56, %v1980_v56 }
 0x59f   : > { %v1998_v61 = vsel %vm364_vm0, %v1984_v57, %v1995_v58  ;;  %v2052_v14 = vunpack.c.l.b16 %v1984_v57 }
 0x5a0   : > { %v2000_v48 = vsel %vm6204_vm5, %v1998_v61, 0  ;;  %v2001_v1 = vsel %vm6211_vm6, %v1998_v61, 0  ;;  %2290 = vmatpush.bf16.msra.mxu2 %v5367_v11 }
 0x5a1   : > { %4580 = vmatmul.msk.bf16.vlgmr.msrb.gmra.mxu2 %vm536_vm8, %v2000_v48  ;;  %4614 = vmatmul.msk.bf16.vlgmr.msrb.gmra.mxu0 %vm536_vm8, %v2001_v1  ;;  %v2053_v4 = vpack.c.b16 %v2052_v14, %v1994_v55 }
 0x5a3   : > { %4597 = vmatmul.msk.bf16.vlgmr.msra.gmra.mxu3 %vm536_vm8, %v2053_v4 }
 0x5a4   : > { %2291 = vmatpush.bf16.msra.mxu2 %v5366_v15 }
 0x5a8   : > { %2292 = vmatpush.bf16.msra.mxu2 %v5365_v47 }
 0x61e   : > { %v2139_v8 = vpop.f32.mrf.mxu0 }
 0x624   : > { %v2046_v7 = vpop.f32.mrf.mxu2 }
 0x626   : > { %v2090_v20 = vpop.f32.mrf.mxu3  ;;  %v2141_v19 = vpop.f32.mrf.mxu0 }
 0x627   : > { %v2091_v0 = vadd.f32 %v2090_v20, %v2046_v7  ;;  %v5371_v20 = vld [vmem:[%s7188_s2 + $0x214] sm:$0xff] }
 0x629   : > { %v2144_v63 = vadd.f32 %v2139_v8, %v2091_v0  ;;  %v5372_v8 = vld [vmem:[%s7188_s2 + $0x21c] sm:$0xff]  ;;  %v5370_v0 = vld [vmem:[%s7188_s2 + $0x20c] sm:$0xff] }
 0x62a   : > { %2364 = vmatpush.bf16.msrb.mxu3 %v5372_v8  ;;  %v5377_v8 = vld [vmem:[%s7188_s2 + $0x264] sm:$0xff] }
 0x62b   : > { %v2149_v12 = vadd.f32 %v5534_v10, %v2144_v63 }
 0x62c   : > { %v2048_v16 = vpop.f32.mrf.mxu2 }
 0x62d   : > { %v6286_v13 = vadd.f32 %v2149_v12, %v6183_v38 }
 0x62e   : > { %v2092_v60 = vpop.f32.mrf.mxu3  ;;  %2365 = vmatpush.bf16.msrb.mxu3 %v5371_v20 }
 0x62f   : > { %v2153_v3 = vmul.f32 %v6286_v13, %v6286_v13  ;;  %v2093_v17 = vadd.f32 %v2092_v60, %v2048_v16 }
 0x631   : > { %v2155_v22 = vmul.f32 %v2153_v3, %v6286_v13  ;;  %v2145_v30 = vadd.f32 %v2141_v19, %v2093_v17 }
 0x632   : > { %2366 = vmatpush.bf16.msrb.mxu3 %v5370_v0 }
 0x633   : > { %v2157_v23 = vmul.f32 0.044715, %v2155_v22  ;;  %v2150_v24 = vadd.f32 %v5534_v10, %v2145_v30  ;;  %v5536_v10 = vld [vmem:[%s7189_s3 + $0xf] ss:$0 sm:$0xff] }
 0x635   : > { %v2159_v25 = vadd.f32 %v2157_v23, %v6286_v13  ;;  %v6293_v26 = vadd.f32 %v2150_v24, %v6190_v46 }
 0x636   : > { %2367 = vmatpush.bf16.msrb.mxu3 %v5369_v62 }
 0x637   : > { %v2154_v38 = vmul.f32 %v6293_v26, %v6293_v26  ;;  %v2161_v27 = vmul.f32 0.7978846, %v2159_v25 }
 0x639   : > { %v2156_v28 = vmul.f32 %v2154_v38, %v6293_v26  ;;  %5579 = vtanh.f32 %v2161_v27 }
 0x63b   : > { %v2158_v31 = vmul.f32 0.044715, %v2156_v28 }
 0x63d   : > { %v2160_v59 = vadd.f32 %v2158_v31, %v6293_v26 }
 0x63f   : > { %v2162_v32 = vmul.f32 0.7978846, %v2160_v59  ;;  %v5580_v34 = vpop.eup %5579 }
 0x640   : > { %v2165_v35 = vadd.f32 1.0, %v5580_v34 }
 0x641   : > { %5581 = vtanh.f32 %v2162_v32 }
 0x642   : > { %v2167_v40 = vmul.f32 0.5, %v2165_v35 }
 0x644   : > { %v2169_v46 = vmul.f32 %v2167_v40, %v6286_v13 }
 0x647   : > { %v5582_v37 = vpop.eup %5581 }
 0x648   : > { %v2166_v39 = vadd.f32 1.0, %v5582_v37 }
 0x64a   : > { %v2168_v42 = vmul.f32 0.5, %v2166_v39 }
 0x64c   : > { %v2170_v43 = vmul.f32 %v2168_v42, %v6293_v26  ;;  %v5376_v42 = vld [vmem:[%s7188_s2 + $0x5dc] sm:$0xff] }
 0x64d   : > { %2437 = vmatpush.bf16.msra.mxu0 %v5376_v42  ;;  %v5381_v42 = vld [vmem:[%s7188_s2 + $0x624] sm:$0xff] }
 0x64e   : > { %v2173_v9 = vpack.c.bf16 %v2170_v43, %v2169_v46  ;;  %v5375_v46 = vld [vmem:[%s7188_s2 + $0x5d4] sm:$0xff]  ;;  %v5374_v43 = vld [vmem:[%s7188_s2 + $0x5cc] sm:$0xff] }
 0x650   : > { %4632 = vmatmul.msk.bf16.vlgmr.msra.gmra.mxu1 %vm536_vm8, %v2173_v9  ;;  %v5537_v9 = vld [vmem:[%s7189_s3 + $0x6] ss:$0 sm:$0xff] }
 0x651   : > { %2438 = vmatpush.bf16.msra.mxu0 %v5375_v46 }
 0x655   : > { %2439 = vmatpush.bf16.msra.mxu0 %v5374_v43 }
 0x659   : > { %2440 = vmatpush.bf16.msra.mxu0 %v5373_v44 }
 0x6cd   : > { %v2221_v18 = vpop.f32.mrf.mxu1 }
 0x6ce   : > { %v2222_v49 = vadd.f32 %v5535_v21, %v2221_v18 }
 0x6d0   : > { %v2226_v50 = vmul.f32 %v2222_v49, %v2222_v49 }
 0x6d2   : > { %v2228_v51 = vmul.f32 %v2226_v50, %v2222_v49 }
 0x6d4   : > { %v2230_v41 = vmul.f32 0.044715, %v2228_v51 }
 0x6d5   : > { %v2223_v52 = vpop.f32.mrf.mxu1 }
 0x6d6   : > { %v2232_v45 = vadd.f32 %v2230_v41, %v2222_v49  ;;  %v2224_v53 = vadd.f32 %v5535_v21, %v2223_v52 }
 0x6d8   : > { %v2234_v33 = vmul.f32 0.7978846, %v2232_v45  ;;  %v2227_v54 = vmul.f32 %v2224_v53, %v2224_v53 }
 0x6da   : > { %v2229_v55 = vmul.f32 %v2227_v54, %v2224_v53  ;;  %5583 = vtanh.f32 %v2234_v33 }
 0x6dc   : > { %v2231_v56 = vmul.f32 0.044715, %v2229_v55 }
 0x6de   : > { %v2233_v57 = vadd.f32 %v2231_v56, %v2224_v53 }
 0x6e0   : > { %v2235_v58 = vmul.f32 0.7978846, %v2233_v57  ;;  %v5584_v61 = vpop.eup %5583 }
 0x6e1   : > { %v2238_v14 = vadd.f32 1.0, %v5584_v61 }
 0x6e2   : > { %5585 = vtanh.f32 %v2235_v58 }
 0x6e3   : > { %v2240_v1 = vmul.f32 0.5, %v2238_v14 }
 0x6e5   : > { %v2242_v2 = vmul.f32 %v2240_v1, %v2222_v49 }
 0x6e8   : > { %v5586_v48 = vpop.eup %5585 }
 0x6e9   : > { %v2239_v4 = vadd.f32 1.0, %v5586_v48 }
 0x6eb   : > { %v2241_v5 = vmul.f32 0.5, %v2239_v4 }
 0x6ed   : > { %v2243_v6 = vmul.f32 %v2241_v5, %v2224_v53  ;;  %v5380_v5 = vld [vmem:[%s7188_s2 + $0x27c] sm:$0xff] }
 0x6ee   : > { %2512 = vmatpush.bf16.msrb.mxu1 %v5380_v5  ;;  %v5385_v5 = vld [vmem:[%s7188_s2 + $0x2c4] sm:$0xff] }
 0x6ef   : > { %v2246_v7 = vpack.c.bf16 %v2243_v6, %v2242_v2  ;;  %v5379_v2 = vld [vmem:[%s7188_s2 + $0x274] sm:$0xff]  ;;  %v5378_v6 = vld [vmem:[%s7188_s2 + $0x26c] sm:$0xff] }
 0x6f1   : > { %4650 = vmatmul.msk.bf16.vlgmr.msra.gmra.mxu2 %vm536_vm8, %v2246_v7  ;;  %v5538_v7 = vld [vmem:[%s7189_s3 + $0x10] ss:$0 sm:$0xff] }
 0x6f2   : > { %2513 = vmatpush.bf16.msrb.mxu1 %v5379_v2 }
 0x6f6   : > { %2514 = vmatpush.bf16.msrb.mxu1 %v5378_v6 }
 0x6fa   : > { %2515 = vmatpush.bf16.msrb.mxu1 %v5377_v8 }
 0x774   : > { %v2294_v63 = vpop.f32.mrf.mxu2 }
 0x775   : > { %v2295_v12 = vadd.f32 %v5536_v10, %v2294_v63 }
 0x777   : > { %v6334_v16 = vadd.f32 %v2295_v12, %v6286_v13 }
 0x779   : > { %v2301_v60 = vmul.f32 %v6334_v16, %v6334_v16 }
 0x77b   : > { %v2303_v3 = vmul.f32 %v2301_v60, %v6334_v16 }
 0x77c   : > { %v2296_v17 = vpop.f32.mrf.mxu2 }
 0x77d   : > { %v2305_v19 = vmul.f32 0.044715, %v2303_v3  ;;  %v2297_v22 = vadd.f32 %v5536_v10, %v2296_v17 }
 0x77f   : > { %v2307_v30 = vadd.f32 %v2305_v19, %v6334_v16  ;;  %v6341_v23 = vadd.f32 %v2297_v22, %v6293_v26 }
 0x781   : > { %v2309_v24 = vmul.f32 0.7978846, %v2307_v30  ;;  %v2302_v25 = vmul.f32 %v6341_v23, %v6341_v23 }
 0x783   : > { %v2304_v13 = vmul.f32 %v2302_v25, %v6341_v23  ;;  %5587 = vtanh.f32 %v2309_v24 }
 0x785   : > { %v2306_v38 = vmul.f32 0.044715, %v2304_v13 }
 0x787   : > { %v2308_v27 = vadd.f32 %v2306_v38, %v6341_v23 }
 0x789   : > { %v2310_v28 = vmul.f32 0.7978846, %v2308_v27  ;;  %v5588_v31 = vpop.eup %5587 }
 0x78a   : > { %v2313_v59 = vadd.f32 1.0, %v5588_v31 }
 0x78b   : > { %5589 = vtanh.f32 %v2310_v28 }
 0x78c   : > { %v2315_v35 = vmul.f32 0.5, %v2313_v59 }
 0x78e   : > { %v2317_v26 = vmul.f32 %v2315_v35, %v6334_v16 }
 0x791   : > { %v5590_v32 = vpop.eup %5589 }
 0x792   : > { %v2314_v34 = vadd.f32 1.0, %v5590_v32 }
 0x794   : > { %v2316_v37 = vmul.f32 0.5, %v2314_v34 }
 0x796   : > { %v2318_v39 = vmul.f32 %v2316_v37, %v6341_v23  ;;  %v5384_v37 = vld [vmem:[%s7188_s2 + $0x63c] sm:$0xff] }
 0x797   : > { %2585 = vmatpush.bf16.msrb.mxu2 %v5384_v37  ;;  %v5389_v37 = vld [vmem:[%s7188_s2 + $0x684] sm:$0xff] }
 0x798   : > { %v2321_v40 = vpack.c.bf16 %v2318_v39, %v2317_v26  ;;  %v5383_v26 = vld [vmem:[%s7188_s2 + $0x634] sm:$0xff]  ;;  %v5382_v39 = vld [vmem:[%s7188_s2 + $0x62c] sm:$0xff] }
 0x79a   : > { %4668 = vmatmul.msk.bf16.vlgmr.msrb.gmra.mxu3 %vm536_vm8, %v2321_v40  ;;  %v5539_v40 = vld [vmem:[%s7189_s3 + $0x7] ss:$0 sm:$0xff] }
 0x79b   : > { %2586 = vmatpush.bf16.msrb.mxu2 %v5383_v26 }
 0x79f   : > { %2587 = vmatpush.bf16.msrb.mxu2 %v5382_v39 }
 0x7a3   : > { %2588 = vmatpush.bf16.msrb.mxu2 %v5381_v42 }
 0x81d   : > { %v2369_v11 = vpop.f32.mrf.mxu3 }
 0x81e   : > { %v2370_v15 = vadd.f32 %v5537_v9, %v2369_v11 }
 0x820   : > { %v2374_v21 = vmul.f32 %v2370_v15, %v2370_v15 }
 0x822   : > { %v2376_v47 = vmul.f32 %v2374_v21, %v2370_v15 }
 0x824   : > { %v2378_v18 = vmul.f32 0.044715, %v2376_v47 }
 0x825   : > { %v2371_v49 = vpop.f32.mrf.mxu3 }
 0x826   : > { %v2380_v50 = vadd.f32 %v2378_v18, %v2370_v15  ;;  %v2372_v51 = vadd.f32 %v5537_v9, %v2371_v49 }
 0x828   : > { %v2382_v41 = vmul.f32 0.7978846, %v2380_v50  ;;  %v2375_v52 = vmul.f32 %v2372_v51, %v2372_v51 }
 0x82a   : > { %v2377_v45 = vmul.f32 %v2375_v52, %v2372_v51  ;;  %5591 = vtanh.f32 %v2382_v41 }
 0x82c   : > { %v2379_v53 = vmul.f32 0.044715, %v2377_v45 }
 0x82e   : > { %v2381_v33 = vadd.f32 %v2379_v53, %v2372_v51 }
 0x830   : > { %v2383_v54 = vmul.f32 0.7978846, %v2381_v33  ;;  %v5592_v55 = vpop.eup %5591 }
 0x831   : > { %v2386_v56 = vadd.f32 1.0, %v5592_v55 }
 0x832   : > { %5593 = vtanh.f32 %v2383_v54 }
 0x833   : > { %v2388_v58 = vmul.f32 0.5, %v2386_v56 }
 0x835   : > { %v2390_v48 = vmul.f32 %v2388_v58, %v2370_v15 }
 0x838   : > { %v5594_v57 = vpop.eup %5593 }
 0x839   : > { %v2387_v61 = vadd.f32 1.0, %v5594_v57 }
 0x83b   : > { %v2389_v14 = vmul.f32 0.5, %v2387_v61 }
 0x83d   : > { %v2391_v1 = vmul.f32 %v2389_v14, %v2372_v51  ;;  %v5388_v14 = vld [vmem:[%s7188_s2 + $0x2dc] sm:$0xff] }
 0x83e   : > { %2660 = vmatpush.bf16.msra.mxu3 %v5388_v14  ;;  %v5393_v14 = vld [vmem:[%s7188_s2 + $0x324] sm:$0xff] }
 0x83f   : > { %v2394_v4 = vpack.c.bf16 %v2391_v1, %v2390_v48  ;;  %v5387_v48 = vld [vmem:[%s7188_s2 + $0x2d4] sm:$0xff]  ;;  %v5386_v1 = vld [vmem:[%s7188_s2 + $0x2cc] sm:$0xff] }
 0x841   : > { %4686 = vmatmul.msk.bf16.vlgmr.msra.gmra.mxu0 %vm536_vm8, %v2394_v4  ;;  %v5540_v4 = vld [vmem:[%s7189_s3 + $0x11] ss:$0 sm:$0xff] }
 0x842   : > { %2661 = vmatpush.bf16.msra.mxu3 %v5387_v48 }
 0x846   : > { %2662 = vmatpush.bf16.msra.mxu3 %v5386_v1 }
 0x84a   : > { %2663 = vmatpush.bf16.msra.mxu3 %v5385_v5 }
 0x8be   : > { %v2442_v20 = vpop.f32.mrf.mxu0 }
 0x8bf   : > { %v2443_v0 = vadd.f32 %v5538_v7, %v2442_v20 }
 0x8c1   : > { %v6382_v10 = vadd.f32 %v2443_v0, %v6334_v16 }
 0x8c3   : > { %v2449_v62 = vmul.f32 %v6382_v10, %v6382_v10 }
 0x8c5   : > { %v2451_v63 = vmul.f32 %v2449_v62, %v6382_v10 }
 0x8c6   : > { %v2444_v12 = vpop.f32.mrf.mxu0 }
 0x8c7   : > { %v2453_v60 = vmul.f32 0.044715, %v2451_v63  ;;  %v2445_v3 = vadd.f32 %v5538_v7, %v2444_v12 }
 0x8c9   : > { %v2455_v17 = vadd.f32 %v2453_v60, %v6382_v10  ;;  %v6389_v19 = vadd.f32 %v2445_v3, %v6341_v23 }
 0x8cb   : > { %v2457_v22 = vmul.f32 0.7978846, %v2455_v17  ;;  %v2450_v30 = vmul.f32 %v6389_v19, %v6389_v19 }
 0x8cd   : > { %v2452_v16 = vmul.f32 %v2450_v30, %v6389_v19  ;;  %5595 = vtanh.f32 %v2457_v22 }
 0x8cf   : > { %v2454_v24 = vmul.f32 0.044715, %v2452_v16 }
 0x8d1   : > { %v2456_v25 = vadd.f32 %v2454_v24, %v6389_v19 }
 0x8d3   : > { %v2458_v13 = vmul.f32 0.7978846, %v2456_v25  ;;  %v5596_v38 = vpop.eup %5595 }
 0x8d4   : > { %v2461_v27 = vadd.f32 1.0, %v5596_v38 }
 0x8d5   : > { %5597 = vtanh.f32 %v2458_v13 }
 0x8d6   : > { %v2463_v59 = vmul.f32 0.5, %v2461_v27 }
 0x8d8   : > { %v2465_v23 = vmul.f32 %v2463_v59, %v6382_v10 }
 0x8db   : > { %v5598_v28 = vpop.eup %5597 }
 0x8dc   : > { %v2462_v31 = vadd.f32 1.0, %v5598_v28 }
 0x8de   : > { %v2464_v32 = vmul.f32 0.5, %v2462_v31 }
 0x8e0   : > { %v2466_v34 = vmul.f32 %v2464_v32, %v6389_v19  ;;  %v5392_v32 = vld [vmem:[%s7188_s2 + $0x69c] sm:$0xff] }
 0x8e1   : > { %2733 = vmatpush.bf16.msrb.mxu0 %v5392_v32  ;;  %v5397_v32 = vld [vmem:[%s7188_s2 + $0x6e4] sm:$0xff] }
 0x8e2   : > { %v2469_v35 = vpack.c.bf16 %v2466_v34, %v2465_v23  ;;  %v5391_v23 = vld [vmem:[%s7188_s2 + $0x694] sm:$0xff]  ;;  %v5390_v34 = vld [vmem:[%s7188_s2 + $0x68c] sm:$0xff] }
 0x8e4   : > { %4704 = vmatmul.msk.bf16.vlgmr.msrb.gmra.mxu1 %vm536_vm8, %v2469_v35  ;;  %v5541_v35 = vld [vmem:[%s7189_s3 + $0x8] ss:$0 sm:$0xff] }
 0x8e5   : > { %2734 = vmatpush.bf16.msrb.mxu0 %v5391_v23 }
 0x8e9   : > { %2735 = vmatpush.bf16.msrb.mxu0 %v5390_v34 }
 0x8ed   : > { %2736 = vmatpush.bf16.msrb.mxu0 %v5389_v37 }
 0x961   : > { %v2517_v46 = vpop.f32.mrf.mxu1 }
 0x962   : > { %v2518_v43 = vadd.f32 %v5539_v40, %v2517_v46 }
 0x964   : > { %v2522_v9 = vmul.f32 %v2518_v43, %v2518_v43 }
 0x966   : > { %v2524_v44 = vmul.f32 %v2522_v9, %v2518_v43 }
 0x968   : > { %v2526_v11 = vmul.f32 0.044715, %v2524_v44 }
 0x969   : > { %v2519_v15 = vpop.f32.mrf.mxu1 }
 0x96a   : > { %v2528_v21 = vadd.f32 %v2526_v11, %v2518_v43  ;;  %v2520_v47 = vadd.f32 %v5539_v40, %v2519_v15 }
 0x96c   : > { %v2530_v18 = vmul.f32 0.7978846, %v2528_v21  ;;  %v2523_v49 = vmul.f32 %v2520_v47, %v2520_v47 }
 0x96e   : > { %v2525_v50 = vmul.f32 %v2523_v49, %v2520_v47  ;;  %5599 = vtanh.f32 %v2530_v18 }
 0x970   : > { %v2527_v51 = vmul.f32 0.044715, %v2525_v50 }
 0x972   : > { %v2529_v41 = vadd.f32 %v2527_v51, %v2520_v47 }
 0x974   : > { %v2531_v52 = vmul.f32 0.7978846, %v2529_v41  ;;  %v5600_v45 = vpop.eup %5599 }
 0x975   : > { %v2534_v53 = vadd.f32 1.0, %v5600_v45 }
 0x976   : > { %5601 = vtanh.f32 %v2531_v52 }
 0x977   : > { %v2536_v54 = vmul.f32 0.5, %v2534_v53 }
 0x979   : > { %v2538_v57 = vmul.f32 %v2536_v54, %v2518_v43 }
 0x97c   : > { %v5602_v33 = vpop.eup %5601 }
 0x97d   : > { %v2535_v55 = vadd.f32 1.0, %v5602_v33 }
 0x97f   : > { %v2537_v56 = vmul.f32 0.5, %v2535_v55 }
 0x981   : > { %v2539_v58 = vmul.f32 %v2537_v56, %v2520_v47  ;;  %v5396_v56 = vld [vmem:[%s7188_s2 + $0x33c] sm:$0xff] }
 0x982   : > { %2808 = vmatpush.bf16.msra.mxu1 %v5396_v56  ;;  %v5401_v56 = vld [vmem:[%s7188_s2 + $0x384] sm:$0xff] }
 0x983   : > { %v2542_v61 = vpack.c.bf16 %v2539_v58, %v2538_v57  ;;  %v5395_v57 = vld [vmem:[%s7188_s2 + $0x334] sm:$0xff]  ;;  %v5394_v58 = vld [vmem:[%s7188_s2 + $0x32c] sm:$0xff] }
 0x985   : > { %4722 = vmatmul.msk.bf16.vlgmr.msrb.gmra.mxu2 %vm536_vm8, %v2542_v61  ;;  %v5542_v61 = vld [vmem:[%s7189_s3 + $0x12] ss:$0 sm:$0xff] }
 0x986   : > { %2809 = vmatpush.bf16.msra.mxu1 %v5395_v57 }
 0x98a   : > { %2810 = vmatpush.bf16.msra.mxu1 %v5394_v58 }
 0x98e   : > { %2811 = vmatpush.bf16.msra.mxu1 %v5393_v14 }
 0xa08   : > { %v2590_v2 = vpop.f32.mrf.mxu2 }
 0xa09   : > { %v2591_v6 = vadd.f32 %v5540_v4, %v2590_v2 }
 0xa0b   : > { %v6430_v7 = vadd.f32 %v2591_v6, %v6382_v10 }
 0xa0d   : > { %v2597_v8 = vmul.f32 %v6430_v7, %v6430_v7 }
 0xa0f   : > { %v2599_v20 = vmul.f32 %v2597_v8, %v6430_v7 }
 0xa10   : > { %v2592_v0 = vpop.f32.mrf.mxu2 }
 0xa11   : > { %v2601_v62 = vmul.f32 0.044715, %v2599_v20  ;;  %v2593_v63 = vadd.f32 %v5540_v4, %v2592_v0 }
 0xa13   : > { %v2603_v12 = vadd.f32 %v2601_v62, %v6430_v7  ;;  %v6437_v60 = vadd.f32 %v2593_v63, %v6389_v19 }
 0xa15   : > { %v2605_v3 = vmul.f32 0.7978846, %v2603_v12  ;;  %v2598_v17 = vmul.f32 %v6437_v60, %v6437_v60 }
 0xa17   : > { %v2600_v10 = vmul.f32 %v2598_v17, %v6437_v60  ;;  %5603 = vtanh.f32 %v2605_v3 }
 0xa19   : > { %v2602_v22 = vmul.f32 0.044715, %v2600_v10 }
 0xa1b   : > { %v2604_v30 = vadd.f32 %v2602_v22, %v6437_v60 }
 0xa1d   : > { %v2606_v16 = vmul.f32 0.7978846, %v2604_v30  ;;  %v5604_v24 = vpop.eup %5603 }
 0xa1e   : > { %v2609_v25 = vadd.f32 1.0, %v5604_v24 }
 0xa1f   : > { %5605 = vtanh.f32 %v2606_v16 }
 0xa20   : > { %v2611_v27 = vmul.f32 0.5, %v2609_v25 }
 0xa22   : > { %v2613_v19 = vmul.f32 %v2611_v27, %v6430_v7 }
 0xa25   : > { %v5606_v13 = vpop.eup %5605 }
 0xa26   : > { %v2610_v38 = vadd.f32 1.0, %v5606_v13 }
 0xa28   : > { %v2612_v28 = vmul.f32 0.5, %v2610_v38 }
 0xa2a   : > { %v2614_v31 = vmul.f32 %v2612_v28, %v6437_v60  ;;  %v5400_v28 = vld [vmem:[%s7188_s2 + $0x6fc] sm:$0xff] }
 0xa2b   : > { %2881 = vmatpush.bf16.msra.mxu2 %v5400_v28  ;;  %v5405_v28 = vld [vmem:[%s7188_s2 + $0x744] sm:$0xff] }
 0xa2c   : > { %v2617_v59 = vpack.c.bf16 %v2614_v31, %v2613_v19  ;;  %v5399_v19 = vld [vmem:[%s7188_s2 + $0x6f4] sm:$0xff]  ;;  %v5398_v31 = vld [vmem:[%s7188_s2 + $0x6ec] sm:$0xff] }
 0xa2e   : > { %4740 = vmatmul.msk.bf16.vlgmr.msra.gmra.mxu3 %vm536_vm8, %v2617_v59  ;;  %v5543_v59 = vld [vmem:[%s7189_s3 + $0x9] ss:$0 sm:$0xff] }
 0xa2f   : > { %2882 = vmatpush.bf16.msra.mxu2 %v5399_v19 }
 0xa33   : > { %2883 = vmatpush.bf16.msra.mxu2 %v5398_v31 }
 0xa37   : > { %2884 = vmatpush.bf16.msra.mxu2 %v5397_v32 }
 0xab1   : > { %v2665_v26 = vpop.f32.mrf.mxu3 }
 0xab2   : > { %v2666_v39 = vadd.f32 %v5541_v35, %v2665_v26 }
 0xab4   : > { %v2670_v40 = vmul.f32 %v2666_v39, %v2666_v39 }
 0xab6   : > { %v2672_v42 = vmul.f32 %v2670_v40, %v2666_v39 }
 0xab8   : > { %v2674_v46 = vmul.f32 0.044715, %v2672_v42 }
 0xab9   : > { %v2667_v43 = vpop.f32.mrf.mxu3 }
 0xaba   : > { %v2676_v9 = vadd.f32 %v2674_v46, %v2666_v39  ;;  %v2668_v44 = vadd.f32 %v5541_v35, %v2667_v43 }
 0xabc   : > { %v2678_v11 = vmul.f32 0.7978846, %v2676_v9  ;;  %v2671_v15 = vmul.f32 %v2668_v44, %v2668_v44 }
 0xabe   : > { %v2673_v21 = vmul.f32 %v2671_v15, %v2668_v44  ;;  %5607 = vtanh.f32 %v2678_v11 }
 0xac0   : > { %v2675_v47 = vmul.f32 0.044715, %v2673_v21 }
 0xac2   : > { %v2677_v18 = vadd.f32 %v2675_v47, %v2668_v44 }
 0xac4   : > { %v2679_v49 = vmul.f32 0.7978846, %v2677_v18  ;;  %v5608_v50 = vpop.eup %5607 }
 0xac5   : > { %v2682_v51 = vadd.f32 1.0, %v5608_v50 }
 0xac6   : > { %5609 = vtanh.f32 %v2679_v49 }
 0xac7   : > { %v2684_v52 = vmul.f32 0.5, %v2682_v51 }
 0xac9   : > { %v2686_v33 = vmul.f32 %v2684_v52, %v2666_v39 }
 0xacc   : > { %v5610_v41 = vpop.eup %5609 }
 0xacd   : > { %v2683_v45 = vadd.f32 1.0, %v5610_v41 }
 0xacf   : > { %v2685_v53 = vmul.f32 0.5, %v2683_v45 }
 0xad1   : > { %v2687_v54 = vmul.f32 %v2685_v53, %v2668_v44  ;;  %v5404_v53 = vld [vmem:[%s7188_s2 + $0x39c] sm:$0xff] }
 0xad2   : > { %2956 = vmatpush.bf16.msrb.mxu3 %v5404_v53  ;;  %v4874_v53 = vld [vmem:[%s7190_s4 + $0xb4] sm:$0xf0] }
 0xad3   : > { %v2690_v55 = vpack.c.bf16 %v2687_v54, %v2686_v33  ;;  %v5403_v33 = vld [vmem:[%s7188_s2 + $0x394] sm:$0xff]  ;;  %v5402_v54 = vld [vmem:[%s7188_s2 + $0x38c] sm:$0xff] }
 0xad5   : > { %4758 = vmatmul.msk.bf16.vlgmr.msrb.gmra.mxu0 %vm536_vm8, %v2690_v55  ;;  %v5544_v55 = vld [vmem:[%s7189_s3 + $0x13] ss:$0 sm:$0xff] }
 0xad6   : > { %2957 = vmatpush.bf16.msrb.mxu3 %v5403_v33  ;;  %v4880_v33 = vld [vmem:[%s7190_s4 + $0xb0] sm:$0xf] }
 0xada   : > { %2958 = vmatpush.bf16.msrb.mxu3 %v5402_v54  ;;  %v5420_v54 = vld [vmem:[%s7190_s4 + $0xb8] sm:$0xf0] }
 0xade   : > { %2959 = vmatpush.bf16.msrb.mxu3 %v5401_v56  ;;  %v4881_v56 = vor.u32 %v5420_v54, %v4880_v33  ;;  %v4901_v54 = vld [vmem:[%s7190_s4 + $0x24] sm:$0xf0] }
 0xb52   : > { %v2738_v48 = vpop.f32.mrf.mxu0 }
 0xb53   : > { %v2739_v1 = vadd.f32 %v5542_v61, %v2738_v48 }
 0xb55   : > { %v6478_v4 = vadd.f32 %v2739_v1, %v6430_v7 }
 0xb57   : > { %v2745_v5 = vmul.f32 %v6478_v4, %v6478_v4 }
 0xb59   : > { %v2747_v2 = vmul.f32 %v2745_v5, %v6478_v4 }
 0xb5a   : > { %v2740_v6 = vpop.f32.mrf.mxu0 }
 0xb5b   : > { %v2749_v8 = vmul.f32 0.044715, %v2747_v2  ;;  %v2741_v20 = vadd.f32 %v5542_v61, %v2740_v6 }
 0xb5d   : > { %v2751_v0 = vadd.f32 %v2749_v8, %v6478_v4  ;;  %v6485_v62 = vadd.f32 %v2741_v20, %v6437_v60 }
 0xb5f   : > { %v2753_v63 = vmul.f32 0.7978846, %v2751_v0  ;;  %v2746_v12 = vmul.f32 %v6485_v62, %v6485_v62 }
 0xb61   : > { %v2748_v7 = vmul.f32 %v2746_v12, %v6485_v62  ;;  %5611 = vtanh.f32 %v2753_v63 }
 0xb63   : > { %v2750_v3 = vmul.f32 0.044715, %v2748_v7 }
 0xb65   : > { %v2752_v17 = vadd.f32 %v2750_v3, %v6485_v62 }
 0xb67   : > { %v2754_v10 = vmul.f32 0.7978846, %v2752_v17  ;;  %v5612_v22 = vpop.eup %5611 }
 0xb68   : > { %v2757_v30 = vadd.f32 1.0, %v5612_v22 }
 0xb69   : > { %5613 = vtanh.f32 %v2754_v10 }
 0xb6a   : > { %v2759_v25 = vmul.f32 0.5, %v2757_v30 }
 0xb6c   : > { %v2761_v60 = vmul.f32 %v2759_v25, %v6478_v4 }
 0xb6f   : > { %v5614_v16 = vpop.eup %5613 }
 0xb70   : > { %v2758_v24 = vadd.f32 1.0, %v5614_v16 }
 0xb72   : > { %v2760_v13 = vmul.f32 0.5, %v2758_v24 }
 0xb74   : > { %v2762_v38 = vmul.f32 %v2760_v13, %v6485_v62  ;;  %v5408_v13 = vld [vmem:[%s7188_s2 + $0x75c] sm:$0xff] }
 0xb75   : > { %3029 = vmatpush.bf16.msra.mxu0 %v5408_v13  ;;  %v5414_v13 = vld [vmem:[%s7190_s4 + $0x88] sm:$0xf0] }
 0xb76   : > { %v2765_v27 = vpack.c.bf16 %v2762_v38, %v2761_v60  ;;  %v5407_v60 = vld [vmem:[%s7188_s2 + $0x754] sm:$0xff]  ;;  %v5406_v38 = vld [vmem:[%s7188_s2 + $0x74c] sm:$0xff] }
 0xb78   : > { %4776 = vmatmul.msk.bf16.vlgmr.msra.gmra.mxu1 %vm536_vm8, %v2765_v27  ;;  %v5545_v27 = vld [vmem:[%s7189_s3 + $0xa] ss:$0 sm:$0xff] }
 0xb79   : > { %3030 = vmatpush.bf16.msra.mxu0 %v5407_v60 }
 0xb7d   : > { %3031 = vmatpush.bf16.msra.mxu0 %v5406_v38 }
 0xb81   : > { %3032 = vmatpush.bf16.msra.mxu0 %v5405_v28  ;;  %v5410_v28 = vld [vmem:[%s7190_s4 + $0x68] sm:$0xf0] }
 0xb85   : > { %3195 = vmatpush.bf16.msrb.mxu0 %v4881_v56  ;;  %v5426_v56 = vld [vmem:[%s7190_s4 + $0x28] sm:$0xf0] }
 0xbf5   : > { %v2813_v23 = vpop.f32.mrf.mxu1 }
 0xbf6   : > { %v2814_v34 = vadd.f32 %v5543_v59, %v2813_v23 }
 0xbf8   : > { %v2818_v35 = vmul.f32 %v2814_v34, %v2814_v34 }
 0xbfa   : > { %v2820_v37 = vmul.f32 %v2818_v35, %v2814_v34 }
 0xbfc   : > { %v2822_v26 = vmul.f32 0.044715, %v2820_v37 }
 0xbfd   : > { %v2815_v39 = vpop.f32.mrf.mxu1 }
 0xbfe   : > { %v2824_v40 = vadd.f32 %v2822_v26, %v2814_v34  ;;  %v2816_v42 = vadd.f32 %v5543_v59, %v2815_v39 }
 0xc00   : > { %v2826_v46 = vmul.f32 0.7978846, %v2824_v40  ;;  %v2819_v43 = vmul.f32 %v2816_v42, %v2816_v42 }
 0xc02   : > { %v2821_v9 = vmul.f32 %v2819_v43, %v2816_v42  ;;  %5615 = vtanh.f32 %v2826_v46 }
 0xc04   : > { %v2823_v44 = vmul.f32 0.044715, %v2821_v9 }
 0xc06   : > { %v2825_v11 = vadd.f32 %v2823_v44, %v2816_v42 }
 0xc08   : > { %v2827_v15 = vmul.f32 0.7978846, %v2825_v11  ;;  %v5616_v21 = vpop.eup %5615 }
 0xc09   : > { %v2830_v47 = vadd.f32 1.0, %v5616_v21 }
 0xc0a   : > { %5617 = vtanh.f32 %v2827_v15 }
 0xc0b   : > { %v2832_v49 = vmul.f32 0.5, %v2830_v47 }
 0xc0d   : > { %v2834_v41 = vmul.f32 %v2832_v49, %v2814_v34 }
 0xc10   : > { %v5618_v18 = vpop.eup %5617 }
 0xc11   : > { %v2831_v50 = vadd.f32 1.0, %v5618_v18 }
 0xc13   : > { %v2833_v51 = vmul.f32 0.5, %v2831_v50 }
 0xc15   : > { %v2835_v52 = vmul.f32 %v2833_v51, %v2816_v42  ;;  %v4872_v51 = vld [vmem:[%s7190_s4 + $0xa8] sm:$0xf] }
 0xc17   : > { %v2838_v45 = vpack.c.bf16 %v2835_v52, %v2834_v41  ;;  %v5419_v41 = vld [vmem:[%s7190_s4 + $0xb0] sm:$0xf0]  ;;  %v5418_v52 = vld [vmem:[%s7190_s4 + $0xac] sm:$0xf] }
 0xc19   : > { %4794 = vmatmul.msk.bf16.vlgmr.msra.gmra.mxu2 %vm536_vm8, %v2838_v45  ;;  %v4873_v45 = vor.u32 %v5419_v41, %v4872_v51 }
 0xc1b   : > { %3169 = vmatpush.bf16.msrb.mxu2 %v4873_v45  ;;  %v5425_v45 = vld [vmem:[%s7190_s4 + $0x20] sm:$0xf0] }
 0xc9c   : > { %v2886_v57 = vpop.f32.mrf.mxu2 }
 0xc9d   : > { %v2887_v58 = vadd.f32 %v5544_v55, %v2886_v57  ;;  %v4860_v57 = vld [vmem:[%s7190_s4 + $0x90] sm:$0xf] }
 0xc9f   : > { %v6526_v61 = vadd.f32 %v2887_v58, %v6478_v4  ;;  %v5416_v58 = vld [vmem:[%s7190_s4 + $0x98] sm:$0xf0] }
 0xca1   : > { %v2893_v14 = vmul.f32 %v6526_v61, %v6526_v61 }
 0xca3   : > { %v2895_v48 = vmul.f32 %v2893_v14, %v6526_v61  ;;  %v5415_v14 = vld [vmem:[%s7190_s4 + $0x94] sm:$0xf] }
 0xca4   : > { %v2888_v1 = vpop.f32.mrf.mxu2 }
 0xca5   : > { %v2897_v5 = vmul.f32 0.044715, %v2895_v48  ;;  %v2889_v2 = vadd.f32 %v5544_v55, %v2888_v1  ;;  %v4877_v55 = vor.u32 %v5418_v52, %v4874_v53  ;;  %v4861_v48 = vor.u32 %v5416_v58, %v4860_v57  ;;  %v4862_v1 = vld [vmem:[%s7190_s4 + $0x9c] sm:$0xf0]  ;;  %v4899_v52 = vld [vmem:[%s7190_s4 + $0x18] sm:$0xf] }
 0xca6   : > { %v5424_v53 = vld [vmem:[%s7190_s4 + $0x1c] sm:$0xf]  ;;  %v4900_v33 = vor.u32 %v5425_v45, %v4899_v52  ;;  %v4965_v52 = vld [vmem:[%s7190_s4 + $0xfc] sm:$0xf0] }
 0xca7   : > { %v2899_v6 = vadd.f32 %v2897_v5, %v6526_v61  ;;  %v6533_v8 = vadd.f32 %v2889_v2, %v6485_v62  ;;  %v4868_v5 = vld [vmem:[%s7190_s4 + $0x98] sm:$0xf]  ;;  %v5417_v2 = vld [vmem:[%s7190_s4 + $0xa0] sm:$0xf0]  ;;  %3182 = vmatpush.bf16.msra.mxu3 %v4877_v55  ;;  %3170 = vmatpush.bf16.msrb.mxu2 %v4861_v48  ;;  %v4907_v55 = vld [vmem:[%s7190_s4 + $0x20] sm:$0xf]  ;;  %v4904_v57 = vor.u32 %v5424_v53, %v4901_v54 }
 0xca8   : > { %v4908_v58 = vor.u32 %v5426_v56, %v4907_v55  ;;  %v5422_v48 = vld [vmem:[%s7190_s4 + $0x8] sm:$0xf0]  ;;  %v4999_v53 = vld [vmem:[%s7190_s4 + $0x138] sm:$0xf]  ;;  %v5071_v55 = vld [vmem:[%s7190_s4 + $0x1c8] sm:$0xf] }
 0xca9   : > { %v2901_v20 = vmul.f32 0.7978846, %v2899_v6  ;;  %v2894_v0 = vmul.f32 %v6533_v8, %v6533_v8  ;;  %v4865_v6 = vor.u32 %v5415_v14, %v4862_v1  ;;  %v4887_v14 = vld [vmem:[%s7190_s4] sm:$0xf]  ;;  %v5421_v1 = vld [vmem:[%s7190_s4 + $0x4] sm:$0xf] }
 0xcaa   : > { %v5467_v56 = vld [vmem:[%s7190_s4 + $0x1d0] sm:$0xf0] }
 0xcab   : > { %v2896_v4 = vmul.f32 %v2894_v0, %v6533_v8  ;;  %5619 = vtanh.f32 %v2901_v20  ;;  %v4869_v20 = vor.u32 %v5417_v2, %v4868_v5  ;;  %3183 = vmatpush.bf16.msra.mxu3 %v4865_v6  ;;  %v4888_v5 = vor.u32 %v5422_v48, %v4887_v14  ;;  %v4889_v2 = vld [vmem:[%s7190_s4 + $0xc] sm:$0xf0]  ;;  %v4895_v6 = vld [vmem:[%s7190_s4 + $0x8] sm:$0xf]  ;;  %v5491_v14 = vld [vmem:[%s7190_s4 + $0x290] sm:$0xf0] }
 0xcad   : > { %v2898_v63 = vmul.f32 0.044715, %v2896_v4  ;;  %3196 = vmatpush.bf16.msrb.mxu0 %v4869_v20  ;;  %v3043_v4 = vmul.u32 16, %v5764_v36  ;;  %v4848_v36 = vld [vmem:[%s7190_s4 + $0x78] sm:$0xf] }
 0xcae   : > { %v5423_v20 = vld [vmem:[%s7190_s4 + $0x10] sm:$0xf0] }
 0xcaf   : > { %v2900_v12 = vadd.f32 %v2898_v63, %v6533_v8  ;;  %v5546_v63 = vld [vmem:[%s7189_s3 + $0x14] ss:$0 sm:$0xff] }
 0xcb1   : > { %v2902_v7 = vmul.f32 0.7978846, %v2900_v12  ;;  %v5620_v3 = vpop.eup %5619  ;;  %v3042_v12 = vand.u32 127, %v325_v29  ;;  %v5413_v29 = vld [vmem:[%s7190_s4 + $0x80] sm:$0xf0] }
 0xcb2   : > { %v2905_v17 = vadd.f32 1.0, %v5620_v3 }
 0xcb3   : > { %5621 = vtanh.f32 %v2902_v7  ;;  %v3044_v7 = vadd.s32 15, %v3043_v4  ;;  %v4896_v4 = vor.u32 %v5423_v20, %v4895_v6  ;;  %v4987_v6 = vld [vmem:[%s7190_s4 + $0x120] sm:$0xf]  ;;  %v5446_v20 = vld [vmem:[%s7190_s4 + $0x128] sm:$0xf0] }
 0xcb4   : > { %v2907_v30 = vmul.f32 0.5, %v2905_v17 }
 0xcb5   : > { %vm3045_vm0 = vcmp.eq.s32.totalorder %v3042_v12, %v3044_v7 }
 0xcb6   : > { %v2909_v62 = vmul.f32 %v2907_v30, %v6526_v61 }
 0xcb9   : > { %v5622_v10 = vpop.eup %5621 }
 0xcba   : > { %v2906_v22 = vadd.f32 1.0, %v5622_v10 }
 0xcbc   : > { %v2908_v16 = vmul.f32 0.5, %v2906_v22 }
 0xcbe   : > { %v2910_v24 = vmul.f32 %v2908_v16, %v6533_v8  ;;  %v5646_v16 = vmov 0.0  }
 0xcc0   : > { %v2913_v25 = vpack.c.bf16 %v2910_v24, %v2909_v62  ;;  %v4831_v62 = vsel %vm3045_vm0, 1.0, %v5646_v16  ;;  %v4849_v24 = vor.u32 %v5413_v29, %v4848_v36 }
 0xcc2   : > { %4812 = vmatmul.msk.bf16.vlgmr.msrb.gmra.mxu3 %vm536_vm8, %v2913_v25  ;;  %v4856_v25 = vld [vmem:[%s7190_s4 + $0x80] sm:$0xf]  ;;  %3171 = vmatpush.bf16.msrb.mxu2 %v4849_v24  ;;  %v5025_v24 = vld [vmem:[%s7190_s4 + $0x174] sm:$0xf0] }
 0xcc3   : > { %v4857_v38 = vor.u32 %v5414_v13, %v4856_v25  ;;  %v5451_v25 = vld [vmem:[%s7190_s4 + $0x154] sm:$0xf]  ;;  %v5013_v13 = vld [vmem:[%s7190_s4 + $0x15c] sm:$0xf0] }
 0xcc5   : > { %3197 = vmatpush.bf16.msrb.mxu0 %v4857_v38  ;;  %v5119_v38 = vld [vmem:[%s7190_s4 + $0x228] sm:$0xf] }
 0xd45   : > { %v2961_v19 = vpop.f32.mrf.mxu3 }
 0xd46   : > { %v2962_v31 = vadd.f32 %v5545_v27, %v2961_v19  ;;  %v5409_v19 = vld [vmem:[%s7190_s4 + $0x64] sm:$0xf] }
 0xd48   : > { %v2966_v59 = vmul.f32 %v2962_v31, %v2962_v31 }
 0xd4a   : > { %v2968_v32 = vmul.f32 %v2966_v59, %v2962_v31  ;;  %v4838_v59 = vld [vmem:[%s7190_s4 + $0x6c] sm:$0xf0] }
 0xd4c   : > { %v2970_v23 = vmul.f32 0.044715, %v2968_v32  ;;  %v4844_v32 = vld [vmem:[%s7190_s4 + $0x68] sm:$0xf] }
 0xd4d   : > { %v2963_v34 = vpop.f32.mrf.mxu3 }
 0xd4e   : > { %v2972_v35 = vadd.f32 %v2970_v23, %v2962_v31  ;;  %v2964_v37 = vadd.f32 %v5545_v27, %v2963_v34  ;;  %v4836_v27 = vld [vmem:[%s7190_s4 + $0x60] sm:$0xf]  ;;  %v5411_v23 = vld [vmem:[%s7190_s4 + $0x70] sm:$0xf0]  ;;  %v4841_v34 = vor.u32 %v5409_v19, %v4838_v59  ;;  %v5107_v59 = vld [vmem:[%s7190_s4 + $0x210] sm:$0xf] }
 0xd50   : > { %v2974_v26 = vmul.f32 0.7978846, %v2972_v35  ;;  %v2967_v39 = vmul.f32 %v2964_v37, %v2964_v37  ;;  %v4845_v35 = vor.u32 %v5411_v23, %v4844_v32  ;;  %v5476_v32 = vld [vmem:[%s7190_s4 + $0x218] sm:$0xf0] }
 0xd52   : > { %v2969_v40 = vmul.f32 %v2967_v39, %v2964_v37  ;;  %5623 = vtanh.f32 %v2974_v26  ;;  %3198 = vmatpush.bf16.msrb.mxu0 %v4845_v35  ;;  %v5431_v26 = vld [vmem:[%s7190_s4 + $0x50] sm:$0xf0]  ;;  %v5430_v39 = vld [vmem:[%s7190_s4 + $0x4c] sm:$0xf]  ;;  %v5445_v35 = vld [vmem:[%s7190_s4 + $0x124] sm:$0xf] }
 0xd54   : > { %v2971_v42 = vmul.f32 0.044715, %v2969_v40 }
 0xd56   : > { %v2973_v46 = vadd.f32 %v2971_v42, %v2964_v37  ;;  %v4925_v42 = vld [vmem:[%s7190_s4 + $0x54] sm:$0xf0] }
 0xd58   : > { %v2975_v43 = vmul.f32 0.7978846, %v2973_v46  ;;  %v5624_v9 = vpop.eup %5623  ;;  %v4931_v46 = vld [vmem:[%s7190_s4 + $0x50] sm:$0xf] }
 0xd59   : > { %v2978_v44 = vadd.f32 1.0, %v5624_v9  ;;  %v4928_v9 = vor.u32 %v5430_v39, %v4925_v42  ;;  %v5095_v42 = vld [vmem:[%s7190_s4 + $0x1f8] sm:$0xf] }
 0xd5a   : > { %5625 = vtanh.f32 %v2975_v43  ;;  %v5432_v43 = vld [vmem:[%s7190_s4 + $0x58] sm:$0xf0] }
 0xd5b   : > { %v2980_v15 = vmul.f32 0.5, %v2978_v44  ;;  %v4932_v44 = vor.u32 %v5432_v43, %v4931_v46  ;;  %v5473_v46 = vld [vmem:[%s7190_s4 + $0x200] sm:$0xf0] }
 0xd5d   : > { %v2982_v18 = vmul.f32 %v2980_v15, %v2962_v31  ;;  %v4837_v31 = vor.u32 %v5410_v28, %v4836_v27  ;;  %v5428_v15 = vld [vmem:[%s7190_s4 + $0x38] sm:$0xf0]  ;;  %v5479_v27 = vld [vmem:[%s7190_s4 + $0x230] sm:$0xf0] }
 0xd5e   : > { %v5448_v28 = vld [vmem:[%s7190_s4 + $0x13c] sm:$0xf]  ;;  %v5120_v19 = vor.u32 %v5479_v27, %v5119_v38  ;;  %v5143_v38 = vld [vmem:[%s7190_s4 + $0x258] sm:$0xf]  ;;  %v5485_v27 = vld [vmem:[%s7190_s4 + $0x260] sm:$0xf0] }
 0xd5f   : > { %3172 = vmatpush.bf16.msrb.mxu2 %v4837_v31  ;;  %v5001_v31 = vld [vmem:[%s7190_s4 + $0x144] sm:$0xf0] }
 0xd60   : > { %v5626_v11 = vpop.eup %5625  ;;  %v5004_v23 = vor.u32 %v5448_v28, %v5001_v31  ;;  %v5144_v28 = vor.u32 %v5485_v27, %v5143_v38  ;;  %v5487_v27 = vld [vmem:[%s7190_s4 + $0x274] sm:$0xf] }
 0xd61   : > { %v2979_v21 = vadd.f32 1.0, %v5626_v11  ;;  %v4911_v11 = vld [vmem:[%s7190_s4 + $0x30] sm:$0xf] }
 0xd63   : > { %v2981_v47 = vmul.f32 0.5, %v2979_v21  ;;  %3322 = vmatpush.bf16.msra.mxu2 %v4928_v9  ;;  %v5427_v21 = vld [vmem:[%s7190_s4 + $0x34] sm:$0xf]  ;;  %v5096_v9 = vor.u32 %v5473_v46, %v5095_v42  ;;  %v5131_v42 = vld [vmem:[%s7190_s4 + $0x240] sm:$0xf] }
 0xd64   : > { %v5482_v46 = vld [vmem:[%s7190_s4 + $0x248] sm:$0xf0] }
 0xd65   : > { %v2983_v49 = vmul.f32 %v2981_v47, %v2964_v37  ;;  %v4923_v37 = vld [vmem:[%s7190_s4 + $0x48] sm:$0xf]  ;;  %v4912_v47 = vor.u32 %v5428_v15, %v4911_v11  ;;  %v4977_v11 = vld [vmem:[%s7190_s4 + $0x114] sm:$0xf0] }
 0xd66   : > { %v4924_v40 = vor.u32 %v5431_v26, %v4923_v37  ;;  %v4989_v37 = vld [vmem:[%s7190_s4 + $0x12c] sm:$0xf0]  ;;  %v5023_v26 = vld [vmem:[%s7190_s4 + $0x168] sm:$0xf] }
 0xd67   : > { %v2986_v50 = vpack.c.bf16 %v2983_v49, %v2982_v18  ;;  %v4913_v18 = vld [vmem:[%s7190_s4 + $0x3c] sm:$0xf0]  ;;  %v4919_v49 = vld [vmem:[%s7190_s4 + $0x38] sm:$0xf]  ;;  %v4992_v39 = vor.u32 %v5445_v35, %v4989_v37  ;;  %v5477_v35 = vld [vmem:[%s7190_s4 + $0x220] sm:$0xf0] }
 0xd68   : > { %v4916_v51 = vor.u32 %v5427_v21, %v4913_v18  ;;  %v5011_v21 = vld [vmem:[%s7190_s4 + $0x150] sm:$0xf]  ;;  %v5035_v37 = vld [vmem:[%s7190_s4 + $0x180] sm:$0xf] }
 0xd69   : > { %4830 = vmatmul.msk.bf16.vlgmr.msra.gmra.mxu0 %vm536_vm8, %v2986_v50  ;;  %v5429_v50 = vld [vmem:[%s7190_s4 + $0x40] sm:$0xf0] }
 0xd6a   : > { %v4920_v41 = vor.u32 %v5429_v50, %v4919_v49  ;;  %3323 = vmatpush.bf16.msra.mxu2 %v4916_v51  ;;  %v5083_v49 = vld [vmem:[%s7190_s4 + $0x1e0] sm:$0xf]  ;;  %v5470_v50 = vld [vmem:[%s7190_s4 + $0x1e8] sm:$0xf0] }
 0xd6b   : > { %v5084_v51 = vor.u32 %v5470_v50, %v5083_v49  ;;  %v4951_v49 = vld [vmem:[%s7190_s4 + $0xd8] sm:$0xf]  ;;  %v5437_v50 = vld [vmem:[%s7190_s4 + $0xe0] sm:$0xf0] }
 0xd6e   : > { %3324 = vmatpush.bf16.msra.mxu2 %v4904_v57  ;;  %v5167_v57 = vld [vmem:[%s7190_s4 + $0x288] sm:$0xf] }
 0xd6f   : > { %v5168_v48 = vor.u32 %v5491_v14, %v5167_v57 }
 0xde6   : > { %v3034_v0 = vpop.f32.mrf.mxu0 }
 0xde7   : > { %v3035_v17 = vadd.f32 %v5546_v63, %v3034_v0  ;;  %v4892_v0 = vor.u32 %v5421_v1, %v4889_v2  ;;  %v5436_v1 = vld [vmem:[%s7190_s4 + $0xdc] sm:$0xf] }
 0xde9   : > { %v3039_v30 = vadd.f32 %v3035_v17, %v6526_v61  ;;  %v4850_v61 = vld [vmem:[%s7190_s4 + $0x84] sm:$0xf0]  ;;  %3325 = vmatpush.bf16.msra.mxu2 %v4892_v0  ;;  %v4988_v0 = vor.u32 %v5446_v20, %v4987_v6  ;;  %v5471_v20 = vld [vmem:[%s7190_s4 + $0x1f0] sm:$0xf0] }
 0xdee   : > { %v3036_v3 = vpop.f32.mrf.mxu0 }
 0xdef   : > { %v3037_v10 = vadd.f32 %v5546_v63, %v3036_v3 }
 0xdf1   : > { %v3040_v22 = vadd.f32 %v3037_v10, %v6533_v8  ;;  %v5412_v8 = vld [vmem:[%s7190_s4 + $0x7c] sm:$0xf] }
 0xdf2   : > { %v4853_v60 = vor.u32 %v5412_v8, %v4850_v61  ;;  %v5454_v8 = vld [vmem:[%s7190_s4 + $0x16c] sm:$0xf] }
 0xdf3   : > { %3066 = vmatpush.msrb.mxu1 %v3040_v22  ;;  %v5028_v61 = vor.u32 %v5454_v8, %v5025_v24  ;;  %v5480_v24 = vld [vmem:[%s7190_s4 + $0x238] sm:$0xf0] }
 0xdf4   : > { %3184 = vmatpush.bf16.msra.mxu3 %v4853_v60  ;;  %v5016_v60 = vor.u32 %v5451_v25, %v5013_v13  ;;  %v5461_v25 = vld [vmem:[%s7190_s4 + $0x1a0] sm:$0xf0] }
 0xdf5   : > { %3067 = vmatpush.msrb.mxu1 %v3039_v30 }
 0xdf6   : > { %4832 = vmatmul.msk.f32.vlgmr.msrb.gmra.mxu1 %vm3048_vm12, %v4831_v62 }
 0xdf7   : > { %3309 = vmatpush.bf16.msra.mxu1 %v4924_v40  ;;  %v5455_v40 = vld [vmem:[%s7190_s4 + $0x170] sm:$0xf0] }
 0xdf8   : > { %3185 = vmatpush.bf16.msra.mxu3 %v4841_v34  ;;  %v5108_v34 = vor.u32 %v5476_v32, %v5107_v59  ;;  %v5024_v43 = vor.u32 %v5455_v40, %v5023_v26  ;;  %v4963_v59 = vld [vmem:[%s7190_s4 + $0xf0] sm:$0xf]  ;;  %v5440_v32 = vld [vmem:[%s7190_s4 + $0xf8] sm:$0xf0]  ;;  %v5458_v26 = vld [vmem:[%s7190_s4 + $0x188] sm:$0xf0] }
 0xdf9   : > { %v5036_v40 = vor.u32 %v5458_v26, %v5035_v37  ;;  %v5466_v26 = vld [vmem:[%s7190_s4 + $0x1cc] sm:$0xf] }
 0xdfa   : > { %3786 = vmatpush.bf16.msra.mxu0 %v5024_v43  ;;  %v5478_v43 = vld [vmem:[%s7190_s4 + $0x22c] sm:$0xf] }
 0xdfb   : > { %3310 = vmatpush.bf16.msra.mxu1 %v4912_v47  ;;  %v5452_v47 = vld [vmem:[%s7190_s4 + $0x158] sm:$0xf0] }
 0xdfc   : > { %3335 = vmatpush.bf16.msrb.mxu3 %v4932_v44  ;;  %v5442_v44 = vld [vmem:[%s7190_s4 + $0x10c] sm:$0xf]  ;;  %v5012_v18 = vor.u32 %v5452_v47, %v5011_v21  ;;  %v5456_v21 = vld [vmem:[%s7190_s4 + $0x178] sm:$0xf0] }
 0xdfd   : > { %v4980_v15 = vor.u32 %v5442_v44, %v4977_v11  ;;  %v5132_v44 = vor.u32 %v5482_v46, %v5131_v42  ;;  %v5121_v11 = vld [vmem:[%s7190_s4 + $0x234] sm:$0xf0] }
 0xdfe   : > { %3787 = vmatpush.bf16.msra.mxu0 %v5012_v18  ;;  %v5124_v47 = vor.u32 %v5478_v43, %v5121_v11 }
 0xdff   : > { %3311 = vmatpush.bf16.msra.mxu1 %v4900_v33  ;;  %v5449_v33 = vld [vmem:[%s7190_s4 + $0x140] sm:$0xf0] }
 0xe00   : > { %3336 = vmatpush.bf16.msrb.mxu3 %v4920_v41  ;;  %v5439_v41 = vld [vmem:[%s7190_s4 + $0xf4] sm:$0xf]  ;;  %v5000_v54 = vor.u32 %v5449_v33, %v4999_v53  ;;  %v5109_v33 = vld [vmem:[%s7190_s4 + $0x21c] sm:$0xf0] }
 0xe01   : > { %v4968_v45 = vor.u32 %v5439_v41, %v4965_v52  ;;  %v4952_v41 = vor.u32 %v5437_v50, %v4951_v49  ;;  %v5474_v52 = vld [vmem:[%s7190_s4 + $0x208] sm:$0xf0]  ;;  %v5475_v53 = vld [vmem:[%s7190_s4 + $0x214] sm:$0xf] }
 0xe02   : > { %3788 = vmatpush.bf16.msra.mxu0 %v5000_v54  ;;  %v5019_v54 = vld [vmem:[%s7190_s4 + $0x158] sm:$0xf]  ;;  %v5462_v49 = vld [vmem:[%s7190_s4 + $0x1a8] sm:$0xf0]  ;;  %v5463_v50 = vld [vmem:[%s7190_s4 + $0x1b4] sm:$0xf] }
 0xe03   : > { %3312 = vmatpush.bf16.msra.mxu1 %v4888_v5  ;;  %v4953_v5 = vld [vmem:[%s7190_s4 + $0xe4] sm:$0xf0] }
 0xe04   : > { %3337 = vmatpush.bf16.msrb.mxu3 %v4908_v58  ;;  %v5072_v58 = vor.u32 %v5467_v56, %v5071_v55  ;;  %v4956_v2 = vor.u32 %v5436_v1, %v4953_v5  ;;  %v5112_v55 = vor.u32 %v5475_v53, %v5109_v33  ;;  %v5453_v56 = vld [vmem:[%s7190_s4 + $0x160] sm:$0xf0]  ;;  %v5434_v1 = vld [vmem:[%s7190_s4 + $0xc8] sm:$0xf0]  ;;  %v5091_v5 = vld [vmem:[%s7190_s4 + $0x1e8] sm:$0xf] }
 0xe05   : > { %v5020_v14 = vor.u32 %v5453_v56, %v5019_v54  ;;  %v4971_v53 = vld [vmem:[%s7190_s4 + $0xf8] sm:$0xf]  ;;  %v5441_v33 = vld [vmem:[%s7190_s4 + $0x100] sm:$0xf0] }
 0xe06   : > { %3789 = vmatpush.bf16.msra.mxu0 %v4988_v0  ;;  %v5092_v0 = vor.u32 %v5471_v20, %v5091_v5  ;;  %v5481_v54 = vld [vmem:[%s7190_s4 + $0x244] sm:$0xf]  ;;  %v4972_v56 = vor.u32 %v5441_v33, %v4971_v53  ;;  %v5460_v20 = vld [vmem:[%s7190_s4 + $0x19c] sm:$0xf] }
 0xe07   : > { %3799 = vmatpush.bf16.msrb.mxu1 %v5120_v19 }
 0xe08   : > { %3338 = vmatpush.bf16.msrb.mxu3 %v4896_v4  ;;  %v5059_v4 = vld [vmem:[%s7190_s4 + $0x1b0] sm:$0xf] }
 0xe0b   : > { %3800 = vmatpush.bf16.msrb.mxu1 %v5108_v34  ;;  %v4964_v34 = vor.u32 %v5440_v32, %v4963_v59  ;;  %v5067_v59 = vld [vmem:[%s7190_s4 + $0x1b8] sm:$0xf] }
 0xe0f   : > { %3801 = vmatpush.bf16.msrb.mxu1 %v5096_v9 }
 0xe13   : > { %3802 = vmatpush.bf16.msrb.mxu1 %v5084_v51  ;;  %v5103_v51 = vld [vmem:[%s7190_s4 + $0x200] sm:$0xf] }
 0xe17   : > { %3803 = vmatpush.bf16.msrb.mxu1 %v5072_v58 }
 0xe73   : > { %v3069_v63 = vpop.f32.mrf.mxu1 }
 0xe74   : > { %v3072_v12 = vpack.c.bf16 %v3069_v63, %v3069_v63  ;;  %v3204_v7 = vmul.f32 %v3069_v63, %v3069_v63 }
 0xe76   : > { %v3205_v3 = vmul.f32 %v3204_v7, %v3069_v63  ;;  %4882 = vmatmul.msk.bf16.vlgmr.msrb.gmra.mxu2 %vm536_vm8, %v3072_v12  ;;  %4883 = vmatmul.msk.bf16.vlgmr.msra.gmra.mxu3 %vm536_vm8, %v3072_v12 }
 0xe77   : > { %4884 = vmatmul.msk.bf16.vlgmr.msrb.gmra.mxu0 %vm536_vm8, %v3072_v12  ;;  %3825 = vmatpush.bf16.msra.mxu3 %v5028_v61  ;;  %v5155_v12 = vld [vmem:[%s7190_s4 + $0x270] sm:$0xf]  ;;  %v5047_v61 = vld [vmem:[%s7190_s4 + $0x198] sm:$0xf] }
 0xe78   : > { %v3206_v17 = vmul.f32 0.044715, %v3205_v3  ;;  %3816 = vmatpush.bf16.msrb.mxu2 %v5168_v48  ;;  %v5488_v3 = vld [vmem:[%s7190_s4 + $0x278] sm:$0xf0]  ;;  %v4939_v48 = vld [vmem:[%s7190_s4 + $0xc0] sm:$0xf] }
 0xe79   : > { %v4940_v6 = vor.u32 %v5434_v1, %v4939_v48 }
 0xe7a   : > { %v3207_v10 = vadd.f32 %v3206_v17, %v3069_v63 }
 0xe7b   : > { %3826 = vmatpush.bf16.msra.mxu3 %v5016_v60  ;;  %v5048_v60 = vor.u32 %v5461_v25, %v5047_v61  ;;  %v5085_v61 = vld [vmem:[%s7190_s4 + $0x1ec] sm:$0xf0]  ;;  %v4995_v25 = vld [vmem:[%s7190_s4 + $0x128] sm:$0xf] }
 0xe7c   : > { %v3208_v22 = vmul.f32 0.7978846, %v3207_v10  ;;  %v5156_v10 = vor.u32 %v5488_v3, %v5155_v12  ;;  %v5007_v12 = vld [vmem:[%s7190_s4 + $0x140] sm:$0xf]  ;;  %v5450_v3 = vld [vmem:[%s7190_s4 + $0x148] sm:$0xf0] }
 0xe7e   : > { %5627 = vtanh.f32 %v3208_v22  ;;  %v5433_v22 = vld [vmem:[%s7190_s4 + $0xc4] sm:$0xf]  ;;  %3817 = vmatpush.bf16.msrb.mxu2 %v5156_v10  ;;  %v5008_v10 = vor.u32 %v5450_v3, %v5007_v12  ;;  %v5438_v3 = vld [vmem:[%s7190_s4 + $0xe8] sm:$0xf0] }
 0xe7f   : > { %3827 = vmatpush.bf16.msra.mxu3 %v5004_v23  ;;  %v5115_v23 = vld [vmem:[%s7190_s4 + $0x218] sm:$0xf] }
 0xe82   : > { %3818 = vmatpush.bf16.msrb.mxu2 %v5144_v28  ;;  %v5157_v28 = vld [vmem:[%s7190_s4 + $0x27c] sm:$0xf0] }
 0xe83   : > { %3828 = vmatpush.bf16.msra.mxu3 %v4992_v39  ;;  %v5116_v39 = vor.u32 %v5477_v35, %v5115_v23  ;;  %v5160_v23 = vor.u32 %v5487_v27, %v5157_v28 }
 0xe84   : > { %v5628_v30 = vpop.eup %5627 }
 0xe85   : > { %v3210_v16 = vadd.f32 1.0, %v5628_v30  ;;  %v4941_v30 = vld [vmem:[%s7190_s4 + $0xcc] sm:$0xf0] }
 0xe86   : > { %3819 = vmatpush.bf16.msrb.mxu2 %v5132_v44 }
 0xe87   : > { %v3211_v62 = vmul.f32 0.5, %v3210_v16  ;;  %3829 = vmatpush.bf16.msra.mxu3 %v4980_v15  ;;  %v4944_v16 = vor.u32 %v5433_v22, %v4941_v30  ;;  %v5031_v15 = vld [vmem:[%s7190_s4 + $0x170] sm:$0xf]  ;;  %v5490_v22 = vld [vmem:[%s7190_s4 + $0x28c] sm:$0xf] }
 0xe88   : > { %v5032_v18 = vor.u32 %v5456_v21, %v5031_v15  ;;  %v5169_v30 = vld [vmem:[%s7190_s4 + $0x294] sm:$0xf0]  ;;  %v5484_v15 = vld [vmem:[%s7190_s4 + $0x25c] sm:$0xf]  ;;  %v5145_v21 = vld [vmem:[%s7190_s4 + $0x264] sm:$0xf0] }
 0xe89   : > { %v3212_v36 = vmul.f32 %v3211_v62, %v3069_v63  ;;  %v5464_v63 = vld [vmem:[%s7190_s4 + $0x1b8] sm:$0xf0]  ;;  %v4975_v62 = vld [vmem:[%s7190_s4 + $0x108] sm:$0xf] }
 0xe8a   : > { %v5060_v7 = vor.u32 %v5464_v63, %v5059_v4  ;;  %v5472_v4 = vld [vmem:[%s7190_s4 + $0x1fc] sm:$0xf]  ;;  %v5097_v63 = vld [vmem:[%s7190_s4 + $0x204] sm:$0xf0] }
 0xe8b   : > { %v3213_v29 = vpack.c.bf16 %v3212_v36, %v3212_v36  ;;  %3830 = vmatpush.bf16.msra.mxu3 %v4968_v45  ;;  %v5443_v36 = vld [vmem:[%s7190_s4 + $0x110] sm:$0xf0]  ;;  %v5104_v45 = vor.u32 %v5474_v52, %v5103_v51  ;;  %v5061_v51 = vld [vmem:[%s7190_s4 + $0x1bc] sm:$0xf0] }
 0xe8c   : > { %3804 = vmatpush.bf16.msrb.mxu1 %v5060_v7  ;;  %v4976_v8 = vor.u32 %v5443_v36, %v4975_v62  ;;  %v5100_v7 = vor.u32 %v5472_v4, %v5097_v63  ;;  %v5172_v36 = vor.u32 %v5490_v22, %v5169_v30 }
 0xe8d   : > { %4933 = vmatmul.msk.bf16.vlgmr.msra.gmra.mxu1 %vm536_vm8, %v3213_v29  ;;  %4934 = vmatmul.msk.bf16.vlgmr.msra.gmra.mxu2 %vm536_vm8, %v3213_v29 }
 0xe8e   : > { %4935 = vmatmul.msk.bf16.vlgmr.msrb.gmra.mxu3 %vm536_vm8, %v3213_v29  ;;  %v5127_v29 = vld [vmem:[%s7190_s4 + $0x230] sm:$0xf]  ;;  %3790 = vmatpush.bf16.msra.mxu0 %v4976_v8 }
 0xe8f   : > { %3831 = vmatpush.bf16.msra.mxu3 %v4956_v2  ;;  %v5128_v13 = vor.u32 %v5480_v24, %v5127_v29  ;;  %3838 = vmatpush.bf16.msra.mxu2 %v5124_v47  ;;  %v6937_v2 = vld [vmem:[%s7191_s5] sm:$0x7]  ;;  %v5468_v29 = vld [vmem:[%s7190_s4 + $0x1d8] sm:$0xf0]  ;;  %v5469_v24 = vld [vmem:[%s7190_s4 + $0x1e4] sm:$0xf] }
 0xe90   : > { %3805 = vmatpush.bf16.msrb.mxu1 %v5048_v60  ;;  %v3296_v62 = vperm.slane %v6937_v2, 0  ;;  %v5447_v60 = vld [vmem:[%s7190_s4 + $0x130] sm:$0xf0]  ;;  %v3297_v42 = vperm.slane %v6937_v2, 1  ;;  %v3298_v46 = vperm.slane %v6937_v2, 2 }
 0xe91   : > { %v4996_v38 = vor.u32 %v5447_v60, %v4995_v25  ;;  %v5055_v47 = vld [vmem:[%s7190_s4 + $0x1a0] sm:$0xf]  ;;  %v5435_v60 = vld [vmem:[%s7190_s4 + $0xd0] sm:$0xf0] }
 0xe92   : > { %3791 = vmatpush.bf16.msra.mxu0 %v4964_v34  ;;  %v5465_v34 = vld [vmem:[%s7190_s4 + $0x1c0] sm:$0xf0]  ;;  %v5056_v52 = vor.u32 %v5462_v49, %v5055_v47  ;;  %v5163_v47 = vld [vmem:[%s7190_s4 + $0x278] sm:$0xf] }
 0xe93   : > { %3832 = vmatpush.bf16.msra.mxu3 %v4944_v16  ;;  %3839 = vmatpush.bf16.msra.mxu2 %v5112_v55  ;;  %v5079_v16 = vld [vmem:[%s7190_s4 + $0x1d0] sm:$0xf]  ;;  %v5068_v37 = vor.u32 %v5465_v34, %v5067_v59 }
 0xe94   : > { %3806 = vmatpush.bf16.msrb.mxu1 %v5036_v40  ;;  %v5080_v8 = vor.u32 %v5468_v29, %v5079_v16  ;;  %v4983_v40 = vld [vmem:[%s7190_s4 + $0x110] sm:$0xf] }
 0xe96   : > { %3792 = vmatpush.bf16.msra.mxu0 %v4952_v41 }
 0xe97   : > { %3877 = vmatpush.bf16.msrb.mxu3 %v5128_v13  ;;  %3840 = vmatpush.bf16.msra.mxu2 %v5100_v7  ;;  %v5088_v13 = vor.u32 %v5469_v24, %v5085_v61  ;;  %v4959_v7 = vld [vmem:[%s7190_s4 + $0xe0] sm:$0xf]  ;;  %v5037_v24 = vld [vmem:[%s7190_s4 + $0x18c] sm:$0xf0]  ;;  %v4947_v61 = vld [vmem:[%s7190_s4 + $0xc8] sm:$0xf] }
 0xe98   : > { %3864 = vmatpush.bf16.msra.mxu1 %v5032_v18  ;;  %v5148_v18 = vor.u32 %v5484_v15, %v5145_v21  ;;  %v4960_v30 = vor.u32 %v5438_v3, %v4959_v7  ;;  %v4948_v28 = vor.u32 %v5435_v60, %v4947_v61  ;;  %v5505_v7 = vld [vmem:[%s7192_s6 + $0x60] sm:$0xff]  ;;  %v5504_v3 = vld [vmem:[%s7192_s6 + $0x58] sm:$0xff] }
 0xe9a   : > { %3793 = vmatpush.bf16.msra.mxu0 %v4940_v6 }
 0xe9b   : > { %3878 = vmatpush.bf16.msrb.mxu3 %v5116_v39  ;;  %3841 = vmatpush.bf16.msra.mxu2 %v5088_v13  ;;  %v5073_v39 = vld [vmem:[%s7190_s4 + $0x1d4] sm:$0xf0] }
 0xe9c   : > { %3865 = vmatpush.bf16.msra.mxu1 %v5020_v14  ;;  %v5076_v43 = vor.u32 %v5466_v26, %v5073_v39  ;;  %v5459_v14 = vld [vmem:[%s7190_s4 + $0x190] sm:$0xf0] }
 0xe9e   : > { %3855 = vmatpush.bf16.msrb.mxu0 %v5172_v36 }
 0xe9f   : > { %3879 = vmatpush.bf16.msrb.mxu3 %v5104_v45  ;;  %3842 = vmatpush.bf16.msra.mxu2 %v5076_v43  ;;  %v5064_v45 = vor.u32 %v5463_v50, %v5061_v51 }
 0xea0   : > { %3866 = vmatpush.bf16.msra.mxu1 %v5008_v10 }
 0xea2   : > { %3856 = vmatpush.bf16.msrb.mxu0 %v5160_v23 }
 0xea3   : > { %3880 = vmatpush.bf16.msrb.mxu3 %v5092_v0  ;;  %v5049_v0 = vld [vmem:[%s7190_s4 + $0x1a4] sm:$0xf0]  ;;  %3843 = vmatpush.bf16.msra.mxu2 %v5064_v45  ;;  %v5486_v45 = vld [vmem:[%s7190_s4 + $0x268] sm:$0xf0] }
 0xea4   : > { %3867 = vmatpush.bf16.msra.mxu1 %v4996_v38  ;;  %v5052_v12 = vor.u32 %v5460_v20, %v5049_v0  ;;  %v5495_v20 = vld [vmem:[%s7192_s6 + $0x10] sm:$0xff] }
 0xea5   : > { %v5507_v0 = vld [vmem:[%s7192_s6 + $0x70] sm:$0xff] }
 0xea6   : > { %3857 = vmatpush.bf16.msrb.mxu0 %v5148_v18  ;;  %v5489_v18 = vld [vmem:[%s7190_s4 + $0x280] sm:$0xf0] }
 0xea7   : > { %3881 = vmatpush.bf16.msrb.mxu3 %v5080_v8  ;;  %v5457_v8 = vld [vmem:[%s7190_s4 + $0x184] sm:$0xf]  ;;  %3844 = vmatpush.bf16.msra.mxu2 %v5052_v12 }
 0xea8   : > { %v5040_v13 = vor.u32 %v5457_v8, %v5037_v24  ;;  %v5493_v12 = vld [vmem:[%s7192_s6] sm:$0xff] }
 0xea9   : > { %v4936_v8 = vld [vmem:[%s7191_s5 + $0x6] sm:$0x7] }
 0xeaa   : > { %v5509_v24 = vld [vmem:[%s7192_s6 + $0x80] sm:$0xff]  ;;  %v3777_v61 = vperm.slane %v4936_v8, 0 }
 0xeab   : > { %3882 = vmatpush.bf16.msrb.mxu3 %v5068_v37  ;;  %3845 = vmatpush.bf16.msra.mxu2 %v5040_v13 }
 0xeaf   : > { %3883 = vmatpush.bf16.msrb.mxu3 %v5056_v52  ;;  %v5151_v52 = vld [vmem:[%s7190_s4 + $0x260] sm:$0xf] }
 0xef4   : > { %v6829_v17 = vpop.f32.mrf.mxu0 }
 0xef9   : > { %v6861_v19 = vpop.f32.mrf.mxu2  ;;  %v6863_v31 = vpop.f32.mrf.mxu3 }
 0xefc   : > { %v3202_v9 = vpop.f32.mrf.mxu0 }
 0xefd   : > { %v5444_v9 = vld [vmem:[%s7190_s4 + $0x118] sm:$0xf0] }
 0xefe   : > { %v4984_v11 = vor.u32 %v5444_v9, %v4983_v40 }
 0xf00   : > { %3868 = vmatpush.bf16.msra.mxu1 %v4984_v11 }
 0xf01   : > { %v3176_v57 = vpop.f32.mrf.mxu2  ;;  %v3189_v58 = vpop.f32.mrf.mxu3 }
 0xf02   : > { %v5133_v57 = vld [vmem:[%s7190_s4 + $0x24c] sm:$0xf0]  ;;  %v5043_v58 = vld [vmem:[%s7190_s4 + $0x188] sm:$0xf] }
 0xf03   : > { %v5136_v2 = vor.u32 %v5481_v54, %v5133_v57  ;;  %v5044_v6 = vor.u32 %v5459_v14, %v5043_v58  ;;  %v5500_v54 = vld [vmem:[%s7192_s6 + $0x38] sm:$0xff]  ;;  %v5139_v57 = vld [vmem:[%s7190_s4 + $0x248] sm:$0xf]  ;;  %v5483_v58 = vld [vmem:[%s7190_s4 + $0x250] sm:$0xf0] }
 0xf04   : > { %3869 = vmatpush.bf16.msra.mxu1 %v4972_v56  ;;  %v5152_v56 = vor.u32 %v5486_v45, %v5151_v52  ;;  %v5499_v14 = vld [vmem:[%s7192_s6 + $0x30] sm:$0xff] }
 0xf05   : > { %3858 = vmatpush.bf16.msrb.mxu0 %v5136_v2  ;;  %3884 = vmatpush.bf16.msrb.mxu3 %v5044_v6  ;;  %v5496_v2 = vld [vmem:[%s7192_s6 + $0x18] sm:$0xff] }
 0xf06   : > { %v5508_v6 = vld [vmem:[%s7192_s6 + $0x78] sm:$0xff] }
 0xf08   : > { %3870 = vmatpush.bf16.msra.mxu1 %v4960_v30  ;;  %v5511_v30 = vld [vmem:[%s7192_s6 + $0x90] sm:$0xff] }
 0xf0a   : > { %v3314_v32 = vpop.f32.mrf.mxu1 }
 0xf0b   : > { %v6991_v35 = vadd.f32 %v3314_v32, %v3296_v62 }
 0xf0c   : > { %3871 = vmatpush.bf16.msra.mxu1 %v4948_v28 }
 0xf0d   : > { %v3344_v44 = vmul.f32 %v6991_v35, %v6991_v35 }
 0xf0f   : > { %v3347_v41 = vmul.f32 %v3344_v44, %v6991_v35 }
 0xf10   : > { %v3327_v55 = vpop.f32.mrf.mxu2 }
 0xf11   : > { %v3350_v48 = vmul.f32 0.044715, %v3347_v41  ;;  %v7046_v1 = vadd.f32 %v3327_v55, %v3297_v42  ;;  %v3340_v5 = vpop.f32.mrf.mxu3  ;;  %v5175_v42 = vld [vmem:[%s7190_s4 + $0x290] sm:$0xf] }
 0xf12   : > { %v3341_v4 = vadd.f32 %v3340_v5, %v3298_v46  ;;  %v3316_v63 = vpop.f32.mrf.mxu1  ;;  %v5492_v46 = vld [vmem:[%s7190_s4 + $0x298] sm:$0xf0]  ;;  %v5497_v5 = vld [vmem:[%s7192_s6 + $0x20] sm:$0xff] }
 0xf13   : > { %v3353_v10 = vadd.f32 %v3350_v48, %v6991_v35  ;;  %v3345_v22 = vmul.f32 %v7046_v1, %v7046_v1  ;;  %v5176_v44 = vor.u32 %v5492_v46, %v5175_v42  ;;  %v5140_v48 = vor.u32 %v5483_v58, %v5139_v57  ;;  %v5506_v63 = vld [vmem:[%s7192_s6 + $0x68] sm:$0xff] }
 0xf14   : > { %v3346_v16 = vmul.f32 %v3341_v4, %v3341_v4 }
 0xf15   : > { %v3356_v62 = vmul.f32 0.7978846, %v3353_v10  ;;  %v3348_v36 = vmul.f32 %v3345_v22, %v7046_v1  ;;  %v5512_v10 = vld [vmem:[%s7192_s6 + $0x98] sm:$0xff]  ;;  %v5503_v22 = vld [vmem:[%s7192_s6 + $0x50] sm:$0xff] }
 0xf16   : > { %v3349_v29 = vmul.f32 %v3346_v16, %v3341_v4  ;;  %v5502_v16 = vld [vmem:[%s7192_s6 + $0x48] sm:$0xff] }
 0xf17   : > { %5629 = vtanh.f32 %v3356_v62  ;;  %v3351_v25 = vmul.f32 0.044715, %v3348_v36  ;;  %v5510_v62 = vld [vmem:[%s7192_s6 + $0x88] sm:$0xff] }
 0xf18   : > { %v3352_v38 = vmul.f32 0.044715, %v3349_v29  ;;  %v3329_v27 = vpop.f32.mrf.mxu2  ;;  %v5501_v29 = vld [vmem:[%s7192_s6 + $0x40] sm:$0xff] }
 0xf19   : > { %v3354_v59 = vadd.f32 %v3351_v25, %v7046_v1  ;;  %v3342_v32 = vpop.f32.mrf.mxu3 }
 0xf1a   : > { %v3355_v23 = vadd.f32 %v3352_v38, %v3341_v4  ;;  %v4833_v38 = vld [vmem:[%s7191_s5 + $0x3] sm:$0x7] }
 0xf1b   : > { %v3357_v34 = vmul.f32 0.7978846, %v3354_v59  ;;  %v3156_v27 = vperm.slane %v4833_v38, 0 }
 0xf1c   : > { %v3358_v37 = vmul.f32 0.7978846, %v3355_v23 }
 0xf1d   : > { %v5630_v26 = vpop.eup %5629  ;;  %5631 = vtanh.f32 %v3357_v34  ;;  %v3175_v23 = vadd.f32 %v6861_v19, %v3156_v27 }
 0xf1e   : > { %5633 = vtanh.f32 %v3358_v37  ;;  %v3362_v39 = vadd.f32 1.0, %v5630_v26 }
 0xf20   : > { %v3365_v40 = vmul.f32 0.5, %v3362_v39 }
 0xf22   : > { %v3368_v43 = vmul.f32 %v3365_v40, %v6991_v35  ;;  %v5164_v35 = vor.u32 %v5489_v18, %v5163_v47  ;;  %v3157_v47 = vperm.slane %v4833_v38, 1 }
 0xf23   : > { %v5632_v9 = vpop.eup %5631 }
 0xf24   : > { %v5634_v11 = vpop.eup %5633  ;;  %v3371_v15 = vpack.c.bf16 %v3368_v43, %v3368_v43  ;;  %v3363_v21 = vadd.f32 1.0, %v5632_v9  ;;  %v3188_v52 = vadd.f32 %v6863_v31, %v3157_v47  ;;  %v3949_v31 = vld [vmem:[%s7193_s7] sm:$0x1] }
 0xf25   : > { %v3364_v49 = vadd.f32 1.0, %v5634_v11  ;;  %v3778_v11 = vperm.slane %v4936_v8, 1 }
 0xf26   : > { %3794 = vmatmul.bf16.vlgmr.msra.gmra.mxu0 %v3371_v15  ;;  %3833 = vmatmul.bf16.vlgmr.msra.gmra.mxu3 %v3371_v15  ;;  %v3366_v50 = vmul.f32 0.5, %v3363_v21 }
 0xf27   : > { %v3367_v51 = vmul.f32 0.5, %v3364_v49  ;;  %3894 = vmatpush.bf16.msra.mxu0 %v5176_v44  ;;  %v3779_v44 = vperm.slane %v4936_v8, 2  ;;  %v3158_v49 = vperm.slane %v4833_v38, 2 }
 0xf28   : > { %v3369_v41 = vmul.f32 %v3366_v50, %v7046_v1  ;;  %v5498_v1 = vld [vmem:[%s7192_s6 + $0x28] sm:$0xff] }
 0xf29   : > { %v3370_v53 = vmul.f32 %v3367_v51, %v3341_v4  ;;  %v5494_v4 = vld [vmem:[%s7192_s6 + $0x8] sm:$0xff] }
 0xf2a   : > { %v3372_v33 = vpack.c.bf16 %v3369_v41, %v3369_v41 }
 0xf2b   : > { %v3373_v55 = vpack.c.bf16 %v3370_v53, %v3370_v53  ;;  %3895 = vmatpush.bf16.msra.mxu0 %v5164_v35 }
 0xf2c   : > { %3807 = vmatmul.bf16.vlgmr.msrb.gmra.mxu1 %v3372_v33 }
 0xf2d   : > { %5177 = vmatmul.msk.bf16.vlgmr.msrb.gmra.mxu2 %vm536_vm8, %v3373_v55  ;;  %4103 = vmatpush.bf16.msrb.mxu1 %v5512_v10 }
 0xf2e   : > { %4073 = vmatpush.bf16.msrb.mxu2 %v5500_v54 }
 0xf2f   : > { %3896 = vmatpush.bf16.msra.mxu0 %v5152_v56 }
 0xf31   : > { %4104 = vmatpush.bf16.msrb.mxu1 %v5511_v30 }
 0xf32   : > { %4074 = vmatpush.bf16.msrb.mxu2 %v5499_v14 }
 0xf33   : > { %3897 = vmatpush.bf16.msra.mxu0 %v5140_v48 }
 0xf35   : > { %4105 = vmatpush.bf16.msrb.mxu1 %v5510_v62 }
 0xf36   : > { %5178 = vmatmul.msk.bf16.vlgmr.msrb.gmra.mxu0 %vm536_vm8, %v3373_v55  ;;  %3885 = vmatmul.bf16.vlgmr.msrb.gmra.mxu3 %v3372_v33 }
 0xf37   : > { %4075 = vmatpush.bf16.msrb.mxu2 %v5498_v1  ;;  %4086 = vmatpush.bf16.msrb.mxu0 %v5508_v6 }
 0xf39   : > { %4106 = vmatpush.bf16.msrb.mxu1 %v5509_v24 }
 0xf3b   : > { %4076 = vmatpush.bf16.msrb.mxu2 %v5497_v5  ;;  %4087 = vmatpush.bf16.msrb.mxu0 %v5507_v0 }
 0xf3c   : > { %3872 = vmatmul.bf16.vlgmr.msra.gmra.mxu1 %v3371_v15 }
 0xf3d   : > { %3846 = vmatmul.bf16.vlgmr.msra.gmra.mxu2 %v3372_v33  ;;  %v3201_v33 = vadd.f32 %v6829_v17, %v3158_v49 }
 0xf3f   : > { %4077 = vmatpush.bf16.msrb.mxu2 %v5496_v2  ;;  %4088 = vmatpush.bf16.msrb.mxu0 %v5506_v63 }
 0xf43   : > { %4078 = vmatpush.bf16.msrb.mxu2 %v5495_v20  ;;  %4089 = vmatpush.bf16.msrb.mxu0 %v5505_v7 }
 0xf46   : > { %5179 = vmatmul.msk.bf16.vlgmr.msra.gmra.mxu0 %vm536_vm8, %v3373_v55 }
 0xf47   : > { %4079 = vmatpush.bf16.msrb.mxu2 %v5494_v4  ;;  %4090 = vmatpush.bf16.msrb.mxu0 %v5504_v3 }
 0xf4b   : > { %4080 = vmatpush.bf16.msrb.mxu2 %v5493_v12  ;;  %4091 = vmatpush.bf16.msrb.mxu0 %v5503_v22 }
 0xf4f   : > { %4092 = vmatpush.bf16.msrb.mxu0 %v5502_v16 }
 0xf53   : > { %4093 = vmatpush.bf16.msrb.mxu0 %v5501_v29 }
 0xfa3   : > { %v3795_v36 = vpop.f32.mrf.mxu0 }
 0xfa4   : > { %v3796_v28 = vadd.f32 %v3795_v36, %v3777_v61 }
 0xfa9   : > { %v3808_v25 = vpop.f32.mrf.mxu1  ;;  %v3834_v13 = vpop.f32.mrf.mxu3 }
 0xfaa   : > { %v3809_v59 = vadd.f32 %v3808_v25, %v3796_v28  ;;  %v3835_v18 = vadd.f32 %v3834_v13, %v3778_v11 }
 0xfab   : > { %v3797_v60 = vpop.f32.mrf.mxu0 }
 0xfb0   : > { %v3821_v32 = vpop.f32.mrf.mxu2 }
 0xfb1   : > { %v3822_v34 = vadd.f32 %v3821_v32, %v3809_v59  ;;  %v3810_v37 = vpop.f32.mrf.mxu1  ;;  %v3836_v26 = vpop.f32.mrf.mxu3 }
 0xfb3   : > { %v3903_v39 = vadd.f32 %v3822_v34, %v3175_v23  ;;  %v3860_v40 = vpop.f32.mrf.mxu0 }
 0xfb5   : > { %v3906_v42 = vpack.c.bf16 %v3903_v39, %v3903_v39 }
 0xfb7   : > { %4081 = vmatmul.bf16.vlgmr.msrb.gmra.mxu2 %v3906_v42 }
 0xfb8   : > { %v3823_v46 = vpop.f32.mrf.mxu2 }
 0xfb9   : > { %v3873_v43 = vpop.f32.mrf.mxu1  ;;  %v3886_v9 = vpop.f32.mrf.mxu3 }
 0xfba   : > { %v3874_v21 = vadd.f32 %v3873_v43, %v3779_v44 }
 0xfbb   : > { %v3862_v15 = vpop.f32.mrf.mxu0 }
 0xfbc   : > { %v3887_v41 = vadd.f32 %v3886_v9, %v3874_v21 }
 0xfc0   : > { %v3847_v50 = vpop.f32.mrf.mxu2 }
 0xfc1   : > { %v3848_v51 = vadd.f32 %v3847_v50, %v3835_v18  ;;  %v3875_v19 = vpop.f32.mrf.mxu1  ;;  %v3888_v35 = vpop.f32.mrf.mxu3 }
 0xfc3   : > { %v3861_v45 = vadd.f32 %v3860_v40, %v3848_v51  ;;  %v3899_v53 = vpop.f32.mrf.mxu0 }
 0xfc4   : > { %v3900_v54 = vadd.f32 %v3899_v53, %v3887_v41 }
 0xfc5   : > { %v3904_v55 = vadd.f32 %v3861_v45, %v3188_v52 }
 0xfc6   : > { %v3905_v56 = vadd.f32 %v3900_v54, %v3201_v33 }
 0xfc7   : > { %v3907_v57 = vpack.c.bf16 %v3904_v55, %v3904_v55 }
 0xfc8   : > { %v3908_v58 = vpack.c.bf16 %v3905_v56, %v3905_v56  ;;  %v3849_v14 = vpop.f32.mrf.mxu2 }
 0xfc9   : > { %4094 = vmatmul.bf16.vlgmr.msrb.gmra.mxu0 %v3907_v57 }
 0xfca   : > { %5260 = vmatmul.msk.bf16.vlgmr.msrb.gmra.mxu1 %vm536_vm8, %v3908_v58 }
 0xfcb   : > { %v3901_v48 = vpop.f32.mrf.mxu0 }
0x103a   : > { %v4082_v1 = vpop.f32.mrf.mxu2 }
0x103b   : > { %v4083_v2 = vadd.f32 %v4082_v1, %v3949_v31 }
0x1042   : > { %v4084_v5 = vpop.f32.mrf.mxu2 }
0x1046   : > { %v4095_v6 = vpop.f32.mrf.mxu0 }
0x1047   : > { %v4096_v17 = vadd.f32 %v4095_v6, %v4083_v2  ;;  %v4108_v20 = vpop.f32.mrf.mxu1 }
0x1049   : > { %v4109_v0 = vadd.f32 %v4108_v20, %v4096_v17 }
0x104b   : > { %4113 = vst.msk [vmem:[%s321_s12] sm:$0x1] %vm4112_vm1, %v4109_v0 }
0x104e   : > { %v4097_v4 = vpop.f32.mrf.mxu0 }
0x104f   : > { %v4110_v63 = vpop.f32.mrf.mxu1 }
0x1050 PF: > { %s18_s27 = sadd.s32 1, %s5641_s27  }
0x1051   : > { %p15_p4 = scmp.ge.s32.totalorder %s18_s27, 4  }
0x1053   :  { %17 = sbr.rel (!%p15_p4) target bundleno = 1 (0x1), region = 107 }

</bundles_post_ra>
